<compile_context>
chip_gen: v6e
topology: v6e:2x2x1
jax: 0.10.0
libtpu: 0.0.40
codegen_flags: <defaults>
</compile_context>

<pallas_src>
import functools

import jax
import jax.numpy as jnp
from jax import lax
from jax.experimental import pallas as pl
from jax.experimental.pallas import tpu as pltpu

EPS = 1e-5
C_IN_PAD = 8            # input channels padded 3 -> 8 (sublane-aligned taps)
C_OUT_PAD = 8           # final conv output channels padded n_out -> 8 sublanes
G_GUARD = 128           # zero guard lanes in front of each activation slab
NEG_BIG = -1e30         # bias of padded output channels -> exp underflows to 0
MATMUL_DTYPE = jnp.float32   # keep f32: self-check vs. f32 reference at 2e-3


def _round_up(x, m):
    return (x + m - 1) // m * m


def bakenet_kernel(x_ref, mask_ref,
                   w1_ref, b1_ref, g1_ref, be1_ref,
                   w2_ref, b2_ref, g2_ref, be2_ref,
                   w3_ref, b3_ref, g3_ref, be3_ref,
                   w4_ref, b4_ref,
                   out_ref,
                   act16_ref, act32_ref, col_ref,
                   *, tap_starts, l_out, guard, inv_m):
    # Zero the reusable activation slabs ONCE: only the guard / tail lanes need
    # to stay zero (the [guard, guard+l_out) interior is fully overwritten by
    # every block), but a whole-slab fill is two cheap one-time stores.
    act16_ref[...] = jnp.zeros_like(act16_ref)
    act32_ref[...] = jnp.zeros_like(act32_ref)

    mask = mask_ref[...]                                    # (1, l_out)

    def im2col(src_ref):
        """(Cin, L_tot) activation -> (9*Cin, l_out) column slab in col_ref.

        Each tap is a full-lane-width slice at a static +/- lane offset
        (lane shift on the XLU) and an unmasked, lane-dense store.
        """
        cin = src_ref.shape[0]
        for t, s in enumerate(tap_starts):
            col_ref[t * cin:(t + 1) * cin, :] = (
                src_ref[:, s:s + l_out].astype(col_ref.dtype))
        return col_ref[:9 * cin, :]

    def conv(src_ref, w_ref, b_ref):
        col = im2col(src_ref)                               # (9*Cin, l_out)
        return jnp.dot(w_ref[...], col,
                       preferred_element_type=jnp.float32) + b_ref[...]

    def relu_bn(y, g_ref, be_ref):
        """ReLU + training-mode BatchNorm, one pass, folded into scale/shift.

        Halo / tail columns are zeroed by `mask` so they do not bias the
        per-channel statistics; the final mask keeps the halo exactly zero
        for the next conv's zero padding.
        """
        yr = jnp.maximum(y, 0.0) * mask
        m = jnp.sum(yr, axis=1, keepdims=True) * inv_m                    # (C, 1)
        v = jnp.sum(yr * yr, axis=1, keepdims=True) * inv_m - m * m       # (C, 1)
        scale = g_ref[...] * lax.rsqrt(v + EPS)
        shift = be_ref[...] - m * scale
        return (yr * scale + shift) * mask

    # --- block 1: Conv(8->16) + ReLU + BN(16) ---
    y = relu_bn(conv(x_ref, w1_ref, b1_ref), g1_ref, be1_ref)
    act16_ref[:, guard:guard + l_out] = y                   # 128-aligned store

    # --- block 2: Conv(16->32) + ReLU + BN(32) ---
    y = relu_bn(conv(act16_ref, w2_ref, b2_ref), g2_ref, be2_ref)
    act32_ref[:, guard:guard + l_out] = y

    # --- block 3: Conv(32->16) + ReLU + BN(16)  (reuses act16) ---
    y = relu_bn(conv(act32_ref, w3_ref, b3_ref), g3_ref, be3_ref)
    act16_ref[:, guard:guard + l_out] = y

    # --- block 4: Conv(16 -> 8-padded) + Softmax over channels (sublanes) ---
    # Padded channel rows have zero weights and -1e30 bias, so their exp() is
    # exactly 0 and the 8-way softmax equals the n_out-way softmax.
    logits = conv(act16_ref, w4_ref, b4_ref)                # (8, l_out), f32
    logits = logits - jnp.max(logits, axis=0, keepdims=True)
    e = jnp.exp(logits)
    denom = jnp.sum(e, axis=0, keepdims=True)
    out_ref[...] = e * (1.0 / denom)                        # exact reciprocal


def _wt(w, cin_pad=None):
    """(3,3,Cin,Cout) HWIO -> (Cout, 9*Cin); column index = (ky*3+kx)*Cin + c."""
    if cin_pad is not None:
        w = jnp.pad(w, ((0, 0), (0, 0), (0, cin_pad - w.shape[2]), (0, 0)))
    cout = w.shape[3]
    return jnp.transpose(w, (3, 0, 1, 2)).reshape(cout, -1).astype(MATMUL_DTYPE)


def _colb(b):
    """(1, C) row params -> (C, 1) columns for lane-broadcast in the kernel."""
    return b.reshape(-1, 1).astype(jnp.float32)


def bakenet_forward(x_nchw, p, n_out=2):
    """x_nchw: (N, 3, H, W) f32 -> (N, n_out, H, W) softmax probabilities."""
    assert n_out <= C_OUT_PAD
    x = x_nchw.astype(jnp.float32)
    N, Cin, H, W = x.shape
    Hp, Wp = H + 2, W + 2
    l_core = N * Hp * Wp                      # padded pixels with real meaning
    l_out = _round_up(l_core, 128)            # lane-dense output / col width
    halo = Wp + 1                             # max |tap offset| in lanes
    l_tot = _round_up(G_GUARD + l_out + halo, 128)

    # Input -> channels-as-sublanes, pixels-as-lanes: (C_IN_PAD, l_tot).
    xp = jnp.pad(x, ((0, 0), (0, C_IN_PAD - Cin), (1, 1), (1, 1)))  # (N,8,Hp,Wp)
    xp = jnp.transpose(xp, (1, 0, 2, 3)).reshape(C_IN_PAD, l_core)
    xp = jnp.pad(xp, ((0, 0), (G_GUARD, l_tot - G_GUARD - l_core)))

    # Validity mask over the l_out output columns (1 = real interior pixel).
    idx = jnp.arange(l_out)
    hp = (idx // Wp) % Hp
    wp = idx % Wp
    mask = ((idx < l_core) & (hp >= 1) & (hp <= H) & (wp >= 1) & (wp <= W))
    mask = mask.astype(jnp.float32).reshape(1, l_out)

    # Conv weights -> (Cout, 9*Cin); final conv padded to 8 output channels.
    w1t = _wt(p["w1"], C_IN_PAD)                                   # (16, 72)
    w2t = _wt(p["w2"])                                             # (32, 144)
    w3t = _wt(p["w3"])                                             # (16, 288)
    w4t = _wt(jnp.pad(p["w4"], ((0, 0), (0, 0), (0, 0), (0, C_OUT_PAD - n_out))))
    b4c = jnp.concatenate(
        [p["b4"].reshape(-1),
         jnp.full((C_OUT_PAD - n_out,), NEG_BIG, jnp.float32)]).reshape(-1, 1)

    inputs = (
        xp, mask,
        w1t, _colb(p["b1"]), _colb(p["g1"]), _colb(p["be1"]),
        w2t, _colb(p["b2"]), _colb(p["g2"]), _colb(p["be2"]),
        w3t, _colb(p["b3"]), _colb(p["g3"]), _colb(p["be3"]),
        w4t, b4c,
    )

    # Static tap offsets: tap (ky, kx) starts at lane G + (ky-1)*Wp + (kx-1).
    tap_starts = tuple(G_GUARD + (ky - 1) * Wp + (kx - 1)
                       for ky in range(3) for kx in range(3))

    kernel = functools.partial(
        bakenet_kernel, tap_starts=tap_starts, l_out=l_out,
        guard=G_GUARD, inv_m=1.0 / float(N * H * W))

    vmem_spec = pl.BlockSpec(memory_space=pltpu.MemorySpace.VMEM)

    # VMEM limit: actual residency + headroom, capped per generation at ~75%
    # of the physical VMEM (64 MiB fallback == v7x, the smallest current gen).
    f32b = 4
    resident = (sum(int(a.size) * a.dtype.itemsize for a in inputs)
                + C_OUT_PAD * l_out * f32b                      # output slab
                + (16 + 32) * l_tot * f32b                      # act scratches
                + 9 * 32 * l_out * jnp.dtype(MATMUL_DTYPE).itemsize)  # col slab
    try:
        phys = int(pltpu.get_tpu_info().vmem_capacity_bytes)
    except Exception:
        phys = 64 << 20
    vmem_limit = int(min(int(0.75 * phys),
                         max(3 * resident + (8 << 20), 16 << 20)))

    out = pl.pallas_call(
        kernel,
        out_shape=jax.ShapeDtypeStruct((C_OUT_PAD, l_out), jnp.float32),
        in_specs=[vmem_spec] * len(inputs),
        out_specs=vmem_spec,
        scratch_shapes=[
            pltpu.VMEM((16, l_tot), jnp.float32),       # blocks 1 & 3 activations
            pltpu.VMEM((32, l_tot), jnp.float32),       # block 2 activations
            pltpu.VMEM((9 * 32, l_out), MATMUL_DTYPE),  # shared im2col slab
        ],
        compiler_params=pltpu.CompilerParams(vmem_limit_bytes=vmem_limit),
    )(*inputs)

    probs = out[:, :l_core].reshape(C_OUT_PAD, N, Hp, Wp)[:n_out, :, 1:1 + H, 1:1 + W]
    return jnp.transpose(probs, (1, 0, 2, 3))           # back to NCHW


# ----------------------------- reference (pure JAX) -----------------------------
def bakenet_ref(x_nchw, p):
    x = jnp.transpose(x_nchw, (0, 2, 3, 1)).astype(jnp.float32)

    def conv(x, w, b):
        y = lax.conv_general_dilated(x, w, (1, 1), "SAME",
                                     dimension_numbers=("NHWC", "HWIO", "NHWC"))
        return y + b.reshape(1, 1, 1, -1)

    def relu_bn(y, g, be):
        y = jax.nn.relu(y)
        m = jnp.mean(y, axis=(0, 1, 2), keepdims=True)
        v = jnp.mean((y - m) ** 2, axis=(0, 1, 2), keepdims=True)
        return (y - m) / jnp.sqrt(v + EPS) * g.reshape(1, 1, 1, -1) + be.reshape(1, 1, 1, -1)

    y = relu_bn(conv(x, p["w1"], p["b1"]), p["g1"], p["be1"])
    y = relu_bn(conv(y, p["w2"], p["b2"]), p["g2"], p["be2"])
    y = relu_bn(conv(y, p["w3"], p["b3"]), p["g3"], p["be3"])
    y = conv(y, p["w4"], p["b4"])
    y = jax.nn.softmax(y, axis=-1)
    return jnp.transpose(y, (0, 3, 1, 2))


# ----------------------------- deterministic params -----------------------------
def init_params(key, n_out=2):
    chans = [(3, 16), (16, 32), (32, 16), (16, n_out)]
    keys = jax.random.split(key, 3 * len(chans))
    p = {}
    for i, (cin, cout) in enumerate(chans):
        kw, kb, kg = keys[3 * i], keys[3 * i + 1], keys[3 * i + 2]
        scale = 1.0 / (9.0 * cin) ** 0.5
        p[f"w{i+1}"] = jax.random.normal(kw, (3, 3, cin, cout), jnp.float32) * scale
        p[f"b{i+1}"] = jax.random.normal(kb, (1, cout), jnp.float32) * 0.05
        if i < 3:   # BN only after the first three convs
            p[f"g{i+1}"] = 1.0 + 0.1 * jax.random.normal(kg, (1, cout), jnp.float32)
            p[f"be{i+1}"] = 0.05 * jax.random.normal(kg, (1, cout), jnp.float32) + 0.01
    return p


if __name__ == "__main__":
    key = jax.random.PRNGKey(0)
    kx, kp = jax.random.split(key)

    N, C, H, W = 2, 3, 16, 16           # BakeNet expects 3 input channels
    x = jax.random.normal(kx, (N, C, H, W), jnp.float32)
    params = init_params(kp, n_out=2)

    out = jax.block_until_ready(bakenet_forward(x, params))
    ref = jax.block_until_ready(bakenet_ref(x, params))

    assert out.shape == (N, 2, H, W), out.shape
    # exact reciprocal in the kernel -> channel probabilities sum to ~1
    assert jnp.allclose(jnp.sum(out, axis=1), 1.0, atol=1e-3)
    assert jnp.allclose(out, ref, atol=2e-3, rtol=2e-3), float(jnp.max(jnp.abs(out - ref)))

    print("KERNEL_OK")
</pallas_src>

<mosaic_0001>
module attributes {stable_mosaic.version = 11 : i64} {
  func.func @bakenet_kernel(%arg0: memref<8x1024xf32, #tpu.memory_space<vmem>>, %arg1: memref<1x768xf32, #tpu.memory_space<vmem>>, %arg2: memref<16x72xf32, #tpu.memory_space<vmem>>, %arg3: memref<16x1xf32, #tpu.memory_space<vmem>>, %arg4: memref<16x1xf32, #tpu.memory_space<vmem>>, %arg5: memref<16x1xf32, #tpu.memory_space<vmem>>, %arg6: memref<32x144xf32, #tpu.memory_space<vmem>>, %arg7: memref<32x1xf32, #tpu.memory_space<vmem>>, %arg8: memref<32x1xf32, #tpu.memory_space<vmem>>, %arg9: memref<32x1xf32, #tpu.memory_space<vmem>>, %arg10: memref<16x288xf32, #tpu.memory_space<vmem>>, %arg11: memref<16x1xf32, #tpu.memory_space<vmem>>, %arg12: memref<16x1xf32, #tpu.memory_space<vmem>>, %arg13: memref<16x1xf32, #tpu.memory_space<vmem>>, %arg14: memref<8x144xf32, #tpu.memory_space<vmem>>, %arg15: memref<8x1xf32, #tpu.memory_space<vmem>>, %arg16: memref<8x768xf32, #tpu.memory_space<vmem>>, %arg17: memref<16x1024xf32, #tpu.memory_space<vmem>>, %arg18: memref<32x1024xf32, #tpu.memory_space<vmem>>, %arg19: memref<288x768xf32, #tpu.memory_space<vmem>>) attributes {dimension_semantics = [], scalar_prefetch = 0 : i64, scratch_operands = 3 : i64, tpu.core_type = #tpu.core_type<tc>} {
    %cst = arith.constant 0.000000e+00 : f32
    %0 = vector.broadcast %cst : f32 to vector<16x1024xf32>
    %c0 = arith.constant 0 : index
    %c0_0 = arith.constant 0 : index
    %1 = vector.load %arg17[%c0, %c0_0] : memref<16x1024xf32, #tpu.memory_space<vmem>>, vector<16x1024xf32>
    tpu.vector_store %arg17[%c0, %c0_0], %0 {strides = array<i32>} : memref<16x1024xf32, #tpu.memory_space<vmem>>, vector<16x1024xf32>,
    %cst_1 = arith.constant 0.000000e+00 : f32
    %2 = vector.broadcast %cst_1 : f32 to vector<32x1024xf32>
    %c0_2 = arith.constant 0 : index
    %c0_3 = arith.constant 0 : index
    %3 = vector.load %arg18[%c0_2, %c0_3] : memref<32x1024xf32, #tpu.memory_space<vmem>>, vector<32x1024xf32>
    tpu.vector_store %arg18[%c0_2, %c0_3], %2 {strides = array<i32>} : memref<32x1024xf32, #tpu.memory_space<vmem>>, vector<32x1024xf32>,
    %c0_4 = arith.constant 0 : index
    %c0_5 = arith.constant 0 : index
    %4 = vector.load %arg1[%c0_4, %c0_5] : memref<1x768xf32, #tpu.memory_space<vmem>>, vector<1x768xf32>
    %c0_6 = arith.constant 0 : index
    %c109 = arith.constant 109 : index
    %5 = vector.load %arg0[%c0_6, %c109] : memref<8x1024xf32, #tpu.memory_space<vmem>>, vector<8x768xf32>
    %c0_7 = arith.constant 0 : index
    %c0_8 = arith.constant 0 : index
    %6 = vector.load %arg19[%c0_7, %c0_8] : memref<288x768xf32, #tpu.memory_space<vmem>>, vector<8x768xf32>
    tpu.vector_store %arg19[%c0_7, %c0_8], %5 {strides = array<i32>} : memref<288x768xf32, #tpu.memory_space<vmem>>, vector<8x768xf32>,
    %c0_9 = arith.constant 0 : index
    %c110 = arith.constant 110 : index
    %7 = vector.load %arg0[%c0_9, %c110] : memref<8x1024xf32, #tpu.memory_space<vmem>>, vector<8x768xf32>
    %c8 = arith.constant 8 : index
    %c0_10 = arith.constant 0 : index
    %8 = vector.load %arg19[%c8, %c0_10] : memref<288x768xf32, #tpu.memory_space<vmem>>, vector<8x768xf32>
    tpu.vector_store %arg19[%c8, %c0_10], %7 {strides = array<i32>} : memref<288x768xf32, #tpu.memory_space<vmem>>, vector<8x768xf32>,
    %c0_11 = arith.constant 0 : index
    %c111 = arith.constant 111 : index
    %9 = vector.load %arg0[%c0_11, %c111] : memref<8x1024xf32, #tpu.memory_space<vmem>>, vector<8x768xf32>
    %c16 = arith.constant 16 : index
    %c0_12 = arith.constant 0 : index
    %10 = vector.load %arg19[%c16, %c0_12] : memref<288x768xf32, #tpu.memory_space<vmem>>, vector<8x768xf32>
    tpu.vector_store %arg19[%c16, %c0_12], %9 {strides = array<i32>} : memref<288x768xf32, #tpu.memory_space<vmem>>, vector<8x768xf32>,
    %c0_13 = arith.constant 0 : index
    %c127 = arith.constant 127 : index
    %11 = vector.load %arg0[%c0_13, %c127] : memref<8x1024xf32, #tpu.memory_space<vmem>>, vector<8x768xf32>
    %c24 = arith.constant 24 : index
    %c0_14 = arith.constant 0 : index
    %12 = vector.load %arg19[%c24, %c0_14] : memref<288x768xf32, #tpu.memory_space<vmem>>, vector<8x768xf32>
    tpu.vector_store %arg19[%c24, %c0_14], %11 {strides = array<i32>} : memref<288x768xf32, #tpu.memory_space<vmem>>, vector<8x768xf32>,
    %c0_15 = arith.constant 0 : index
    %c128 = arith.constant 128 : index
    %13 = vector.load %arg0[%c0_15, %c128] : memref<8x1024xf32, #tpu.memory_space<vmem>>, vector<8x768xf32>
    %c32 = arith.constant 32 : index
    %c0_16 = arith.constant 0 : index
    %14 = vector.load %arg19[%c32, %c0_16] : memref<288x768xf32, #tpu.memory_space<vmem>>, vector<8x768xf32>
    tpu.vector_store %arg19[%c32, %c0_16], %13 {strides = array<i32>} : memref<288x768xf32, #tpu.memory_space<vmem>>, vector<8x768xf32>,
    %c0_17 = arith.constant 0 : index
    %c129 = arith.constant 129 : index
    %15 = vector.load %arg0[%c0_17, %c129] : memref<8x1024xf32, #tpu.memory_space<vmem>>, vector<8x768xf32>
    %c40 = arith.constant 40 : index
    %c0_18 = arith.constant 0 : index
    %16 = vector.load %arg19[%c40, %c0_18] : memref<288x768xf32, #tpu.memory_space<vmem>>, vector<8x768xf32>
    tpu.vector_store %arg19[%c40, %c0_18], %15 {strides = array<i32>} : memref<288x768xf32, #tpu.memory_space<vmem>>, vector<8x768xf32>,
    %c0_19 = arith.constant 0 : index
    %c145 = arith.constant 145 : index
    %17 = vector.load %arg0[%c0_19, %c145] : memref<8x1024xf32, #tpu.memory_space<vmem>>, vector<8x768xf32>
    %c48 = arith.constant 48 : index
    %c0_20 = arith.constant 0 : index
    %18 = vector.load %arg19[%c48, %c0_20] : memref<288x768xf32, #tpu.memory_space<vmem>>, vector<8x768xf32>
    tpu.vector_store %arg19[%c48, %c0_20], %17 {strides = array<i32>} : memref<288x768xf32, #tpu.memory_space<vmem>>, vector<8x768xf32>,
    %c0_21 = arith.constant 0 : index
    %c146 = arith.constant 146 : index
    %19 = vector.load %arg0[%c0_21, %c146] : memref<8x1024xf32, #tpu.memory_space<vmem>>, vector<8x768xf32>
    %c56 = arith.constant 56 : index
    %c0_22 = arith.constant 0 : index
    %20 = vector.load %arg19[%c56, %c0_22] : memref<288x768xf32, #tpu.memory_space<vmem>>, vector<8x768xf32>
    tpu.vector_store %arg19[%c56, %c0_22], %19 {strides = array<i32>} : memref<288x768xf32, #tpu.memory_space<vmem>>, vector<8x768xf32>,
    %c0_23 = arith.constant 0 : index
    %c147 = arith.constant 147 : index
    %21 = vector.load %arg0[%c0_23, %c147] : memref<8x1024xf32, #tpu.memory_space<vmem>>, vector<8x768xf32>
    %c64 = arith.constant 64 : index
    %c0_24 = arith.constant 0 : index
    %22 = vector.load %arg19[%c64, %c0_24] : memref<288x768xf32, #tpu.memory_space<vmem>>, vector<8x768xf32>
    tpu.vector_store %arg19[%c64, %c0_24], %21 {strides = array<i32>} : memref<288x768xf32, #tpu.memory_space<vmem>>, vector<8x768xf32>,
    %c0_25 = arith.constant 0 : index
    %c0_26 = arith.constant 0 : index
    %23 = vector.load %arg19[%c0_25, %c0_26] : memref<288x768xf32, #tpu.memory_space<vmem>>, vector<72x768xf32>
    %c0_27 = arith.constant 0 : index
    %c0_28 = arith.constant 0 : index
    %24 = vector.load %arg2[%c0_27, %c0_28] : memref<16x72xf32, #tpu.memory_space<vmem>>, vector<16x72xf32>
    %cst_29 = arith.constant dense<0.000000e+00> : vector<16x768xf32>
    %25 = tpu.matmul %24, %23, %cst_29 {dimension_numbers = #tpu.dot_dimension_numbers<[1], [0], [0], [1], [0, 0, 1, 1], [], []>} : vector<16x72xf32>, vector<72x768xf32>, vector<16x768xf32> -> vector<16x768xf32>
    %c0_30 = arith.constant 0 : index
    %c0_31 = arith.constant 0 : index
    %26 = vector.load %arg3[%c0_30, %c0_31] : memref<16x1xf32, #tpu.memory_space<vmem>>, vector<16x1xf32>
    %27 = vector.broadcast %26 : vector<16x1xf32> to vector<16x768xf32>
    %28 = arith.addf %25, %27 : vector<16x768xf32>
    %cst_32 = arith.constant 0.000000e+00 : f32
    %29 = vector.broadcast %cst_32 : f32 to vector<16x768xf32>
    %30 = arith.maximumf %28, %29 : vector<16x768xf32>
    %31 = vector.broadcast %4 : vector<1x768xf32> to vector<16x768xf32>
    %32 = arith.mulf %30, %31 : vector<16x768xf32>
    %cst_33 = arith.constant dense<0.000000e+00> : vector<16xf32>
    %33 = vector.multi_reduction <add>, %32, %cst_33 [1] : vector<16x768xf32> to vector<16xf32>
    %34 = vector.shape_cast %33 : vector<16xf32> to vector<16x1xf32>
    %cst_34 = arith.constant 0.001953125 : f32
    %35 = vector.broadcast %cst_34 : f32 to vector<16x1xf32>
    %36 = arith.mulf %34, %35 : vector<16x1xf32>
    %37 = arith.mulf %32, %32 : vector<16x768xf32>
    %cst_35 = arith.constant dense<0.000000e+00> : vector<16xf32>
    %38 = vector.multi_reduction <add>, %37, %cst_35 [1] : vector<16x768xf32> to vector<16xf32>
    %39 = vector.shape_cast %38 : vector<16xf32> to vector<16x1xf32>
    %cst_36 = arith.constant 0.001953125 : f32
    %40 = vector.broadcast %cst_36 : f32 to vector<16x1xf32>
    %41 = arith.mulf %39, %40 : vector<16x1xf32>
    %42 = arith.mulf %36, %36 : vector<16x1xf32>
    %43 = arith.subf %41, %42 : vector<16x1xf32>
    %c0_37 = arith.constant 0 : index
    %c0_38 = arith.constant 0 : index
    %44 = vector.load %arg4[%c0_37, %c0_38] : memref<16x1xf32, #tpu.memory_space<vmem>>, vector<16x1xf32>
    %cst_39 = arith.constant 9.99999974E-6 : f32
    %45 = vector.broadcast %cst_39 : f32 to vector<16x1xf32>
    %46 = arith.addf %43, %45 : vector<16x1xf32>
    %47 = math.rsqrt %46 : vector<16x1xf32>
    %48 = arith.mulf %44, %47 : vector<16x1xf32>
    %c0_40 = arith.constant 0 : index
    %c0_41 = arith.constant 0 : index
    %49 = vector.load %arg5[%c0_40, %c0_41] : memref<16x1xf32, #tpu.memory_space<vmem>>, vector<16x1xf32>
    %50 = arith.mulf %36, %48 : vector<16x1xf32>
    %51 = arith.subf %49, %50 : vector<16x1xf32>
    %52 = vector.broadcast %48 : vector<16x1xf32> to vector<16x768xf32>
    %53 = arith.mulf %32, %52 : vector<16x768xf32>
    %54 = vector.broadcast %51 : vector<16x1xf32> to vector<16x768xf32>
    %55 = arith.addf %53, %54 : vector<16x768xf32>
    %56 = vector.broadcast %4 : vector<1x768xf32> to vector<16x768xf32>
    %57 = arith.mulf %55, %56 : vector<16x768xf32>
    %c0_42 = arith.constant 0 : index
    %c128_43 = arith.constant 128 : index
    %58 = vector.load %arg17[%c0_42, %c128_43] : memref<16x1024xf32, #tpu.memory_space<vmem>>, vector<16x768xf32>
    tpu.vector_store %arg17[%c0_42, %c128_43], %57 {strides = array<i32>} : memref<16x1024xf32, #tpu.memory_space<vmem>>, vector<16x768xf32>,
    %c0_44 = arith.constant 0 : index
    %c109_45 = arith.constant 109 : index
    %59 = vector.load %arg17[%c0_44, %c109_45] : memref<16x1024xf32, #tpu.memory_space<vmem>>, vector<16x768xf32>
    %c0_46 = arith.constant 0 : index
    %c0_47 = arith.constant 0 : index
    %60 = vector.load %arg19[%c0_46, %c0_47] : memref<288x768xf32, #tpu.memory_space<vmem>>, vector<16x768xf32>
    tpu.vector_store %arg19[%c0_46, %c0_47], %59 {strides = array<i32>} : memref<288x768xf32, #tpu.memory_space<vmem>>, vector<16x768xf32>,
    %c0_48 = arith.constant 0 : index
    %c110_49 = arith.constant 110 : index
    %61 = vector.load %arg17[%c0_48, %c110_49] : memref<16x1024xf32, #tpu.memory_space<vmem>>, vector<16x768xf32>
    %c16_50 = arith.constant 16 : index
    %c0_51 = arith.constant 0 : index
    %62 = vector.load %arg19[%c16_50, %c0_51] : memref<288x768xf32, #tpu.memory_space<vmem>>, vector<16x768xf32>
    tpu.vector_store %arg19[%c16_50, %c0_51], %61 {strides = array<i32>} : memref<288x768xf32, #tpu.memory_space<vmem>>, vector<16x768xf32>,
    %c0_52 = arith.constant 0 : index
    %c111_53 = arith.constant 111 : index
    %63 = vector.load %arg17[%c0_52, %c111_53] : memref<16x1024xf32, #tpu.memory_space<vmem>>, vector<16x768xf32>
    %c32_54 = arith.constant 32 : index
    %c0_55 = arith.constant 0 : index
    %64 = vector.load %arg19[%c32_54, %c0_55] : memref<288x768xf32, #tpu.memory_space<vmem>>, vector<16x768xf32>
    tpu.vector_store %arg19[%c32_54, %c0_55], %63 {strides = array<i32>} : memref<288x768xf32, #tpu.memory_space<vmem>>, vector<16x768xf32>,
    %c0_56 = arith.constant 0 : index
    %c127_57 = arith.constant 127 : index
    %65 = vector.load %arg17[%c0_56, %c127_57] : memref<16x1024xf32, #tpu.memory_space<vmem>>, vector<16x768xf32>
    %c48_58 = arith.constant 48 : index
    %c0_59 = arith.constant 0 : index
    %66 = vector.load %arg19[%c48_58, %c0_59] : memref<288x768xf32, #tpu.memory_space<vmem>>, vector<16x768xf32>
    tpu.vector_store %arg19[%c48_58, %c0_59], %65 {strides = array<i32>} : memref<288x768xf32, #tpu.memory_space<vmem>>, vector<16x768xf32>,
    %c0_60 = arith.constant 0 : index
    %c128_61 = arith.constant 128 : index
    %67 = vector.load %arg17[%c0_60, %c128_61] : memref<16x1024xf32, #tpu.memory_space<vmem>>, vector<16x768xf32>
    %c64_62 = arith.constant 64 : index
    %c0_63 = arith.constant 0 : index
    %68 = vector.load %arg19[%c64_62, %c0_63] : memref<288x768xf32, #tpu.memory_space<vmem>>, vector<16x768xf32>
    tpu.vector_store %arg19[%c64_62, %c0_63], %67 {strides = array<i32>} : memref<288x768xf32, #tpu.memory_space<vmem>>, vector<16x768xf32>,
    %c0_64 = arith.constant 0 : index
    %c129_65 = arith.constant 129 : index
    %69 = vector.load %arg17[%c0_64, %c129_65] : memref<16x1024xf32, #tpu.memory_space<vmem>>, vector<16x768xf32>
    %c80 = arith.constant 80 : index
    %c0_66 = arith.constant 0 : index
    %70 = vector.load %arg19[%c80, %c0_66] : memref<288x768xf32, #tpu.memory_space<vmem>>, vector<16x768xf32>
    tpu.vector_store %arg19[%c80, %c0_66], %69 {strides = array<i32>} : memref<288x768xf32, #tpu.memory_space<vmem>>, vector<16x768xf32>,
    %c0_67 = arith.constant 0 : index
    %c145_68 = arith.constant 145 : index
    %71 = vector.load %arg17[%c0_67, %c145_68] : memref<16x1024xf32, #tpu.memory_space<vmem>>, vector<16x768xf32>
    %c96 = arith.constant 96 : index
    %c0_69 = arith.constant 0 : index
    %72 = vector.load %arg19[%c96, %c0_69] : memref<288x768xf32, #tpu.memory_space<vmem>>, vector<16x768xf32>
    tpu.vector_store %arg19[%c96, %c0_69], %71 {strides = array<i32>} : memref<288x768xf32, #tpu.memory_space<vmem>>, vector<16x768xf32>,
    %c0_70 = arith.constant 0 : index
    %c146_71 = arith.constant 146 : index
    %73 = vector.load %arg17[%c0_70, %c146_71] : memref<16x1024xf32, #tpu.memory_space<vmem>>, vector<16x768xf32>
    %c112 = arith.constant 112 : index
    %c0_72 = arith.constant 0 : index
    %74 = vector.load %arg19[%c112, %c0_72] : memref<288x768xf32, #tpu.memory_space<vmem>>, vector<16x768xf32>
    tpu.vector_store %arg19[%c112, %c0_72], %73 {strides = array<i32>} : memref<288x768xf32, #tpu.memory_space<vmem>>, vector<16x768xf32>,
    %c0_73 = arith.constant 0 : index
    %c147_74 = arith.constant 147 : index
    %75 = vector.load %arg17[%c0_73, %c147_74] : memref<16x1024xf32, #tpu.memory_space<vmem>>, vector<16x768xf32>
    %c128_75 = arith.constant 128 : index
    %c0_76 = arith.constant 0 : index
    %76 = vector.load %arg19[%c128_75, %c0_76] : memref<288x768xf32, #tpu.memory_space<vmem>>, vector<16x768xf32>
    tpu.vector_store %arg19[%c128_75, %c0_76], %75 {strides = array<i32>} : memref<288x768xf32, #tpu.memory_space<vmem>>, vector<16x768xf32>,
    %c0_77 = arith.constant 0 : index
    %c0_78 = arith.constant 0 : index
    %77 = vector.load %arg19[%c0_77, %c0_78] : memref<288x768xf32, #tpu.memory_space<vmem>>, vector<144x768xf32>
    %c0_79 = arith.constant 0 : index
    %c0_80 = arith.constant 0 : index
    %78 = vector.load %arg6[%c0_79, %c0_80] : memref<32x144xf32, #tpu.memory_space<vmem>>, vector<32x144xf32>
    %cst_81 = arith.constant dense<0.000000e+00> : vector<32x768xf32>
    %79 = tpu.matmul %78, %77, %cst_81 {dimension_numbers = #tpu.dot_dimension_numbers<[1], [0], [0], [1], [0, 0, 1, 1], [], []>} : vector<32x144xf32>, vector<144x768xf32>, vector<32x768xf32> -> vector<32x768xf32>
    %c0_82 = arith.constant 0 : index
    %c0_83 = arith.constant 0 : index
    %80 = vector.load %arg7[%c0_82, %c0_83] : memref<32x1xf32, #tpu.memory_space<vmem>>, vector<32x1xf32>
    %81 = vector.broadcast %80 : vector<32x1xf32> to vector<32x768xf32>
    %82 = arith.addf %79, %81 : vector<32x768xf32>
    %cst_84 = arith.constant 0.000000e+00 : f32
    %83 = vector.broadcast %cst_84 : f32 to vector<32x768xf32>
    %84 = arith.maximumf %82, %83 : vector<32x768xf32>
    %85 = vector.broadcast %4 : vector<1x768xf32> to vector<32x768xf32>
    %86 = arith.mulf %84, %85 : vector<32x768xf32>
    %cst_85 = arith.constant dense<0.000000e+00> : vector<32xf32>
    %87 = vector.multi_reduction <add>, %86, %cst_85 [1] : vector<32x768xf32> to vector<32xf32>
    %88 = vector.shape_cast %87 : vector<32xf32> to vector<32x1xf32>
    %cst_86 = arith.constant 0.001953125 : f32
    %89 = vector.broadcast %cst_86 : f32 to vector<32x1xf32>
    %90 = arith.mulf %88, %89 : vector<32x1xf32>
    %91 = arith.mulf %86, %86 : vector<32x768xf32>
    %cst_87 = arith.constant dense<0.000000e+00> : vector<32xf32>
    %92 = vector.multi_reduction <add>, %91, %cst_87 [1] : vector<32x768xf32> to vector<32xf32>
    %93 = vector.shape_cast %92 : vector<32xf32> to vector<32x1xf32>
    %cst_88 = arith.constant 0.001953125 : f32
    %94 = vector.broadcast %cst_88 : f32 to vector<32x1xf32>
    %95 = arith.mulf %93, %94 : vector<32x1xf32>
    %96 = arith.mulf %90, %90 : vector<32x1xf32>
    %97 = arith.subf %95, %96 : vector<32x1xf32>
    %c0_89 = arith.constant 0 : index
    %c0_90 = arith.constant 0 : index
    %98 = vector.load %arg8[%c0_89, %c0_90] : memref<32x1xf32, #tpu.memory_space<vmem>>, vector<32x1xf32>
    %cst_91 = arith.constant 9.99999974E-6 : f32
    %99 = vector.broadcast %cst_91 : f32 to vector<32x1xf32>
    %100 = arith.addf %97, %99 : vector<32x1xf32>
    %101 = math.rsqrt %100 : vector<32x1xf32>
    %102 = arith.mulf %98, %101 : vector<32x1xf32>
    %c0_92 = arith.constant 0 : index
    %c0_93 = arith.constant 0 : index
    %103 = vector.load %arg9[%c0_92, %c0_93] : memref<32x1xf32, #tpu.memory_space<vmem>>, vector<32x1xf32>
    %104 = arith.mulf %90, %102 : vector<32x1xf32>
    %105 = arith.subf %103, %104 : vector<32x1xf32>
    %106 = vector.broadcast %102 : vector<32x1xf32> to vector<32x768xf32>
    %107 = arith.mulf %86, %106 : vector<32x768xf32>
    %108 = vector.broadcast %105 : vector<32x1xf32> to vector<32x768xf32>
    %109 = arith.addf %107, %108 : vector<32x768xf32>
    %110 = vector.broadcast %4 : vector<1x768xf32> to vector<32x768xf32>
    %111 = arith.mulf %109, %110 : vector<32x768xf32>
    %c0_94 = arith.constant 0 : index
    %c128_95 = arith.constant 128 : index
    %112 = vector.load %arg18[%c0_94, %c128_95] : memref<32x1024xf32, #tpu.memory_space<vmem>>, vector<32x768xf32>
    tpu.vector_store %arg18[%c0_94, %c128_95], %111 {strides = array<i32>} : memref<32x1024xf32, #tpu.memory_space<vmem>>, vector<32x768xf32>,
    %c0_96 = arith.constant 0 : index
    %c109_97 = arith.constant 109 : index
    %113 = vector.load %arg18[%c0_96, %c109_97] : memref<32x1024xf32, #tpu.memory_space<vmem>>, vector<32x768xf32>
    %c0_98 = arith.constant 0 : index
    %c0_99 = arith.constant 0 : index
    %114 = vector.load %arg19[%c0_98, %c0_99] : memref<288x768xf32, #tpu.memory_space<vmem>>, vector<32x768xf32>
    tpu.vector_store %arg19[%c0_98, %c0_99], %113 {strides = array<i32>} : memref<288x768xf32, #tpu.memory_space<vmem>>, vector<32x768xf32>,
    %c0_100 = arith.constant 0 : index
    %c110_101 = arith.constant 110 : index
    %115 = vector.load %arg18[%c0_100, %c110_101] : memref<32x1024xf32, #tpu.memory_space<vmem>>, vector<32x768xf32>
    %c32_102 = arith.constant 32 : index
    %c0_103 = arith.constant 0 : index
    %116 = vector.load %arg19[%c32_102, %c0_103] : memref<288x768xf32, #tpu.memory_space<vmem>>, vector<32x768xf32>
    tpu.vector_store %arg19[%c32_102, %c0_103], %115 {strides = array<i32>} : memref<288x768xf32, #tpu.memory_space<vmem>>, vector<32x768xf32>,
    %c0_104 = arith.constant 0 : index
    %c111_105 = arith.constant 111 : index
    %117 = vector.load %arg18[%c0_104, %c111_105] : memref<32x1024xf32, #tpu.memory_space<vmem>>, vector<32x768xf32>
    %c64_106 = arith.constant 64 : index
    %c0_107 = arith.constant 0 : index
    %118 = vector.load %arg19[%c64_106, %c0_107] : memref<288x768xf32, #tpu.memory_space<vmem>>, vector<32x768xf32>
    tpu.vector_store %arg19[%c64_106, %c0_107], %117 {strides = array<i32>} : memref<288x768xf32, #tpu.memory_space<vmem>>, vector<32x768xf32>,
    %c0_108 = arith.constant 0 : index
    %c127_109 = arith.constant 127 : index
    %119 = vector.load %arg18[%c0_108, %c127_109] : memref<32x1024xf32, #tpu.memory_space<vmem>>, vector<32x768xf32>
    %c96_110 = arith.constant 96 : index
    %c0_111 = arith.constant 0 : index
    %120 = vector.load %arg19[%c96_110, %c0_111] : memref<288x768xf32, #tpu.memory_space<vmem>>, vector<32x768xf32>
    tpu.vector_store %arg19[%c96_110, %c0_111], %119 {strides = array<i32>} : memref<288x768xf32, #tpu.memory_space<vmem>>, vector<32x768xf32>,
    %c0_112 = arith.constant 0 : index
    %c128_113 = arith.constant 128 : index
    %121 = vector.load %arg18[%c0_112, %c128_113] : memref<32x1024xf32, #tpu.memory_space<vmem>>, vector<32x768xf32>
    %c128_114 = arith.constant 128 : index
    %c0_115 = arith.constant 0 : index
    %122 = vector.load %arg19[%c128_114, %c0_115] : memref<288x768xf32, #tpu.memory_space<vmem>>, vector<32x768xf32>
    tpu.vector_store %arg19[%c128_114, %c0_115], %121 {strides = array<i32>} : memref<288x768xf32, #tpu.memory_space<vmem>>, vector<32x768xf32>,
    %c0_116 = arith.constant 0 : index
    %c129_117 = arith.constant 129 : index
    %123 = vector.load %arg18[%c0_116, %c129_117] : memref<32x1024xf32, #tpu.memory_space<vmem>>, vector<32x768xf32>
    %c160 = arith.constant 160 : index
    %c0_118 = arith.constant 0 : index
    %124 = vector.load %arg19[%c160, %c0_118] : memref<288x768xf32, #tpu.memory_space<vmem>>, vector<32x768xf32>
    tpu.vector_store %arg19[%c160, %c0_118], %123 {strides = array<i32>} : memref<288x768xf32, #tpu.memory_space<vmem>>, vector<32x768xf32>,
    %c0_119 = arith.constant 0 : index
    %c145_120 = arith.constant 145 : index
    %125 = vector.load %arg18[%c0_119, %c145_120] : memref<32x1024xf32, #tpu.memory_space<vmem>>, vector<32x768xf32>
    %c192 = arith.constant 192 : index
    %c0_121 = arith.constant 0 : index
    %126 = vector.load %arg19[%c192, %c0_121] : memref<288x768xf32, #tpu.memory_space<vmem>>, vector<32x768xf32>
    tpu.vector_store %arg19[%c192, %c0_121], %125 {strides = array<i32>} : memref<288x768xf32, #tpu.memory_space<vmem>>, vector<32x768xf32>,
    %c0_122 = arith.constant 0 : index
    %c146_123 = arith.constant 146 : index
    %127 = vector.load %arg18[%c0_122, %c146_123] : memref<32x1024xf32, #tpu.memory_space<vmem>>, vector<32x768xf32>
    %c224 = arith.constant 224 : index
    %c0_124 = arith.constant 0 : index
    %128 = vector.load %arg19[%c224, %c0_124] : memref<288x768xf32, #tpu.memory_space<vmem>>, vector<32x768xf32>
    tpu.vector_store %arg19[%c224, %c0_124], %127 {strides = array<i32>} : memref<288x768xf32, #tpu.memory_space<vmem>>, vector<32x768xf32>,
    %c0_125 = arith.constant 0 : index
    %c147_126 = arith.constant 147 : index
    %129 = vector.load %arg18[%c0_125, %c147_126] : memref<32x1024xf32, #tpu.memory_space<vmem>>, vector<32x768xf32>
    %c256 = arith.constant 256 : index
    %c0_127 = arith.constant 0 : index
    %130 = vector.load %arg19[%c256, %c0_127] : memref<288x768xf32, #tpu.memory_space<vmem>>, vector<32x768xf32>
    tpu.vector_store %arg19[%c256, %c0_127], %129 {strides = array<i32>} : memref<288x768xf32, #tpu.memory_space<vmem>>, vector<32x768xf32>,
    %c0_128 = arith.constant 0 : index
    %c0_129 = arith.constant 0 : index
    %131 = vector.load %arg19[%c0_128, %c0_129] : memref<288x768xf32, #tpu.memory_space<vmem>>, vector<288x768xf32>
    %c0_130 = arith.constant 0 : index
    %c0_131 = arith.constant 0 : index
    %132 = vector.load %arg10[%c0_130, %c0_131] : memref<16x288xf32, #tpu.memory_space<vmem>>, vector<16x288xf32>
    %cst_132 = arith.constant dense<0.000000e+00> : vector<16x768xf32>
    %133 = tpu.matmul %132, %131, %cst_132 {dimension_numbers = #tpu.dot_dimension_numbers<[1], [0], [0], [1], [0, 0, 1, 1], [], []>} : vector<16x288xf32>, vector<288x768xf32>, vector<16x768xf32> -> vector<16x768xf32>
    %c0_133 = arith.constant 0 : index
    %c0_134 = arith.constant 0 : index
    %134 = vector.load %arg11[%c0_133, %c0_134] : memref<16x1xf32, #tpu.memory_space<vmem>>, vector<16x1xf32>
    %135 = vector.broadcast %134 : vector<16x1xf32> to vector<16x768xf32>
    %136 = arith.addf %133, %135 : vector<16x768xf32>
    %cst_135 = arith.constant 0.000000e+00 : f32
    %137 = vector.broadcast %cst_135 : f32 to vector<16x768xf32>
    %138 = arith.maximumf %136, %137 : vector<16x768xf32>
    %139 = vector.broadcast %4 : vector<1x768xf32> to vector<16x768xf32>
    %140 = arith.mulf %138, %139 : vector<16x768xf32>
    %cst_136 = arith.constant dense<0.000000e+00> : vector<16xf32>
    %141 = vector.multi_reduction <add>, %140, %cst_136 [1] : vector<16x768xf32> to vector<16xf32>
    %142 = vector.shape_cast %141 : vector<16xf32> to vector<16x1xf32>
    %cst_137 = arith.constant 0.001953125 : f32
    %143 = vector.broadcast %cst_137 : f32 to vector<16x1xf32>
    %144 = arith.mulf %142, %143 : vector<16x1xf32>
    %145 = arith.mulf %140, %140 : vector<16x768xf32>
    %cst_138 = arith.constant dense<0.000000e+00> : vector<16xf32>
    %146 = vector.multi_reduction <add>, %145, %cst_138 [1] : vector<16x768xf32> to vector<16xf32>
    %147 = vector.shape_cast %146 : vector<16xf32> to vector<16x1xf32>
    %cst_139 = arith.constant 0.001953125 : f32
    %148 = vector.broadcast %cst_139 : f32 to vector<16x1xf32>
    %149 = arith.mulf %147, %148 : vector<16x1xf32>
    %150 = arith.mulf %144, %144 : vector<16x1xf32>
    %151 = arith.subf %149, %150 : vector<16x1xf32>
    %c0_140 = arith.constant 0 : index
    %c0_141 = arith.constant 0 : index
    %152 = vector.load %arg12[%c0_140, %c0_141] : memref<16x1xf32, #tpu.memory_space<vmem>>, vector<16x1xf32>
    %cst_142 = arith.constant 9.99999974E-6 : f32
    %153 = vector.broadcast %cst_142 : f32 to vector<16x1xf32>
    %154 = arith.addf %151, %153 : vector<16x1xf32>
    %155 = math.rsqrt %154 : vector<16x1xf32>
    %156 = arith.mulf %152, %155 : vector<16x1xf32>
    %c0_143 = arith.constant 0 : index
    %c0_144 = arith.constant 0 : index
    %157 = vector.load %arg13[%c0_143, %c0_144] : memref<16x1xf32, #tpu.memory_space<vmem>>, vector<16x1xf32>
    %158 = arith.mulf %144, %156 : vector<16x1xf32>
    %159 = arith.subf %157, %158 : vector<16x1xf32>
    %160 = vector.broadcast %156 : vector<16x1xf32> to vector<16x768xf32>
    %161 = arith.mulf %140, %160 : vector<16x768xf32>
    %162 = vector.broadcast %159 : vector<16x1xf32> to vector<16x768xf32>
    %163 = arith.addf %161, %162 : vector<16x768xf32>
    %164 = vector.broadcast %4 : vector<1x768xf32> to vector<16x768xf32>
    %165 = arith.mulf %163, %164 : vector<16x768xf32>
    %c0_145 = arith.constant 0 : index
    %c128_146 = arith.constant 128 : index
    %166 = vector.load %arg17[%c0_145, %c128_146] : memref<16x1024xf32, #tpu.memory_space<vmem>>, vector<16x768xf32>
    tpu.vector_store %arg17[%c0_145, %c128_146], %165 {strides = array<i32>} : memref<16x1024xf32, #tpu.memory_space<vmem>>, vector<16x768xf32>,
    %c0_147 = arith.constant 0 : index
    %c109_148 = arith.constant 109 : index
    %167 = vector.load %arg17[%c0_147, %c109_148] : memref<16x1024xf32, #tpu.memory_space<vmem>>, vector<16x768xf32>
    %c0_149 = arith.constant 0 : index
    %c0_150 = arith.constant 0 : index
    %168 = vector.load %arg19[%c0_149, %c0_150] : memref<288x768xf32, #tpu.memory_space<vmem>>, vector<16x768xf32>
    tpu.vector_store %arg19[%c0_149, %c0_150], %167 {strides = array<i32>} : memref<288x768xf32, #tpu.memory_space<vmem>>, vector<16x768xf32>,
    %c0_151 = arith.constant 0 : index
    %c110_152 = arith.constant 110 : index
    %169 = vector.load %arg17[%c0_151, %c110_152] : memref<16x1024xf32, #tpu.memory_space<vmem>>, vector<16x768xf32>
    %c16_153 = arith.constant 16 : index
    %c0_154 = arith.constant 0 : index
    %170 = vector.load %arg19[%c16_153, %c0_154] : memref<288x768xf32, #tpu.memory_space<vmem>>, vector<16x768xf32>
    tpu.vector_store %arg19[%c16_153, %c0_154], %169 {strides = array<i32>} : memref<288x768xf32, #tpu.memory_space<vmem>>, vector<16x768xf32>,
    %c0_155 = arith.constant 0 : index
    %c111_156 = arith.constant 111 : index
    %171 = vector.load %arg17[%c0_155, %c111_156] : memref<16x1024xf32, #tpu.memory_space<vmem>>, vector<16x768xf32>
    %c32_157 = arith.constant 32 : index
    %c0_158 = arith.constant 0 : index
    %172 = vector.load %arg19[%c32_157, %c0_158] : memref<288x768xf32, #tpu.memory_space<vmem>>, vector<16x768xf32>
    tpu.vector_store %arg19[%c32_157, %c0_158], %171 {strides = array<i32>} : memref<288x768xf32, #tpu.memory_space<vmem>>, vector<16x768xf32>,
    %c0_159 = arith.constant 0 : index
    %c127_160 = arith.constant 127 : index
    %173 = vector.load %arg17[%c0_159, %c127_160] : memref<16x1024xf32, #tpu.memory_space<vmem>>, vector<16x768xf32>
    %c48_161 = arith.constant 48 : index
    %c0_162 = arith.constant 0 : index
    %174 = vector.load %arg19[%c48_161, %c0_162] : memref<288x768xf32, #tpu.memory_space<vmem>>, vector<16x768xf32>
    tpu.vector_store %arg19[%c48_161, %c0_162], %173 {strides = array<i32>} : memref<288x768xf32, #tpu.memory_space<vmem>>, vector<16x768xf32>,
    %c0_163 = arith.constant 0 : index
    %c128_164 = arith.constant 128 : index
    %175 = vector.load %arg17[%c0_163, %c128_164] : memref<16x1024xf32, #tpu.memory_space<vmem>>, vector<16x768xf32>
    %c64_165 = arith.constant 64 : index
    %c0_166 = arith.constant 0 : index
    %176 = vector.load %arg19[%c64_165, %c0_166] : memref<288x768xf32, #tpu.memory_space<vmem>>, vector<16x768xf32>
    tpu.vector_store %arg19[%c64_165, %c0_166], %175 {strides = array<i32>} : memref<288x768xf32, #tpu.memory_space<vmem>>, vector<16x768xf32>,
    %c0_167 = arith.constant 0 : index
    %c129_168 = arith.constant 129 : index
    %177 = vector.load %arg17[%c0_167, %c129_168] : memref<16x1024xf32, #tpu.memory_space<vmem>>, vector<16x768xf32>
    %c80_169 = arith.constant 80 : index
    %c0_170 = arith.constant 0 : index
    %178 = vector.load %arg19[%c80_169, %c0_170] : memref<288x768xf32, #tpu.memory_space<vmem>>, vector<16x768xf32>
    tpu.vector_store %arg19[%c80_169, %c0_170], %177 {strides = array<i32>} : memref<288x768xf32, #tpu.memory_space<vmem>>, vector<16x768xf32>,
    %c0_171 = arith.constant 0 : index
    %c145_172 = arith.constant 145 : index
    %179 = vector.load %arg17[%c0_171, %c145_172] : memref<16x1024xf32, #tpu.memory_space<vmem>>, vector<16x768xf32>
    %c96_173 = arith.constant 96 : index
    %c0_174 = arith.constant 0 : index
    %180 = vector.load %arg19[%c96_173, %c0_174] : memref<288x768xf32, #tpu.memory_space<vmem>>, vector<16x768xf32>
    tpu.vector_store %arg19[%c96_173, %c0_174], %179 {strides = array<i32>} : memref<288x768xf32, #tpu.memory_space<vmem>>, vector<16x768xf32>,
    %c0_175 = arith.constant 0 : index
    %c146_176 = arith.constant 146 : index
    %181 = vector.load %arg17[%c0_175, %c146_176] : memref<16x1024xf32, #tpu.memory_space<vmem>>, vector<16x768xf32>
    %c112_177 = arith.constant 112 : index
    %c0_178 = arith.constant 0 : index
    %182 = vector.load %arg19[%c112_177, %c0_178] : memref<288x768xf32, #tpu.memory_space<vmem>>, vector<16x768xf32>
    tpu.vector_store %arg19[%c112_177, %c0_178], %181 {strides = array<i32>} : memref<288x768xf32, #tpu.memory_space<vmem>>, vector<16x768xf32>,
    %c0_179 = arith.constant 0 : index
    %c147_180 = arith.constant 147 : index
    %183 = vector.load %arg17[%c0_179, %c147_180] : memref<16x1024xf32, #tpu.memory_space<vmem>>, vector<16x768xf32>
    %c128_181 = arith.constant 128 : index
    %c0_182 = arith.constant 0 : index
    %184 = vector.load %arg19[%c128_181, %c0_182] : memref<288x768xf32, #tpu.memory_space<vmem>>, vector<16x768xf32>
    tpu.vector_store %arg19[%c128_181, %c0_182], %183 {strides = array<i32>} : memref<288x768xf32, #tpu.memory_space<vmem>>, vector<16x768xf32>,
    %c0_183 = arith.constant 0 : index
    %c0_184 = arith.constant 0 : index
    %185 = vector.load %arg19[%c0_183, %c0_184] : memref<288x768xf32, #tpu.memory_space<vmem>>, vector<144x768xf32>
    %c0_185 = arith.constant 0 : index
    %c0_186 = arith.constant 0 : index
    %186 = vector.load %arg14[%c0_185, %c0_186] : memref<8x144xf32, #tpu.memory_space<vmem>>, vector<8x144xf32>
    %cst_187 = arith.constant dense<0.000000e+00> : vector<8x768xf32>
    %187 = tpu.matmul %186, %185, %cst_187 {dimension_numbers = #tpu.dot_dimension_numbers<[1], [0], [0], [1], [0, 0, 1, 1], [], []>} : vector<8x144xf32>, vector<144x768xf32>, vector<8x768xf32> -> vector<8x768xf32>
    %c0_188 = arith.constant 0 : index
    %c0_189 = arith.constant 0 : index
    %188 = vector.load %arg15[%c0_188, %c0_189] : memref<8x1xf32, #tpu.memory_space<vmem>>, vector<8x1xf32>
    %189 = vector.broadcast %188 : vector<8x1xf32> to vector<8x768xf32>
    %190 = arith.addf %187, %189 : vector<8x768xf32>
    %cst_190 = arith.constant dense<0xFF800000> : vector<768xf32>
    %191 = vector.multi_reduction <maximumf>, %190, %cst_190 [0] : vector<8x768xf32> to vector<768xf32>
    %192 = vector.shape_cast %191 : vector<768xf32> to vector<1x768xf32>
    %193 = vector.broadcast %192 : vector<1x768xf32> to vector<8x768xf32>
    %194 = arith.subf %190, %193 : vector<8x768xf32>
    %195 = math.exp %194 : vector<8x768xf32>
    %cst_191 = arith.constant dense<0.000000e+00> : vector<768xf32>
    %196 = vector.multi_reduction <add>, %195, %cst_191 [0] : vector<8x768xf32> to vector<768xf32>
    %197 = vector.shape_cast %196 : vector<768xf32> to vector<1x768xf32>
    %cst_192 = arith.constant 1.000000e+00 : f32
    %198 = vector.broadcast %cst_192 : f32 to vector<1x768xf32>
    %199 = arith.divf %198, %197 : vector<1x768xf32>
    %200 = vector.broadcast %199 : vector<1x768xf32> to vector<8x768xf32>
    %201 = arith.mulf %195, %200 : vector<8x768xf32>
    %c0_193 = arith.constant 0 : index
    %c0_194 = arith.constant 0 : index
    %202 = vector.load %arg16[%c0_193, %c0_194] : memref<8x768xf32, #tpu.memory_space<vmem>>, vector<8x768xf32>
    tpu.vector_store %arg16[%c0_193, %c0_194], %201 {strides = array<i32>} : memref<8x768xf32, #tpu.memory_space<vmem>>, vector<8x768xf32>,
    return
  }
}

</mosaic_0001>

<bundles_post_ra>
// kernel: tpu_custom_call.1
= control target key start
LH: loop header
LB: loop body
LE: loop exit
PB: predicated region body
PF: predicated region fallthrough
CT: control target
= control target key end

     0   :  { %s9942_s0 = inlined_call_operand.vmem [shape: f32[8,1024], index: 0, kind: input, shape index: {}]   ;;  %s9943_s1 = inlined_call_operand.hbm [shape: f32[1,768], index: 1, kind: input, shape index: {}]   ;;  %s9944_s2 = inlined_call_operand.vmem [shape: f32[16,72], index: 2, kind: input, shape index: {}]   ;;  %s9945_s3 = inlined_call_operand.vmem [shape: f32[16,1], index: 3, kind: input, shape index: {}]   ;;  %s9946_s4 = inlined_call_operand.vmem [shape: f32[16,1], index: 4, kind: input, shape index: {}]   ;;  %s9947_s5 = inlined_call_operand.vmem [shape: f32[16,1], index: 5, kind: input, shape index: {}]   ;;  %s9948_s6 = inlined_call_operand.vmem [shape: f32[32,144], index: 6, kind: input, shape index: {}]   ;;  %s9949_s7 = inlined_call_operand.vmem [shape: f32[32,1], index: 7, kind: input, shape index: {}]   ;;  %s9950_s8 = inlined_call_operand.vmem [shape: f32[32,1], index: 8, kind: input, shape index: {}]   ;;  %s9951_s9 = inlined_call_operand.vmem [shape: f32[32,1], index: 9, kind: input, shape index: {}]   ;;  %s9952_s10 = inlined_call_operand.vmem [shape: f32[16,288], index: 10, kind: input, shape index: {}]   ;;  %s9953_s11 = inlined_call_operand.vmem [shape: f32[16,1], index: 11, kind: input, shape index: {}]   ;;  %s9954_s12 = inlined_call_operand.vmem [shape: f32[16,1], index: 12, kind: input, shape index: {}]   ;;  %s9955_s13 = inlined_call_operand.vmem [shape: f32[16,1], index: 13, kind: input, shape index: {}]   ;;  %s9956_s14 = inlined_call_operand.vmem [shape: f32[8,144], index: 14, kind: input, shape index: {}]   ;;  %s9957_s15 = inlined_call_operand.vmem [shape: f32[8,1], index: 15, kind: input, shape index: {}]   ;;  %s9958_s16 = inlined_call_operand.hbm [shape: f32[8,768], index: 16, kind: output, shape index: {}]  }
   0x1   :  { %10089 = sst [smem:[#allocation129_spill]] %s9942_s0 }
   0x2   :  { %21 = vsyncpa [#allocation6], 0 }
   0x3   :  { %22 = vsyncpa [#allocation7], 0  ;;  %s6351_s21 = smov [#allocation5]  }
   0x4   :  { %s31_s22 = sshll.u32 %s6351_s21, 4  ;;  %s32_s22 = int_to_ptr.vmem [resolvable:$true] %s31_s22 }
   0x5   :  { %s6315_s23 = scalar_lea.vmem %s32_s22, 96  ;;  %p6320_p1 = scmp.lt.s32.totalorder %s32_s22, %s32_s22 }
   0x6   :  { %p6316_p0 = scmp.ne.s32.totalorder %s32_s22, %s6315_s23  ;;  %p6321_p2 = scmp.lt.s32.totalorder %s6315_s23, %s6315_s23 }
   0x8   :  { %p6322_p3 = por %p6321_p2, %p6320_p1 }
   0xa   :  { %p6323_p4 = pnand %p6322_p3, %p6316_p0 }
   0xc   :  { %6326 = shalt.err (!%p6323_p4)
}
   0xd   :  { %34 = dma.hbm_to_vmem [thread:$0]  %s9943_s1, 96, %s32_s22, [#allocation6]  }
   0xe   :  { %6347 = dma.done.wait [#allocation6], 96  }
   0xf   :  { %6348 = vsyncadd [#allocation6], 4294967200  ;;  %s10090_s28 = sld [smem:[#allocation129_spill]]  ;;  %s6352_s0 = smov 109   ;;  %v9960_v6 = vmov 0.0   ;;  %v6361_v9 = vmov 0  }
  0x10   :  { %s6353_s18 = smov 110   ;;  %s6354_s19 = smov 111   ;;  %642 = vmatprep.mubr.f32.mxu0 %v9960_v6  ;;  %719 = vmatprep.mubr.f32.mxu1 %v9960_v6  ;;  %v559_v10 = vld [vmem:[%s9945_s3] sm:$0xff]  ;;  %v560_v11 = vld [vmem:[%s9945_s3 + $0x8] sm:$0xff]  ;;  %vm484_vm0 = vcmask 891904   ;;  %vm437_vm1 = vcmask 900096  }
  0x11   :  { %s6355_s20 = smov 127   ;;  %s6356_s21 = smov 1   ;;  %6120 = vset.pattern.permute.xlu1 %v6361_v9  ;;  %6119 = vset.pattern.permute.xlu0 %v6361_v9  ;;  %vm390_vm2 = vcmask 908288   ;;  %vm343_vm3 = vcmask 1039360   ;;  %vm284_vm4 = vcmask 7168   ;;  %vm237_vm5 = vcmask 138240  }
  0x12   :  { %s6357_s24 = smov 17   ;;  %s6358_s25 = smov 18   ;;  %vm190_vm6 = vcmask 146432   ;;  %vm143_vm7 = vcmask 154624   ;;  %v6650_v57 = vld [vmem:[%s9944_s2] sm:$0xff]  ;;  %vm571_vm8 = vcmask 588800  }
  0x13   :  { %s6359_s1 = smov 19   ;;  %v6662_v63 = vld [vmem:[%s9944_s2 + $0x8] sm:$0xff]  ;;  %vm1894_vm9 = vcmask 130048   ;;  %vm4236_vm10 = vcmask 261120  }
  0x15   :  { %v6454_v0 = vld [vmem:[%s10090_s28 + $0x10] sm:$0xff]  ;;  %v6459_v1 = vld [vmem:[%s10090_s28 + $0x8] sm:$0xff]  ;;  %v6468_v2 = vld [vmem:[%s10090_s28 + $0x18] sm:$0xff] }
  0x16   :  { %472 = vrot.lane.b32.xlu0 %v6454_v0, %s6352_s0  ;;  %470 = vrot.lane.b32.xlu1 %v6459_v1, %s6352_s0  ;;  %v256_v3 = vld [vmem:[%s10090_s28] sm:$0xff]  ;;  %v6510_v4 = vld [vmem:[%s10090_s28 + $0x28] sm:$0xff] }
  0x17   :  { %v6515_v5 = vld [vmem:[%s10090_s28 + $0x20] sm:$0xff]  ;;  %v6540_v7 = vld [vmem:[%s10090_s28 + $0x30] sm:$0xff]  ;;  %v462_v8 = vld [vmem:[%s10090_s28 + $0x38] sm:$0xff] }
  0x1a   :  { %474 = vrot.lane.b32.xlu0 %v6468_v2, %s6352_s0  ;;  %425 = vrot.lane.b32.xlu1 %v6454_v0, %s6353_s18 }
  0x1e   :  { %427 = vrot.lane.b32.xlu0 %v6468_v2, %s6353_s18  ;;  %423 = vrot.lane.b32.xlu1 %v6459_v1, %s6353_s18 }
  0x22   :  { %380 = vrot.lane.b32.xlu1 %v6468_v2, %s6354_s19  ;;  %378 = vrot.lane.b32.xlu0 %v6454_v0, %s6354_s19 }
  0x26   :  { %376 = vrot.lane.b32.xlu0 %v6459_v1, %s6354_s19  ;;  %331 = vrot.lane.b32.xlu1 %v6454_v0, %s6355_s20 }
  0x2a   :  { %333 = vrot.lane.b32.xlu0 %v6468_v2, %s6355_s20  ;;  %329 = vrot.lane.b32.xlu1 %v6459_v1, %s6355_s20 }
  0x2e   :  { %274 = vrot.lane.b32.xlu1 %v6454_v0, %s6356_s21  ;;  %272 = vrot.lane.b32.xlu0 %v6459_v1, %s6356_s21 }
  0x32   :  { %270 = vrot.lane.b32.xlu0 %v256_v3, %s6356_s21  ;;  %225 = vrot.lane.b32.xlu1 %v6459_v1, %s6357_s24 }
  0x36   :  { %227 = vrot.lane.b32.xlu0 %v6454_v0, %s6357_s24  ;;  %223 = vrot.lane.b32.xlu1 %v256_v3, %s6357_s24 }
  0x3a   :  { %180 = vrot.lane.b32.xlu1 %v6454_v0, %s6358_s25  ;;  %178 = vrot.lane.b32.xlu0 %v6459_v1, %s6358_s25 }
  0x3e   :  { %478 = vrot.lane.b32.xlu1 %v6510_v4, %s6352_s0  ;;  %476 = vrot.lane.b32.xlu0 %v6515_v5, %s6352_s0 }
  0x42   :  { %176 = vrot.lane.b32.xlu0 %v256_v3, %s6358_s25  ;;  %131 = vrot.lane.b32.xlu1 %v6459_v1, %s6359_s1 }
  0x46   :  { %133 = vrot.lane.b32.xlu0 %v6454_v0, %s6359_s1  ;;  %429 = vrot.lane.b32.xlu1 %v6515_v5, %s6353_s18 }
  0x4a   :  { %431 = vrot.lane.b32.xlu0 %v6510_v4, %s6353_s18  ;;  %129 = vrot.lane.b32.xlu1 %v256_v3, %s6359_s1 }
  0x4e   :  { %382 = vrot.lane.b32.xlu0 %v6515_v5, %s6354_s19  ;;  %384 = vrot.lane.b32.xlu1 %v6510_v4, %s6354_s19 }
  0x52   :  { %480 = vrot.lane.b32.xlu0 %v6540_v7, %s6352_s0  ;;  %482 = vrot.lane.b32.xlu1 %v462_v8, %s6352_s0 }
  0x56   :  { %335 = vrot.lane.b32.xlu0 %v6515_v5, %s6355_s20  ;;  %337 = vrot.lane.b32.xlu1 %v6510_v4, %s6355_s20 }
  0x5a   :  { %433 = vrot.lane.b32.xlu0 %v6540_v7, %s6353_s18  ;;  %435 = vrot.lane.b32.xlu1 %v462_v8, %s6353_s18 }
  0x5e   :  { %386 = vrot.lane.b32.xlu0 %v6540_v7, %s6354_s19  ;;  %388 = vrot.lane.b32.xlu1 %v462_v8, %s6354_s19 }
  0x62   :  { %276 = vrot.lane.b32.xlu0 %v6468_v2, %s6356_s21  ;;  %278 = vrot.lane.b32.xlu1 %v6515_v5, %s6356_s21 }
  0x66   :  { %339 = vrot.lane.b32.xlu0 %v6540_v7, %s6355_s20  ;;  %341 = vrot.lane.b32.xlu1 %v462_v8, %s6355_s20 }
  0x6a   :  { %229 = vrot.lane.b32.xlu0 %v6468_v2, %s6357_s24  ;;  %231 = vrot.lane.b32.xlu1 %v6515_v5, %s6357_s24 }
  0x6e   :  { %182 = vrot.lane.b32.xlu0 %v6468_v2, %s6358_s25  ;;  %184 = vrot.lane.b32.xlu1 %v6515_v5, %s6358_s25 }
  0x72   :  { %280 = vrot.lane.b32.xlu0 %v6510_v4, %s6356_s21  ;;  %282 = vrot.lane.b32.xlu1 %v6540_v7, %s6356_s21 }
  0x76   :  { %135 = vrot.lane.b32.xlu0 %v6468_v2, %s6359_s1  ;;  %137 = vrot.lane.b32.xlu1 %v6515_v5, %s6359_s1 }
  0x7a   :  { %233 = vrot.lane.b32.xlu0 %v6510_v4, %s6357_s24  ;;  %235 = vrot.lane.b32.xlu1 %v6540_v7, %s6357_s24 }
  0x7e   :  { %186 = vrot.lane.b32.xlu0 %v6510_v4, %s6358_s25  ;;  %188 = vrot.lane.b32.xlu1 %v6540_v7, %s6358_s25 }
  0x82   :  { %139 = vrot.lane.b32.xlu0 %v6510_v4, %s6359_s1  ;;  %141 = vrot.lane.b32.xlu1 %v6540_v7, %s6359_s1 }
  0x86   :  { %563 = vperm.xlu1 %6120, %v559_v10   ;;  %568 = vperm.xlu0 %6119, %v560_v11  }
  0x88   :  { %v473_v12 = vpop.permute.xlu0 %472  ;;  %v471_v13 = vpop.permute.xlu1 %470 }
  0x89   :  { %v485_v17 = vsel %vm484_vm0, %v471_v13, %v473_v12 }
  0x8a   :  { %6122 = vrot.lane.b32.xlu1 %v9960_v6, %s6356_s21  ;;  %6127 = vrot.lane.b32.xlu0 %v9960_v6, %s6357_s24 }
  0x8c   :  { %v475_v14 = vpop.permute.xlu0 %474  ;;  %v426_v15 = vpop.permute.xlu1 %425 }
  0x8d   :  { %v486_v16 = vsel %vm484_vm0, %v473_v12, %v475_v14 }
  0x8e   :  { %592 = vmatprep.subr.mxu0 %v486_v16  ;;  %6132 = vrot.lane.b32.xlu1 %v9960_v6, %s6358_s25 }
  0x8f   :  { %593 = vmatpush1.msra.mxu0 %v485_v17  ;;  %6137 = vrot.lane.b32.xlu0 %v9960_v6, %s6359_s1 }
  0x90   :  { %v6609_v18 = vpop.permute.xlu0 %427  ;;  %v424_v19 = vpop.permute.xlu1 %423 }
  0x91   :  { %v439_v20 = vsel %vm437_vm1, %v426_v15, %v6609_v18  ;;  %v438_v21 = vsel %vm437_vm1, %v424_v19, %v426_v15 }
  0x92   :  { %594 = vmatprep.subr.mxu0 %v439_v20 }
  0x93   :  { %595 = vmatpush1.msra.mxu0 %v438_v21 }
  0x94   :  { %v6614_v22 = vpop.permute.xlu1 %380  ;;  %v379_v23 = vpop.permute.xlu0 %378 }
  0x95   :  { %v392_v24 = vsel %vm390_vm2, %v379_v23, %v6614_v22 }
  0x96   :  { %596 = vmatprep.subr.mxu0 %v392_v24 }
  0x98   :  { %v377_v25 = vpop.permute.xlu0 %376  ;;  %v332_v26 = vpop.permute.xlu1 %331 }
  0x99   :  { %v391_v27 = vsel %vm390_vm2, %v377_v25, %v379_v23 }
  0x9a   :  { %597 = vmatpush1.msra.mxu0 %v391_v27 }
  0x9c   :  { %v6619_v28 = vpop.permute.xlu0 %333  ;;  %v330_v29 = vpop.permute.xlu1 %329 }
  0x9d   :  { %v345_v30 = vsel %vm343_vm3, %v332_v26, %v6619_v28  ;;  %v344_v31 = vsel %vm343_vm3, %v330_v29, %v332_v26 }
  0x9e   :  { %598 = vmatprep.subr.mxu0 %v345_v30 }
  0x9f   :  { %599 = vmatpush1.msra.mxu0 %v344_v31 }
  0xa0   :  { %600 = vmatprep.subr.mxu0 %v6454_v0  ;;  %v6625_v32 = vpop.permute.xlu1 %274  ;;  %v273_v33 = vpop.permute.xlu0 %272 }
  0xa1   :  { %601 = vmatpush1.msra.mxu0 %v6459_v1  ;;  %v286_v34 = vsel %vm284_vm4, %v273_v33, %v6625_v32 }
  0xa2   :  { %602 = vmatprep.subr.mxu0 %v286_v34 }
  0xa4   :  { %v271_v35 = vpop.permute.xlu0 %270  ;;  %v226_v36 = vpop.permute.xlu1 %225 }
  0xa5   :  { %v285_v37 = vsel %vm284_vm4, %v271_v35, %v273_v33 }
  0xa6   :  { %603 = vmatpush1.msra.mxu0 %v285_v37 }
  0xa8   :  { %v6631_v38 = vpop.permute.xlu0 %227  ;;  %v224_v39 = vpop.permute.xlu1 %223 }
  0xa9   :  { %v239_v40 = vsel %vm237_vm5, %v226_v36, %v6631_v38  ;;  %v238_v41 = vsel %vm237_vm5, %v224_v39, %v226_v36 }
  0xaa   :  { %604 = vmatprep.subr.mxu0 %v239_v40 }
  0xab   :  { %605 = vmatpush1.msra.mxu0 %v238_v41 }
  0xac   :  { %v6636_v42 = vpop.permute.xlu1 %180  ;;  %v179_v43 = vpop.permute.xlu0 %178 }
  0xad   :  { %v192_v44 = vsel %vm190_vm6, %v179_v43, %v6636_v42 }
  0xae   :  { %606 = vmatprep.subr.mxu0 %v192_v44 }
  0xb0   :  { %v479_v45 = vpop.permute.xlu1 %478  ;;  %v477_v46 = vpop.permute.xlu0 %476 }
  0xb1   :  { %v488_v47 = vsel %vm484_vm0, %v477_v46, %v479_v45  ;;  %v487_v48 = vsel %vm484_vm0, %v475_v14, %v477_v46 }
  0xb2   :  { %669 = vmatprep.subr.mxu1 %v488_v47 }
  0xb3   :  { %670 = vmatpush1.msra.mxu1 %v487_v48 }
  0xb4   :  { %v177_v49 = vpop.permute.xlu0 %176  ;;  %v132_v50 = vpop.permute.xlu1 %131 }
  0xb5   :  { %v191_v51 = vsel %vm190_vm6, %v177_v49, %v179_v43 }
  0xb6   :  { %607 = vmatpush1.msra.mxu0 %v191_v51 }
  0xb8   :  { %v6643_v52 = vpop.permute.xlu0 %133  ;;  %v430_v53 = vpop.permute.xlu1 %429 }
  0xb9   :  { %v145_v54 = vsel %vm143_vm7, %v132_v50, %v6643_v52  ;;  %v440_v60 = vsel %vm437_vm1, %v6609_v18, %v430_v53 }
  0xba   :  { %608 = vmatprep.subr.mxu0 %v145_v54 }
  0xbc   :  { %v432_v55 = vpop.permute.xlu0 %431  ;;  %v130_v56 = vpop.permute.xlu1 %129 }
  0xbd   :  { %v144_v58 = vsel %vm143_vm7, %v130_v56, %v132_v50  ;;  %v441_v59 = vsel %vm437_vm1, %v430_v53, %v432_v55  ;;  %v822_v56 = vlaneseq }
  0xbe   :  { %609 = vmatpush1.msra.mxu0 %v144_v58  ;;  %671 = vmatprep.subr.mxu1 %v441_v59 }
  0xbf   :  { %672 = vmatpush1.msra.mxu1 %v440_v60  ;;  %6080 = vmatmul.mubr.msk.f32.vlgmr.msra.gmra.mxu0 %vm571_vm8, %v6650_v57  ;;  %v823_v60 = vshrl.u32 %v822_v56, 7 }
  0xc0   :  { %v383_v61 = vpop.permute.xlu0 %382  ;;  %v385_v62 = vpop.permute.xlu1 %384  ;;  %648 = vmatprep.mubr.f32.mxu0 %v9960_v6 }
  0xc1   :  { %v394_v0 = vsel %vm390_vm2, %v383_v61, %v385_v62  ;;  %v393_v1 = vsel %vm390_vm2, %v6614_v22, %v383_v61 }
  0xc2   :  { %673 = vmatprep.subr.mxu1 %v394_v0 }
  0xc3   :  { %674 = vmatpush1.msra.mxu1 %v393_v1  ;;  %6081 = vmatmul.mubr.msk.f32.gmra.mxu0 %vm571_vm8, %v6662_v63  ;;  %v824_v1 = vsub.s32 0, %v823_v60 }
  0xc4   :  { %v481_v3 = vpop.permute.xlu0 %480  ;;  %v483_v8 = vpop.permute.xlu1 %482  ;;  %796 = vmatprep.mubr.f32.mxu0 %v9960_v6 }
  0xc5   :  { %v490_v9 = vsel %vm484_vm0, %v481_v3, %v483_v8  ;;  %v489_v10 = vsel %vm484_vm0, %v479_v45, %v481_v3 }
  0xc6   :  { %746 = vmatprep.subr.mxu0 %v490_v9  ;;  %v114_v9 = vld [vmem:[#allocation5] sm:$0x3f] }
  0xc7   :  { %747 = vmatpush1.msra.mxu0 %v489_v10  ;;  %v828_v10 = vsub.s32 1, %v823_v60 }
  0xc8   :  { %v336_v11 = vpop.permute.xlu0 %335  ;;  %v338_v12 = vpop.permute.xlu1 %337 }
  0xc9   :  { %v347_v13 = vsel %vm343_vm3, %v336_v11, %v338_v12  ;;  %v346_v14 = vsel %vm343_vm3, %v6619_v28, %v336_v11 }
  0xca   :  { %675 = vmatprep.subr.mxu1 %v347_v13  ;;  %v6719_v13 = vrot.slane %v114_v9, %v824_v1 }
  0xcb   :  { %676 = vmatpush1.msra.mxu1 %v346_v14 }
  0xcc   :  { %v434_v15 = vpop.permute.xlu0 %433  ;;  %v436_v16 = vpop.permute.xlu1 %435  ;;  %677 = vmatprep.subr.mxu1 %v6515_v5  ;;  %10091 = vst [vmem:[#allocation11_spill] sm:$0xff] %v6719_v13 }
  0xcd   :  { %v443_v17 = vsel %vm437_vm1, %v434_v15, %v436_v16  ;;  %v442_v18 = vsel %vm437_vm1, %v432_v55, %v434_v15  ;;  %678 = vmatpush1.msra.mxu1 %v6468_v2  ;;  %v6721_v15 = vrot.slane %v114_v9, %v828_v10 }
  0xce   :  { %748 = vmatprep.subr.mxu0 %v443_v17 }
  0xcf   :  { %749 = vmatpush1.msra.mxu0 %v442_v18  ;;  %10092 = vst [vmem:[#allocation12_spill] sm:$0xff] %v6721_v15 }
  0xd0   :  { %v387_v19 = vpop.permute.xlu0 %386  ;;  %v389_v20 = vpop.permute.xlu1 %388 }
  0xd1   :  { %v396_v21 = vsel %vm390_vm2, %v387_v19, %v389_v20  ;;  %v395_v22 = vsel %vm390_vm2, %v385_v62, %v387_v19 }
  0xd2   :  { %750 = vmatprep.subr.mxu0 %v396_v21 }
  0xd3   :  { %751 = vmatpush1.msra.mxu0 %v395_v22 }
  0xd4   :  { %v277_v23 = vpop.permute.xlu0 %276  ;;  %v279_v24 = vpop.permute.xlu1 %278 }
  0xd5   :  { %v288_v5 = vsel %vm284_vm4, %v277_v23, %v279_v24  ;;  %v287_v25 = vsel %vm284_vm4, %v6625_v32, %v277_v23 }
  0xd6   :  { %679 = vmatprep.subr.mxu1 %v288_v5 }
  0xd7   :  { %680 = vmatpush1.msra.mxu1 %v287_v25 }
  0xd8   :  { %v340_v2 = vpop.permute.xlu0 %339  ;;  %v342_v26 = vpop.permute.xlu1 %341 }
  0xd9   :  { %v349_v27 = vsel %vm343_vm3, %v340_v2, %v342_v26  ;;  %v348_v28 = vsel %vm343_vm3, %v338_v12, %v340_v2 }
  0xda   :  { %752 = vmatprep.subr.mxu0 %v349_v27 }
  0xdb   :  { %753 = vmatpush1.msra.mxu0 %v348_v28 }
  0xdc   :  { %v230_v29 = vpop.permute.xlu0 %229  ;;  %v232_v30 = vpop.permute.xlu1 %231  ;;  %754 = vmatprep.subr.mxu0 %v6540_v7 }
  0xdd   :  { %v241_v31 = vsel %vm237_vm5, %v230_v29, %v232_v30  ;;  %v240_v33 = vsel %vm237_vm5, %v6631_v38, %v230_v29  ;;  %755 = vmatpush1.msra.mxu0 %v6510_v4 }
  0xde   :  { %681 = vmatprep.subr.mxu1 %v241_v31 }
  0xdf   :  { %682 = vmatpush1.msra.mxu1 %v240_v33 }
  0xe0   :  { %v183_v32 = vpop.permute.xlu0 %182  ;;  %v185_v34 = vpop.permute.xlu1 %184 }
  0xe1   :  { %v194_v35 = vsel %vm190_vm6, %v183_v32, %v185_v34  ;;  %v193_v36 = vsel %vm190_vm6, %v6636_v42, %v183_v32 }
  0xe2   :  { %683 = vmatprep.subr.mxu1 %v194_v35  ;;  %v840_v35 = vsub.s32 4, %v823_v60 }
  0xe3   :  { %684 = vmatpush1.msra.mxu1 %v193_v36 }
  0xe4   :  { %v281_v37 = vpop.permute.xlu0 %280  ;;  %v283_v7 = vpop.permute.xlu1 %282 }
  0xe5   :  { %v290_v39 = vsel %vm284_vm4, %v281_v37, %v283_v7  ;;  %v289_v40 = vsel %vm284_vm4, %v279_v24, %v281_v37  ;;  %v836_v24 = vsub.s32 3, %v823_v60 }
  0xe6   :  { %756 = vmatprep.subr.mxu0 %v290_v39 }
  0xe7   :  { %757 = vmatpush1.msra.mxu0 %v289_v40 }
  0xe8   :  { %v136_v4 = vpop.permute.xlu0 %135  ;;  %v138_v38 = vpop.permute.xlu1 %137 }
  0xe9   :  { %v147_v41 = vsel %vm143_vm7, %v136_v4, %v138_v38  ;;  %v146_v43 = vsel %vm143_vm7, %v6643_v52, %v136_v4 }
  0xea   :  { %685 = vmatprep.subr.mxu1 %v147_v41 }
  0xeb   :  { %686 = vmatpush1.msra.mxu1 %v146_v43 }
  0xec   :  { %v234_v42 = vpop.permute.xlu0 %233  ;;  %6082 = vmatmul.mubr.msk.f32.vlgmr.msra.gmra.mxu1 %vm571_vm8, %v6650_v57  ;;  %v236_v44 = vpop.permute.xlu1 %235 }
  0xed   :  { %v243_v45 = vsel %vm237_vm5, %v234_v42, %v236_v44  ;;  %v242_v46 = vsel %vm237_vm5, %v232_v30, %v234_v42  ;;  %725 = vmatprep.mubr.f32.mxu1 %v9960_v6 }
  0xee   :  { %758 = vmatprep.subr.mxu0 %v243_v45 }
  0xef   :  { %759 = vmatpush1.msra.mxu0 %v242_v46  ;;  %v6762_v46 = vrot.slane %v114_v9, %v840_v35 }
  0xf0   :  { %v187_v47 = vpop.permute.xlu0 %186  ;;  %v189_v48 = vpop.permute.xlu1 %188  ;;  %6083 = vmatmul.mubr.msk.f32.gmra.mxu1 %vm571_vm8, %v6662_v63 }
  0xf1   :  { %v196_v49 = vsel %vm190_vm6, %v187_v47, %v189_v48  ;;  %v195_v50 = vsel %vm190_vm6, %v185_v34, %v187_v47  ;;  %v6742_v34 = vrot.slane %v114_v9, %v836_v24  ;;  %10095 = vst [vmem:[#allocation15_spill] sm:$0xff] %v6762_v46 }
  0xf2   :  { %760 = vmatprep.subr.mxu0 %v196_v49 }
  0xf3   :  { %761 = vmatpush1.msra.mxu0 %v195_v50  ;;  %10094 = vst [vmem:[#allocation14_spill] sm:$0xff] %v6742_v34 }
  0xf4   :  { %v140_v51 = vpop.permute.xlu0 %139  ;;  %v142_v52 = vpop.permute.xlu1 %141 }
  0xf5   :  { %v149_v53 = vsel %vm143_vm7, %v140_v51, %v142_v52  ;;  %v148_v54 = vsel %vm143_vm7, %v138_v38, %v140_v51  ;;  %v844_v38 = vsub.s32 5, %v823_v60 }
  0xf6   :  { %762 = vmatprep.subr.mxu0 %v149_v53 }
  0xf7   :  { %763 = vmatpush1.msra.mxu0 %v148_v54  ;;  %v6772_v56 = vrot.slane %v114_v9, %v844_v38 }
  0xf8   :  { %6084 = vmatmul.mubr.msk.f32.vlgmr.msra.gmra.mxu0 %vm571_vm8, %v6650_v57 }
  0xf9   :  { %802 = vmatprep.mubr.f32.mxu0 %v9960_v6  ;;  %10096 = vst [vmem:[#allocation16_spill] sm:$0xff] %v6772_v56 }
  0xfc   :  { %6085 = vmatmul.mubr.msk.f32.gmra.mxu0 %vm571_vm8, %v6662_v63  ;;  %v832_v63 = vsub.s32 2, %v823_v60 }
  0xfe   :  { %v6723_v22 = vrot.slane %v114_v9, %v832_v63 }
 0x100   :  { %10093 = vst [vmem:[#allocation13_spill] sm:$0xff] %v6723_v22 }
 0x101   :  { %v564_v61 = vpop.permute.xlu1 %563  ;;  %v6715_v62 = vpop.permute.xlu0 %568 }
 0x17f   :  { %v644_v55 = vpop.f32.mrf.mxu0 }
 0x180   :  { %v645_v3 = vadd.f32 %v644_v55, %v564_v61 }
 0x181   :  { %v646_v58 = vpop.f32.mrf.mxu0 }
 0x182   :  { %v647_v8 = vadd.f32 %v646_v58, %v564_v61  ;;  %v809_v16 = vmax.f32 %v645_v3, 0.0 }
 0x183   :  { %v650_v59 = vpop.f32.mrf.mxu0 }
 0x184   :  { %v651_v57 = vadd.f32 %v650_v59, %v6715_v62  ;;  %v810_v17 = vmax.f32 %v647_v8, 0.0  ;;  %v6727_v2 = vmul.f32 %v6719_v13, %v809_v16 }
 0x185   :  { %v652_v0 = vpop.f32.mrf.mxu0 }
 0x186   :  { %v653_v11 = vadd.f32 %v652_v0, %v6715_v62  ;;  %v815_v19 = vmax.f32 %v651_v57, 0.0  ;;  %v6730_v26 = vmul.f32 %v6721_v15, %v810_v17  ;;  %v880_v36 = vmul.f32 %v6727_v2, %v6727_v2 }
 0x188   :  { %v816_v20 = vmax.f32 %v653_v11, 0.0  ;;  %v6733_v27 = vmul.f32 %v6719_v13, %v815_v19  ;;  %v881_v37 = vmul.f32 %v6730_v26, %v6730_v26  ;;  %v864_v41 = vadd.f32 %v6730_v26, %v6727_v2 }
 0x18a   :  { %v6736_v28 = vmul.f32 %v6721_v15, %v816_v20  ;;  %v886_v4 = vmul.f32 %v6733_v27, %v6733_v27  ;;  %v892_v48 = vadd.f32 %v881_v37, %v880_v36  ;;  %v6813_v37 = vpop.permute.xlu0 %6127 }
 0x18c   :  { %v887_v7 = vmul.f32 %v6736_v28, %v6736_v28  ;;  %v871_v49 = vadd.f32 %v6736_v28, %v6733_v27 }
 0x18e   :  { %v899_v53 = vadd.f32 %v887_v7, %v886_v4  ;;  %v6815_v7 = vpop.permute.xlu1 %6122 }
 0x192   :  { %v6819_v4 = vpop.permute.xlu1 %6132 }
 0x1ac   :  { %v721_v12 = vpop.f32.mrf.mxu1 }
 0x1ad   :  { %v722_v14 = vadd.f32 %v721_v12, %v564_v61 }
 0x1ae   :  { %v723_v18 = vpop.f32.mrf.mxu1 }
 0x1af   :  { %v811_v21 = vmax.f32 %v722_v14, 0.0  ;;  %v724_v23 = vadd.f32 %v723_v18, %v564_v61 }
 0x1b0   :  { %v727_v5 = vpop.f32.mrf.mxu1 }
 0x1b1   :  { %v728_v25 = vadd.f32 %v727_v5, %v6715_v62  ;;  %v6740_v33 = vmul.f32 %v6723_v22, %v811_v21  ;;  %v812_v32 = vmax.f32 %v724_v23, 0.0 }
 0x1b2   :  { %v729_v29 = vpop.f32.mrf.mxu1 }
 0x1b3   :  { %v817_v30 = vmax.f32 %v728_v25, 0.0  ;;  %v730_v31 = vadd.f32 %v729_v29, %v6715_v62  ;;  %v882_v43 = vmul.f32 %v6740_v33, %v6740_v33  ;;  %v6760_v42 = vmul.f32 %v6742_v34, %v812_v32 }
 0x1b4   :  { %v865_v47 = vadd.f32 %v864_v41, %v6740_v33 }
 0x1b5   :  { %v6751_v39 = vmul.f32 %v6723_v22, %v817_v30  ;;  %v818_v40 = vmax.f32 %v730_v31, 0.0  ;;  %v883_v59 = vmul.f32 %v6760_v42, %v6760_v42  ;;  %v893_v60 = vadd.f32 %v892_v48, %v882_v43 }
 0x1b6   :  { %v866_v8 = vadd.f32 %v865_v47, %v6760_v42 }
 0x1b7   :  { %v888_v50 = vmul.f32 %v6751_v39, %v6751_v39  ;;  %v6770_v51 = vmul.f32 %v6742_v34, %v818_v40  ;;  %v872_v57 = vadd.f32 %v871_v49, %v6751_v39  ;;  %v894_v17 = vadd.f32 %v893_v60, %v883_v59  ;;  %v6817_v40 = vpop.permute.xlu0 %6137  ;;  %v912_v59 = vld [vmem:[%s9946_s4] sm:$0xff] }
 0x1b8   :  { %v798_v44 = vpop.f32.mrf.mxu0 }
 0x1b9   :  { %v799_v45 = vadd.f32 %v798_v44, %v564_v61  ;;  %v900_v9 = vadd.f32 %v899_v53, %v888_v50  ;;  %v873_v24 = vadd.f32 %v872_v57, %v6770_v51 }
 0x1ba   :  { %v800_v52 = vpop.f32.mrf.mxu0 }
 0x1bb   :  { %v813_v54 = vmax.f32 %v799_v45, 0.0  ;;  %v801_v55 = vadd.f32 %v800_v52, %v564_v61  ;;  %v889_v61 = vmul.f32 %v6770_v51, %v6770_v51 }
 0x1bc   :  { %v804_v58 = vpop.f32.mrf.mxu0 }
 0x1bd   :  { %v6777_v0 = vmul.f32 %v6762_v46, %v813_v54  ;;  %v814_v1 = vmax.f32 %v801_v55, 0.0  ;;  %v805_v3 = vadd.f32 %v804_v58, %v6715_v62  ;;  %v901_v25 = vadd.f32 %v900_v9, %v889_v61  ;;  %v920_v61 = vld [vmem:[%s9947_s5] sm:$0xff]  ;;  %v921_v9 = vld [vmem:[%s9947_s5 + $0x8] sm:$0xff] }
 0x1be   :  { %v806_v10 = vpop.f32.mrf.mxu0 }
 0x1bf   :  { %v6785_v11 = vmul.f32 %v6772_v56, %v814_v1  ;;  %v819_v12 = vmax.f32 %v805_v3, 0.0  ;;  %v807_v63 = vadd.f32 %v806_v10, %v6715_v62  ;;  %v867_v14 = vadd.f32 %v866_v8, %v6777_v0  ;;  %v913_v3 = vld [vmem:[%s9946_s4 + $0x8] sm:$0xff] }
 0x1c0   :  { %v884_v16 = vmul.f32 %v6777_v0, %v6777_v0 }
 0x1c1   :  { %v6792_v18 = vmul.f32 %v6762_v46, %v819_v12  ;;  %v820_v19 = vmax.f32 %v807_v63, 0.0  ;;  %v868_v20 = vadd.f32 %v867_v14, %v6785_v11  ;;  %v885_v21 = vmul.f32 %v6785_v11, %v6785_v11 }
 0x1c2   :  { %v895_v23 = vadd.f32 %v894_v17, %v884_v16 }
 0x1c3   :  { %v6799_v62 = vmul.f32 %v6772_v56, %v820_v19  ;;  %869 = vadd.xlane.f32.xlu0 %v868_v20  ;;  %v890_v5 = vmul.f32 %v6792_v18, %v6792_v18  ;;  %v874_v30 = vadd.f32 %v873_v24, %v6792_v18 }
 0x1c4   :  { %v896_v29 = vadd.f32 %v895_v23, %v885_v21 }
 0x1c5   :  { %v891_v31 = vmul.f32 %v6799_v62, %v6799_v62  ;;  %v902_v32 = vadd.f32 %v901_v25, %v890_v5  ;;  %v875_v36 = vadd.f32 %v874_v30, %v6799_v62 }
 0x1c6   :  { %897 = vadd.xlane.f32.xlu1 %v896_v29 }
 0x1c7   :  { %v903_v35 = vadd.f32 %v902_v32, %v891_v31 }
 0x1c9   :  { %904 = vadd.xlane.f32.xlu0 %v903_v35 }
 0x1ca   :  { %876 = vadd.xlane.f32.xlu1 %v875_v36 }
 0x1db   :  { %6147 = vrot.lane.b32.xlu1 %v9960_v6, %s6354_s19 }
 0x1df   :  { %6142 = vrot.lane.b32.xlu0 %v9960_v6, %s6353_s18 }
 0x1e3   :  { %6152 = vrot.lane.b32.xlu0 %v9960_v6, %s6355_s20 }
 0x24c   :  { %v870_v38 = vpop.xlane.xlu0 %869 }
 0x24d   :  { %v878_v41 = vmul.f32 0.001953125, %v870_v38 }
 0x24f   :  { %v908_v43 = vmul.f32 %v878_v41, %v878_v41  ;;  %v898_v44 = vpop.xlane.xlu1 %897 }
 0x250   :  { %v906_v45 = vmul.f32 0.001953125, %v898_v44 }
 0x252   :  { %v910_v47 = vsub.f32 %v906_v45, %v908_v43  ;;  %v905_v49 = vpop.xlane.xlu0 %904 }
 0x253   :  { %v877_v48 = vpop.xlane.xlu1 %876  ;;  %v907_v54 = vmul.f32 0.001953125, %v905_v49 }
 0x254   :  { %v914_v50 = vadd.f32 1e-05, %v910_v47  ;;  %v879_v52 = vmul.f32 0.001953125, %v877_v48 }
 0x256   :  { %6266 = vrsqrt.f32 %v914_v50  ;;  %v909_v53 = vmul.f32 %v879_v52, %v879_v52  ;;  %v6833_v16 = vpop.permute.xlu0 %6142 }
 0x257   :  { %v6835_v17 = vpop.permute.xlu1 %6147 }
 0x258   :  { %v911_v55 = vsub.f32 %v907_v54, %v909_v53 }
 0x25a   :  { %v915_v58 = vadd.f32 1e-05, %v911_v55  ;;  %v6837_v19 = vpop.permute.xlu0 %6152 }
 0x25c   :  { %6268 = vrsqrt.f32 %v915_v58 }
 0x263   :  { %v6267_v60 = vpop.eup %6266 }
 0x264   :  { %v918_v1 = vmul.f32 %v6267_v60, %v912_v59 }
 0x266   :  { %928 = vperm.xlu1 %6120, %v918_v1   ;;  %v922_v57 = vmul.f32 %v918_v1, %v878_v41 }
 0x268   :  { %v924_v63 = vsub.f32 %v920_v61, %v922_v57  ;;  %v7039_v57 = vld [vmem:[%s9948_s6 + $0x8] sm:$0xff] }
 0x269   :  { %v6269_v8 = vpop.eup %6268  ;;  %10097 = vst [vmem:[#allocation17_spill] sm:$0xff] %v7039_v57  ;;  %6086 = vmatprep.mubr.msk.f32.mxu1 %vm1894_vm9, %v7039_v57  ;;  %6090 = vmatprep.mubr.msk.f32.mxu0 %vm1894_vm9, %v7039_v57 }
 0x26a   :  { %v919_v10 = vmul.f32 %v6269_v8, %v913_v3 }
 0x26c   :  { %933 = vperm.xlu0 %6119, %v919_v10   ;;  %v923_v12 = vmul.f32 %v919_v10, %v879_v52 }
 0x26e   :  { %v925_v14 = vsub.f32 %v921_v9, %v923_v12 }
 0x270   :  { %950 = vperm.xlu0 %6119, %v924_v63   ;;  %955 = vperm.xlu1 %6120, %v925_v14  }
 0x2e1   :  { %v929_v21 = vpop.permute.xlu1 %928 }
 0x2e2   :  { %v937_v23 = vmul.f32 %v929_v21, %v6730_v26  ;;  %v938_v5 = vmul.f32 %v929_v21, %v6740_v33  ;;  %v936_v29 = vmul.f32 %v929_v21, %v6727_v2  ;;  %v940_v2 = vmul.f32 %v929_v21, %v6777_v0 }
 0x2e3   :  { %v939_v38 = vmul.f32 %v929_v21, %v6760_v42  ;;  %v941_v41 = vmul.f32 %v929_v21, %v6785_v11 }
 0x2e7   :  { %v6839_v20 = vpop.permute.xlu0 %933 }
 0x2e8   :  { %v943_v45 = vmul.f32 %v6839_v20, %v6736_v28  ;;  %v942_v48 = vmul.f32 %v6839_v20, %v6733_v27  ;;  %v944_v27 = vmul.f32 %v6839_v20, %v6751_v39  ;;  %v946_v59 = vmul.f32 %v6839_v20, %v6792_v18 }
 0x2e9   :  { %v945_v60 = vmul.f32 %v6839_v20, %v6770_v51 }
 0x2eb   :  { %v951_v24 = vpop.permute.xlu0 %950  ;;  %v6945_v11 = vpop.permute.xlu1 %955 }
 0x2ec   :  { %v959_v25 = vadd.f32 %v951_v24, %v937_v23  ;;  %v960_v30 = vadd.f32 %v951_v24, %v938_v5  ;;  %v958_v31 = vadd.f32 %v951_v24, %v936_v29  ;;  %v962_v33 = vadd.f32 %v951_v24, %v940_v2 }
 0x2ed   :  { %v961_v0 = vadd.f32 %v951_v24, %v939_v38  ;;  %v963_v43 = vadd.f32 %v951_v24, %v941_v41  ;;  %v965_v47 = vadd.f32 %v6945_v11, %v943_v45  ;;  %v964_v49 = vadd.f32 %v6945_v11, %v942_v48 }
 0x2ee   :  { %v6845_v32 = vmul.f32 %v959_v25, %v6721_v15  ;;  %v6848_v35 = vmul.f32 %v960_v30, %v6723_v22  ;;  %v6855_v26 = vmul.f32 %v958_v31, %v6719_v13  ;;  %v6883_v36 = vmul.f32 %v962_v33, %v6762_v46 }
 0x2ef   :  { %v6896_v44 = vmul.f32 %v961_v0, %v6742_v34  ;;  %v6903_v42 = vmul.f32 %v963_v43, %v6772_v56  ;;  %v6962_v50 = vmul.f32 %v965_v47, %v6721_v15  ;;  %v6969_v28 = vmul.f32 %v964_v49, %v6719_v13  ;;  %v1871_v13 = vld [vmem:[%s9949_s7 + $0x8] sm:$0xff] }
 0x2f0   :  { %1600 = vrot.lane.b32.xlu0 %v6845_v32, %s6353_s18  ;;  %1602 = vrot.lane.b32.xlu1 %v6848_v35, %s6353_s18  ;;  %v966_v52 = vadd.f32 %v6945_v11, %v944_v27  ;;  %v968_v1 = vadd.f32 %v6945_v11, %v946_v59  ;;  %v967_v8 = vadd.f32 %v6945_v11, %v945_v60 }
 0x2f1   :  { %v947_v23 = vmul.f32 %v6839_v20, %v6799_v62 }
 0x2f2   :  { %v6983_v53 = vmul.f32 %v966_v52, %v6723_v22  ;;  %v7032_v18 = vmul.f32 %v968_v1, %v6762_v46  ;;  %v7042_v61 = vmul.f32 %v967_v8, %v6742_v34  ;;  %v10105_v22 = vmov 0.0  }
 0x2f3   :  { %v969_v24 = vadd.f32 %v6945_v11, %v947_v23 }
 0x2f4   :  { %1598 = vrot.lane.b32.xlu0 %v6855_v26, %s6353_s18  ;;  %1510 = vrot.lane.b32.xlu1 %v6848_v35, %s6354_s19 }
 0x2f5   :  { %v7082_v62 = vmul.f32 %v969_v24, %v6772_v56  ;;  %v1873_v56 = vld [vmem:[%s9949_s7 + $0x18] sm:$0xff] }
 0x2f8   :  { %1508 = vrot.lane.b32.xlu0 %v6845_v32, %s6354_s19  ;;  %1418 = vrot.lane.b32.xlu1 %v6848_v35, %s6355_s20 }
 0x2fc   :  { %1506 = vrot.lane.b32.xlu0 %v6855_v26, %s6354_s19  ;;  %1302 = vrot.lane.b32.xlu1 %v6845_v32, %s6356_s21 }
 0x300   :  { %1416 = vrot.lane.b32.xlu0 %v6845_v32, %s6355_s20  ;;  %1208 = vrot.lane.b32.xlu1 %v6855_v26, %s6357_s24 }
 0x304   :  { %1414 = vrot.lane.b32.xlu0 %v6855_v26, %s6355_s20  ;;  %1118 = vrot.lane.b32.xlu1 %v6845_v32, %s6358_s25 }
 0x308   :  { %1300 = vrot.lane.b32.xlu0 %v6855_v26, %s6356_s21  ;;  %1024 = vrot.lane.b32.xlu1 %v6855_v26, %s6359_s1 }
 0x30c   :  { %1210 = vrot.lane.b32.xlu0 %v6845_v32, %s6357_s24  ;;  %1606 = vrot.lane.b32.xlu1 %v6883_v36, %s6353_s18 }
 0x310   :  { %1116 = vrot.lane.b32.xlu0 %v6855_v26, %s6358_s25  ;;  %1694 = vrot.lane.b32.xlu1 %v6848_v35, %s6352_s0 }
 0x314   :  { %1026 = vrot.lane.b32.xlu0 %v6845_v32, %s6359_s1  ;;  %1512 = vrot.lane.b32.xlu1 %v6896_v44, %s6354_s19 }
 0x318   :  { %1604 = vrot.lane.b32.xlu0 %v6896_v44, %s6353_s18  ;;  %1608 = vrot.lane.b32.xlu1 %v6903_v42, %s6353_s18 }
 0x31c   :  { %1692 = vrot.lane.b32.xlu0 %v6845_v32, %s6352_s0  ;;  %1422 = vrot.lane.b32.xlu1 %v6883_v36, %s6355_s20 }
 0x320   :  { %1690 = vrot.lane.b32.xlu0 %v6855_v26, %s6352_s0  ;;  %1424 = vrot.lane.b32.xlu1 %v6903_v42, %s6355_s20 }
 0x324   :  { %1514 = vrot.lane.b32.xlu0 %v6883_v36, %s6354_s19  ;;  %1306 = vrot.lane.b32.xlu1 %v6896_v44, %s6356_s21 }
 0x328   :  { %1420 = vrot.lane.b32.xlu0 %v6896_v44, %s6355_s20  ;;  %1214 = vrot.lane.b32.xlu1 %v6896_v44, %s6357_s24 }
 0x32c   :  { %1516 = vrot.lane.b32.xlu0 %v6903_v42, %s6354_s19  ;;  %1310 = vrot.lane.b32.xlu1 %v6903_v42, %s6356_s21 }
 0x330   :  { %1304 = vrot.lane.b32.xlu0 %v6848_v35, %s6356_s21  ;;  %1122 = vrot.lane.b32.xlu1 %v6896_v44, %s6358_s25 }
 0x334   :  { %1212 = vrot.lane.b32.xlu0 %v6848_v35, %s6357_s24  ;;  %1218 = vrot.lane.b32.xlu1 %v6903_v42, %s6357_s24 }
 0x338   :  { %1308 = vrot.lane.b32.xlu0 %v6883_v36, %s6356_s21  ;;  %1030 = vrot.lane.b32.xlu1 %v6896_v44, %s6359_s1 }
 0x33c   :  { %1120 = vrot.lane.b32.xlu0 %v6848_v35, %s6358_s25  ;;  %1126 = vrot.lane.b32.xlu1 %v6903_v42, %s6358_s25 }
 0x340   :  { %1216 = vrot.lane.b32.xlu0 %v6883_v36, %s6357_s24  ;;  %1034 = vrot.lane.b32.xlu1 %v6903_v42, %s6359_s1 }
 0x344   :  { %1028 = vrot.lane.b32.xlu0 %v6848_v35, %s6359_s1  ;;  %1698 = vrot.lane.b32.xlu1 %v6883_v36, %s6352_s0 }
 0x348   :  { %1124 = vrot.lane.b32.xlu0 %v6883_v36, %s6358_s25  ;;  %1614 = vrot.lane.b32.xlu1 %v6962_v50, %s6353_s18 }
 0x34c   :  { %1032 = vrot.lane.b32.xlu0 %v6883_v36, %s6359_s1  ;;  %1612 = vrot.lane.b32.xlu1 %v6969_v28, %s6353_s18 }
 0x350   :  { %1696 = vrot.lane.b32.xlu0 %v6896_v44, %s6352_s0  ;;  %1522 = vrot.lane.b32.xlu1 %v6962_v50, %s6354_s19 }
 0x354   :  { %1616 = vrot.lane.b32.xlu0 %v6983_v53, %s6353_s18  ;;  %1520 = vrot.lane.b32.xlu1 %v6969_v28, %s6354_s19 }
 0x358   :  { %1524 = vrot.lane.b32.xlu0 %v6983_v53, %s6354_s19  ;;  %1430 = vrot.lane.b32.xlu1 %v6962_v50, %s6355_s20 }
 0x35c   :  { %1432 = vrot.lane.b32.xlu0 %v6983_v53, %s6355_s20  ;;  %1428 = vrot.lane.b32.xlu1 %v6969_v28, %s6355_s20 }
 0x360   :  { %1316 = vrot.lane.b32.xlu0 %v6962_v50, %s6356_s21  ;;  %1314 = vrot.lane.b32.xlu1 %v6969_v28, %s6356_s21 }
 0x362   :  { %v7001_v39 = vpop.permute.xlu0 %1600  ;;  %v7003_v54 = vpop.permute.xlu1 %1602 }
 0x364   :  { %1222 = vrot.lane.b32.xlu0 %v6969_v28, %s6357_s24  ;;  %1224 = vrot.lane.b32.xlu1 %v6962_v50, %s6357_s24 }
 0x366   :  { %v7009_v55 = vpop.permute.xlu0 %1598  ;;  %v7011_v58 = vpop.permute.xlu1 %1510 }
 0x368   :  { %1132 = vrot.lane.b32.xlu0 %v6962_v50, %s6358_s25  ;;  %1130 = vrot.lane.b32.xlu1 %v6969_v28, %s6358_s25 }
 0x36a   :  { %v7022_v3 = vpop.permute.xlu0 %1508  ;;  %v7025_v10 = vpop.permute.xlu1 %1418 }
 0x36c   :  { %1038 = vrot.lane.b32.xlu0 %v6969_v28, %s6359_s1  ;;  %1040 = vrot.lane.b32.xlu1 %v6962_v50, %s6359_s1 }
 0x36e   :  { %v7034_v51 = vpop.permute.xlu0 %1506  ;;  %v7044_v9 = vpop.permute.xlu1 %1302 }
 0x370   :  { %1620 = vrot.lane.b32.xlu0 %v7032_v18, %s6353_s18  ;;  %1618 = vrot.lane.b32.xlu1 %v7042_v61, %s6353_s18 }
 0x372   :  { %v7054_v12 = vpop.permute.xlu0 %1416  ;;  %v7056_v63 = vpop.permute.xlu1 %1208 }
 0x374   :  { %1708 = vrot.lane.b32.xlu0 %v6983_v53, %s6352_s0  ;;  %1706 = vrot.lane.b32.xlu1 %v6962_v50, %s6352_s0 }
 0x376   :  { %v7062_v14 = vpop.permute.xlu0 %1414  ;;  %v7064_v21 = vpop.permute.xlu1 %1118 }
 0x378   :  { %1528 = vrot.lane.b32.xlu0 %v7032_v18, %s6354_s19  ;;  %1704 = vrot.lane.b32.xlu1 %v6969_v28, %s6352_s0 }
 0x37a   :  { %v7073_v5 = vpop.permute.xlu0 %1300  ;;  %v7075_v25 = vpop.permute.xlu1 %1024 }
 0x37c   :  { %1434 = vrot.lane.b32.xlu0 %v7042_v61, %s6355_s20  ;;  %1526 = vrot.lane.b32.xlu1 %v7042_v61, %s6354_s19 }
 0x37e   :  { %v7084_v20 = vpop.permute.xlu0 %1210  ;;  %v7086_v29 = vpop.permute.xlu1 %1606 }
 0x380   :  { %1530 = vrot.lane.b32.xlu0 %v7082_v62, %s6354_s19  ;;  %1622 = vrot.lane.b32.xlu1 %v7082_v62, %s6353_s18 }
 0x382   :  { %v7092_v30 = vpop.permute.xlu0 %1116  ;;  %v7094_v31 = vpop.permute.xlu1 %1694 }
 0x384   :  { %1318 = vrot.lane.b32.xlu0 %v6983_v53, %s6356_s21  ;;  %1436 = vrot.lane.b32.xlu1 %v7032_v18, %s6355_s20 }
 0x386   :  { %v7100_v2 = vpop.permute.xlu0 %1026  ;;  %v7102_v33 = vpop.permute.xlu1 %1512 }
 0x388   :  { %1226 = vrot.lane.b32.xlu0 %v6983_v53, %s6357_s24  ;;  %1438 = vrot.lane.b32.xlu1 %v7082_v62, %s6355_s20 }
 0x38a   :  { %v7108_v38 = vpop.permute.xlu0 %1604  ;;  %v7110_v0 = vpop.permute.xlu1 %1608 }
 0x38c   :  { %1322 = vrot.lane.b32.xlu0 %v7032_v18, %s6356_s21  ;;  %1320 = vrot.lane.b32.xlu1 %v7042_v61, %s6356_s21 }
 0x38e   :  { %v7116_v41 = vpop.permute.xlu0 %1692  ;;  %v7118_v43 = vpop.permute.xlu1 %1422 }
 0x390   :  { %1134 = vrot.lane.b32.xlu0 %v6983_v53, %s6358_s25  ;;  %1228 = vrot.lane.b32.xlu1 %v7042_v61, %s6357_s24 }
 0x392   :  { %v7124_v11 = vpop.permute.xlu0 %1690  ;;  %v7126_v45 = vpop.permute.xlu1 %1424 }
 0x394   :  { %1230 = vrot.lane.b32.xlu0 %v7032_v18, %s6357_s24  ;;  %1324 = vrot.lane.b32.xlu1 %v7082_v62, %s6356_s21 }
 0x396   :  { %v7132_v47 = vpop.permute.xlu0 %1514  ;;  %v7134_v48 = vpop.permute.xlu1 %1306 }
 0x398   :  { %1042 = vrot.lane.b32.xlu0 %v6983_v53, %s6359_s1  ;;  %1136 = vrot.lane.b32.xlu1 %v7042_v61, %s6358_s25 }
 0x39a   :  { %v7140_v49 = vpop.permute.xlu0 %1420  ;;  %v7142_v27 = vpop.permute.xlu1 %1214 }
 0x39c   :  { %1138 = vrot.lane.b32.xlu0 %v7032_v18, %s6358_s25  ;;  %1232 = vrot.lane.b32.xlu1 %v7082_v62, %s6357_s24 }
 0x39e   :  { %v7148_v52 = vpop.permute.xlu0 %1516  ;;  %v7150_v59 = vpop.permute.xlu1 %1310 }
 0x39f   :  { %10098 = vst [vmem:[#allocation18_spill] sm:$0xff] %v7150_v59 }
 0x3a0   :  { %1046 = vrot.lane.b32.xlu0 %v7032_v18, %s6359_s1  ;;  %1044 = vrot.lane.b32.xlu1 %v7042_v61, %s6359_s1 }
 0x3a2   :  { %v7156_v60 = vpop.permute.xlu0 %1304  ;;  %v7158_v1 = vpop.permute.xlu1 %1122 }
 0x3a3   :  { %10099 = vst [vmem:[#allocation19_spill] sm:$0xff] %v7158_v1 }
 0x3a4   :  { %1710 = vrot.lane.b32.xlu0 %v7042_v61, %s6352_s0  ;;  %1140 = vrot.lane.b32.xlu1 %v7082_v62, %s6358_s25 }
 0x3a6   :  { %v7164_v8 = vpop.permute.xlu0 %1212  ;;  %v7166_v23 = vpop.permute.xlu1 %1218 }
 0x3a7   :  { %10100 = vst [vmem:[#allocation20_spill] sm:$0xff] %v7166_v23 }
 0x3a8   :  { %1714 = vrot.lane.b32.xlu0 %v7082_v62, %s6352_s0  ;;  %1048 = vrot.lane.b32.xlu1 %v7082_v62, %s6359_s1 }
 0x3aa   :  { %v7172_v24 = vpop.permute.xlu0 %1308  ;;  %v7174_v6 = vpop.permute.xlu1 %1030 }
 0x3ab   :  { %10101 = vst [vmem:[#allocation21_spill] sm:$0xff] %v7172_v24  ;;  %10102 = vst [vmem:[#allocation22_spill] sm:$0xff] %v7174_v6 }
 0x3ac   :  { %1700 = vrot.lane.b32.xlu0 %v6903_v42, %s6352_s0  ;;  %1712 = vrot.lane.b32.xlu1 %v7032_v18, %s6352_s0 }
 0x3ae   :  { %v7183_v46 = vpop.permute.xlu0 %1120  ;;  %v7185_v34 = vpop.permute.xlu1 %1126 }
 0x3af   :  { %10103 = vst [vmem:[#allocation23_spill] sm:$0xff] %v7183_v46  ;;  %10104 = vst [vmem:[#allocation24_spill] sm:$0xff] %v7185_v34 }
 0x3b0   :  { %1891 = vperm.xlu0 %6119, %v1873_v56   ;;  %1716 = vrot.lane.b32.xlu1 %v10105_v22, %s6352_s0  ;;  %v1872_v56 = vld [vmem:[%s9949_s7 + $0x10] sm:$0xff] }
 0x3b2   :  { %v7192_v15 = vpop.permute.xlu0 %1216  ;;  %v7194_v6 = vpop.permute.xlu1 %1034 }
 0x3b3   :  { %10106 = vst [vmem:[#allocation25_spill] sm:$0xff] %v7192_v15  ;;  %10107 = vst [vmem:[#allocation26_spill] sm:$0xff] %v7194_v6  ;;  %v1870_v15 = vld [vmem:[%s9949_s7] sm:$0xff] }
 0x3b4   :  { %1881 = vperm.xlu0 %6119, %v1871_v13   ;;  %1702 = vrot.lane.b32.xlu1 %v10105_v22, %s6352_s0 }
 0x3b6   :  { %v7198_v23 = vpop.permute.xlu0 %1028  ;;  %v7203_v34 = vpop.permute.xlu1 %1698 }
 0x3b7   :  { %10108 = vst [vmem:[#allocation27_spill] sm:$0xff] %v7198_v23  ;;  %10109 = vst [vmem:[#allocation28_spill] sm:$0xff] %v7203_v34 }
 0x3b8   :  { %1886 = vperm.xlu1 %6120, %v1872_v56  }
 0x3ba   :  { %v7205_v46 = vpop.permute.xlu0 %1124  ;;  %v1615_v6 = vpop.permute.xlu1 %1614 }
 0x3bb   :  { %10110 = vst [vmem:[#allocation29_spill] sm:$0xff] %v7205_v46 }
 0x3bc   :  { %1876 = vperm.xlu1 %6120, %v1870_v15   ;;  %v1627_v15 = vsel %vm437_vm1, %v7001_v39, %v7003_v54 }
 0x3be   :  { %v7210_v13 = vpop.permute.xlu0 %1032  ;;  %v1613_v22 = vpop.permute.xlu1 %1612 }
 0x3bf   :  { %10111 = vst [vmem:[#allocation30_spill] sm:$0xff] %v7210_v13  ;;  %v1632_v34 = vsel %vm437_vm1, %v1613_v22, %v1615_v6  ;;  %v1626_v13 = vsel %vm437_vm1, %v7009_v55, %v7001_v39  ;;  %v1535_v22 = vsel %vm390_vm2, %v7022_v3, %v7011_v58 }
 0x3c2   :  { %v7212_v1 = vpop.permute.xlu0 %1696  ;;  %v1523_v23 = vpop.permute.xlu1 %1522 }
 0x3c3   :  { %10112 = vst [vmem:[#allocation31_spill] sm:$0xff] %v7212_v1 }
 0x3c6   :  { %v7214_v24 = vpop.permute.xlu0 %1616  ;;  %v1521_v59 = vpop.permute.xlu1 %1520 }
 0x3c7   :  { %v1633_v56 = vsel %vm437_vm1, %v1615_v6, %v7214_v24  ;;  %v1540_v6 = vsel %vm390_vm2, %v1521_v59, %v1523_v23 }
 0x3c8   :  { %1907 = vmatprep.subr.mxu1 %v1633_v56 }
 0x3c9   :  { %1908 = vmatpush1.msra.mxu1 %v1632_v34  ;;  %v1534_v34 = vsel %vm390_vm2, %v7034_v51, %v7022_v3  ;;  %v1442_v3 = vsel %vm343_vm3, %v7062_v14, %v7054_v12  ;;  %v6125_v14 = vunpack.i.h.bf16 %v6815_v7 }
 0x3ca   :  { %1909 = vmatprep.subr.mxu1 %v1627_v15  ;;  %v7225_v1 = vpop.permute.xlu0 %1524  ;;  %v1431_v46 = vpop.permute.xlu1 %1430 }
 0x3cb   :  { %1910 = vmatpush1.msra.mxu1 %v1626_v13  ;;  %v1541_v57 = vsel %vm390_vm2, %v1523_v23, %v7225_v1 }
 0x3cc   :  { %1911 = vmatprep.subr.mxu1 %v1541_v57  ;;  %v1443_v57 = vsel %vm343_vm3, %v7054_v12, %v7025_v10 }
 0x3cd   :  { %1912 = vmatpush1.msra.mxu1 %v1540_v6 }
 0x3ce   :  { %1913 = vmatprep.subr.mxu1 %v1535_v22  ;;  %v7236_v39 = vpop.permute.xlu0 %1432  ;;  %v1429_v55 = vpop.permute.xlu1 %1428 }
 0x3cf   :  { %1914 = vmatpush1.msra.mxu1 %v1534_v34  ;;  %v1449_v13 = vsel %vm343_vm3, %v1431_v46, %v7236_v39  ;;  %v1448_v59 = vsel %vm343_vm3, %v1429_v55, %v1431_v46  ;;  %v6124_v46 = vunpack.i.l.bf16 %v6815_v7  ;;  %v6130_v34 = vunpack.i.h.bf16 %v6813_v37 }
 0x3d0   :  { %1915 = vmatprep.subr.mxu1 %v1449_v13  ;;  %v1235_v13 = vsel %vm237_vm5, %v7056_v63, %v7084_v20 }
 0x3d1   :  { %1916 = vmatpush1.msra.mxu1 %v1448_v59  ;;  %v6134_v59 = vunpack.i.l.bf16 %v6819_v4 }
 0x3d2   :  { %1917 = vmatprep.subr.mxu1 %v1443_v57  ;;  %v7247_v51 = vpop.permute.xlu0 %1316  ;;  %v1315_v23 = vpop.permute.xlu1 %1314 }
 0x3d3   :  { %1918 = vmatpush1.msra.mxu1 %v1442_v3  ;;  %v1333_v12 = vsel %vm284_vm4, %v1315_v23, %v7247_v51  ;;  %v1332_v6 = vsel %vm284_vm4, %v6124_v46, %v1315_v23  ;;  %v6135_v23 = vunpack.i.h.bf16 %v6819_v4 }
 0x3d4   :  { %1919 = vmatprep.subr.mxu1 %v6962_v50  ;;  %v1327_v50 = vsel %vm284_vm4, %v7073_v5, %v7044_v9 }
 0x3d5   :  { %1920 = vmatpush1.msra.mxu1 %v6969_v28 }
 0x3d6   :  { %1921 = vmatprep.subr.mxu1 %v6845_v32  ;;  %v1223_v56 = vpop.permute.xlu0 %1222  ;;  %v7253_v15 = vpop.permute.xlu1 %1224  ;;  %v6129_v32 = vunpack.i.l.bf16 %v6813_v37 }
 0x3d7   :  { %1922 = vmatpush1.msra.mxu1 %v6855_v26  ;;  %v1326_v26 = vsel %vm284_vm4, %v6125_v14, %v7073_v5  ;;  %v1241_v7 = vsel %vm237_vm5, %v1223_v56, %v7253_v15  ;;  %v1234_v5 = vsel %vm237_vm5, %v6130_v34, %v7056_v63  ;;  %v1142_v14 = vsel %vm190_vm6, %v6135_v23, %v7092_v30  ;;  %v7327_v23 = vld [vmem:[%s9948_s6 + $0x18] sm:$0xff] }
 0x3d8   :  { %1923 = vmatprep.subr.mxu1 %v1333_v12  ;;  %v1240_v55 = vsel %vm237_vm5, %v6129_v32, %v1223_v56  ;;  %v1143_v56 = vsel %vm190_vm6, %v7092_v30, %v7064_v21  ;;  %v6139_v12 = vunpack.i.l.bf16 %v6817_v40  ;;  %v1051_v30 = vsel %vm143_vm7, %v7075_v25, %v7100_v2 }
 0x3d9   :  { %1924 = vmatpush1.msra.mxu1 %v1332_v6 }
 0x3da   :  { %1925 = vmatprep.subr.mxu1 %v1327_v50  ;;  %v7264_v28 = vpop.permute.xlu0 %1132  ;;  %v1131_v22 = vpop.permute.xlu1 %1130  ;;  %v6140_v50 = vunpack.i.h.bf16 %v6817_v40  ;;  %v1629_v40 = vsel %vm437_vm1, %v7108_v38, %v7086_v29 }
 0x3db   :  { %1926 = vmatpush1.msra.mxu1 %v1326_v26  ;;  %v1149_v37 = vsel %vm190_vm6, %v1131_v22, %v7264_v28  ;;  %v1148_v46 = vsel %vm190_vm6, %v6134_v59, %v1131_v22 }
 0x3dc   :  { %1927 = vmatprep.subr.mxu1 %v1241_v7  ;;  %v1050_v34 = vsel %vm143_vm7, %v6140_v50, %v7075_v25  ;;  %v1719_v25 = vsel %vm484_vm0, %v7116_v41, %v7094_v31  ;;  %v1536_v50 = vsel %vm390_vm2, %v7011_v58, %v7102_v33 }
 0x3dd   :  { %1928 = vmatpush1.msra.mxu1 %v1240_v55 }
 0x3de   :  { %1929 = vmatprep.subr.mxu1 %v1235_v13  ;;  %v1039_v57 = vpop.permute.xlu0 %1038  ;;  %v7278_v3 = vpop.permute.xlu1 %1040 }
 0x3df   :  { %1930 = vmatpush1.msra.mxu1 %v1234_v5  ;;  %v1057_v4 = vsel %vm143_vm7, %v1039_v57, %v7278_v3  ;;  %v1056_v26 = vsel %vm143_vm7, %v6139_v12, %v1039_v57 }
 0x3e0   :  { %1931 = vmatprep.subr.mxu1 %v1149_v37  ;;  %v7319_v37 = vld [vmem:[%s9948_s6] sm:$0xff] }
 0x3e1   :  { %1932 = vmatpush1.msra.mxu1 %v1148_v46 }
 0x3e2   :  { %1933 = vmatprep.subr.mxu1 %v1143_v56  ;;  %v1621_v63 = vpop.permute.xlu0 %1620  ;;  %v1619_v6 = vpop.permute.xlu1 %1618 }
 0x3e3   :  { %1934 = vmatpush1.msra.mxu1 %v1142_v14  ;;  %v1635_v32 = vsel %vm437_vm1, %v1619_v6, %v1621_v63  ;;  %v1634_v22 = vsel %vm437_vm1, %v7214_v24, %v1619_v6  ;;  %v1628_v24 = vsel %vm437_vm1, %v7003_v54, %v7108_v38  ;;  %v1718_v54 = vsel %vm484_vm0, %v7124_v11, %v7116_v41  ;;  %v7338_v41 = vld [vmem:[%s9948_s6 + $0x10] sm:$0xff] }
 0x3e4   :  { %1935 = vmatprep.subr.mxu1 %v1057_v4  ;;  %1996 = vmatprep.subr.mxu0 %v1635_v32  ;;  %v6144_v11 = vunpack.i.l.bf16 %v6833_v16  ;;  %v1537_v14 = vsel %vm390_vm2, %v7102_v33, %v7132_v47  ;;  %v6145_v32 = vunpack.i.h.bf16 %v6833_v16  ;;  %v6149_v33 = vunpack.i.l.bf16 %v6835_v17 }
 0x3e5   :  { %1936 = vmatpush1.msra.mxu1 %v1056_v26  ;;  %1997 = vmatpush1.msra.mxu0 %v1634_v22 }
 0x3e6   :  { %1937 = vmatprep.subr.mxu1 %v1051_v30  ;;  %v7303_v7 = vpop.permute.xlu0 %1708  ;;  %v1707_v55 = vpop.permute.xlu1 %1706  ;;  %1998 = vmatprep.subr.mxu0 %v1629_v40  ;;  %v7361_v30 = vld [vmem:[%s9948_s6 + $0x20] sm:$0xff]  ;;  %v1631_v16 = vsel %vm437_vm1, %v7110_v0, %v6145_v32 }
 0x3e7   :  { %1938 = vmatpush1.msra.mxu1 %v1050_v34  ;;  %1999 = vmatpush1.msra.mxu0 %v1628_v24  ;;  %v1725_v13 = vsel %vm484_vm0, %v1707_v55, %v7303_v7  ;;  %v6150_v24 = vunpack.i.h.bf16 %v6835_v17 }
 0x3e8   :  { %1967 = vmatprep.subr.mxu1 %v1725_v13 }
 0x3ea   :  { %v1529_v59 = vpop.permute.xlu0 %1528  ;;  %v1705_v57 = vpop.permute.xlu1 %1704 }
 0x3eb   :  { %v1724_v5 = vsel %vm484_vm0, %v1705_v57, %v1707_v55  ;;  %v7374_v55 = vld [vmem:[%s9948_s6 + $0x38] sm:$0xff] }
 0x3ec   :  { %1968 = vmatpush2.msra.mxu1 %v1724_v5  ;;  %v6154_v5 = vunpack.i.l.bf16 %v6837_v19 }
 0x3ed   :  { %1969 = vmatprep.subr.mxu1 %v1719_v25  ;;  %v7385_v25 = vld [vmem:[%s9948_s6 + $0x30] sm:$0xff] }
 0x3ee   :  { %v1435_v38 = vpop.permute.xlu0 %1434  ;;  %v1527_v46 = vpop.permute.xlu1 %1526  ;;  %1970 = vmatpush2.msra.mxu1 %v1718_v54  ;;  %v1539_v54 = vsel %vm390_vm2, %v7148_v52, %v6150_v24 }
 0x3ef   :  { %1972 = vmatmul.mubr.f32.vlgmr.msra.gmra.mxu1 %v7319_v37  ;;  %v1543_v56 = vsel %vm390_vm2, %v1527_v46, %v1529_v59  ;;  %v1542_v12 = vsel %vm390_vm2, %v7225_v1, %v1527_v46  ;;  %v7347_v1 = vld [vmem:[%s9948_s6 + $0x28] sm:$0xff]  ;;  %v1450_v57 = vsel %vm343_vm3, %v7236_v39, %v1435_v38  ;;  %v1445_v39 = vsel %vm343_vm3, %v7140_v49, %v7118_v43 }
 0x3f0   :  { %2000 = vmatprep.subr.mxu0 %v1543_v56  ;;  %6087 = vmatprep.mubr.msk.f32.mxu1 %vm1894_vm9, %v7327_v23  ;;  %v1538_v46 = vsel %vm390_vm2, %v7132_v47, %v7148_v52  ;;  %v1329_v52 = vsel %vm284_vm4, %v7156_v60, %v7134_v48 }
 0x3f1   :  { %2001 = vmatpush1.msra.mxu0 %v1542_v12  ;;  %v6155_v12 = vunpack.i.h.bf16 %v6837_v19  ;;  %v1446_v19 = vsel %vm343_vm3, %v7118_v43, %v7126_v45 }
 0x3f2   :  { %v1531_v6 = vpop.permute.xlu0 %1530  ;;  %v1623_v4 = vpop.permute.xlu1 %1622  ;;  %2002 = vmatprep.subr.mxu0 %v1537_v14  ;;  %v10113_v14 = vld [vmem:[#allocation17_spill] sm:$0xff] }
 0x3f3   :  { %1978 = vmatmul.mubr.f32.gmra.mxu1 %v7338_v41  ;;  %2003 = vmatpush1.msra.mxu0 %v1536_v50  ;;  %v1637_v26 = vsel %vm437_vm1, %v1623_v4, %v6144_v11  ;;  %v1636_v22 = vsel %vm437_vm1, %v1621_v63, %v1623_v4  ;;  %v1630_v63 = vsel %vm437_vm1, %v7086_v29, %v7110_v0 }
 0x3f4   :  { %2085 = vmatprep.subr.mxu1 %v1637_v26  ;;  %6088 = vmatprep.mubr.msk.f32.mxu1 %vm1894_vm9, %v7347_v1  ;;  %v1545_v13 = vsel %vm390_vm2, %v1531_v6, %v6149_v33  ;;  %v1544_v29 = vsel %vm390_vm2, %v1529_v59, %v1531_v6  ;;  %v1444_v59 = vsel %vm343_vm3, %v7025_v10, %v7140_v49  ;;  %v10115_v6 = vld [vmem:[#allocation21_spill] sm:$0xff]  ;;  %v10116_v26 = vld [vmem:[#allocation19_spill] sm:$0xff] }
 0x3f5   :  { %2086 = vmatpush1.msra.mxu1 %v1636_v22  ;;  %v1447_v49 = vsel %vm343_vm3, %v7126_v45, %v6155_v12  ;;  %v1330_v32 = vsel %vm284_vm4, %v7134_v48, %v10115_v6  ;;  %v10117_v22 = vld [vmem:[#allocation23_spill] sm:$0xff] }
 0x3f6   :  { %v1319_v58 = vpop.permute.xlu0 %1318  ;;  %v1437_v40 = vpop.permute.xlu1 %1436  ;;  %2087 = vmatprep.subr.mxu1 %v1631_v16 }
 0x3f7   :  { %1984 = vmatmul.mubr.f32.gmra.mxu1 %v7361_v30  ;;  %v1451_v34 = vsel %vm343_vm3, %v1435_v38, %v1437_v40 }
 0x3f8   :  { %2088 = vmatpush1.msra.mxu1 %v1630_v63  ;;  %2004 = vmatprep.subr.mxu0 %v1451_v34  ;;  %v10119_v34 = vld [vmem:[#allocation25_spill] sm:$0xff] }
 0x3f9   :  { %2089 = vmatprep.subr.mxu1 %v1545_v13  ;;  %2005 = vmatpush1.msra.mxu0 %v1450_v57  ;;  %v1238_v57 = vsel %vm237_vm5, %v7142_v27, %v10119_v34 }
 0x3fa   :  { %v1227_v0 = vpop.permute.xlu0 %1226  ;;  %2090 = vmatpush1.msra.mxu1 %v1544_v29  ;;  %v1439_v17 = vpop.permute.xlu1 %1438  ;;  %6089 = vmatprep.mubr.msk.f32.mxu1 %vm1894_vm9, %v7374_v55 }
 0x3fb   :  { %2006 = vmatprep.subr.mxu0 %v1445_v39  ;;  %2091 = vmatprep.subr.mxu1 %v1539_v54  ;;  %v1453_v38 = vsel %vm343_vm3, %v1439_v17, %v6154_v5  ;;  %v1452_v56 = vsel %vm343_vm3, %v1437_v40, %v1439_v17  ;;  %v1144_v40 = vsel %vm190_vm6, %v7064_v21, %v10117_v22  ;;  %v10121_v17 = vld [vmem:[#allocation27_spill] sm:$0xff] }
 0x3fc   :  { %1990 = vmatmul.mubr.f32.gmra.mxu1 %v7385_v25  ;;  %2007 = vmatpush1.msra.mxu0 %v1444_v59  ;;  %v1052_v59 = vsel %vm143_vm7, %v7100_v2, %v10121_v17 }
 0x3fd   :  { %2092 = vmatpush1.msra.mxu1 %v1538_v46  ;;  %2008 = vmatprep.subr.mxu0 %v7042_v61 }
 0x3fe   :  { %v1323_v11 = vpop.permute.xlu0 %1322  ;;  %2093 = vmatprep.subr.mxu1 %v1453_v38  ;;  %2009 = vmatpush1.msra.mxu0 %v6983_v53  ;;  %v1321_v10 = vpop.permute.xlu1 %1320  ;;  %v1334_v53 = vsel %vm284_vm4, %v7247_v51, %v1319_v58 }
 0x3ff   :  { %2094 = vmatpush1.msra.mxu1 %v1452_v56  ;;  %2010 = vmatprep.subr.mxu0 %v6896_v44  ;;  %v1335_v47 = vsel %vm284_vm4, %v1319_v58, %v1321_v10  ;;  %v1145_v58 = vsel %vm190_vm6, %v10117_v22, %v10116_v26  ;;  %v10123_v56 = vld [vmem:[#allocation29_spill] sm:$0xff] }
 0x400   :  { %2095 = vmatprep.subr.mxu1 %v1447_v49  ;;  %2011 = vmatpush1.msra.mxu0 %v6848_v35  ;;  %v1328_v35 = vsel %vm284_vm4, %v7044_v9, %v7156_v60  ;;  %v1336_v9 = vsel %vm284_vm4, %v1321_v10, %v1323_v11  ;;  %v1146_v10 = vsel %vm190_vm6, %v10116_v26, %v10123_v56 }
 0x401   :  { %2096 = vmatpush1.msra.mxu1 %v1446_v19  ;;  %2012 = vmatprep.subr.mxu0 %v1335_v47  ;;  %v10124_v47 = vld [vmem:[#allocation26_spill] sm:$0xff] }
 0x402   :  { %v1135_v61 = vpop.permute.xlu0 %1134  ;;  %2097 = vmatprep.subr.mxu1 %v7082_v62  ;;  %2013 = vmatpush1.msra.mxu0 %v1334_v53  ;;  %v1229_v44 = vpop.permute.xlu1 %1228  ;;  %v1242_v62 = vsel %vm237_vm5, %v7253_v15, %v1227_v0  ;;  %v10114_v15 = vld [vmem:[#allocation18_spill] sm:$0xff] }
 0x403   :  { %2098 = vmatpush1.msra.mxu1 %v7032_v18  ;;  %2014 = vmatprep.subr.mxu0 %v1329_v52  ;;  %v1243_v43 = vsel %vm237_vm5, %v1227_v0, %v1229_v44  ;;  %v1237_v18 = vsel %vm237_vm5, %v7164_v8, %v7142_v27  ;;  %v1331_v4 = vsel %vm284_vm4, %v10115_v6, %v10114_v15  ;;  %v10120_v0 = vld [vmem:[#allocation22_spill] sm:$0xff] }
 0x404   :  { %2099 = vmatprep.subr.mxu1 %v6903_v42  ;;  %2015 = vmatpush1.msra.mxu0 %v1328_v35  ;;  %v1236_v42 = vsel %vm237_vm5, %v7084_v20, %v7164_v8  ;;  %v1150_v8 = vsel %vm190_vm6, %v7264_v28, %v1135_v61  ;;  %v10118_v28 = vld [vmem:[#allocation20_spill] sm:$0xff]  ;;  %v1053_v39 = vsel %vm143_vm7, %v10121_v17, %v10120_v0  ;;  %v10125_v19 = vld [vmem:[#allocation30_spill] sm:$0xff] }
 0x405   :  { %2100 = vmatpush1.msra.mxu1 %v6883_v36  ;;  %2016 = vmatprep.subr.mxu0 %v1243_v43  ;;  %v1239_v24 = vsel %vm237_vm5, %v10119_v34, %v10118_v28  ;;  %v1055_v53 = vsel %vm143_vm7, %v10125_v19, %v10124_v47  ;;  %v10129_v28 = vld [vmem:[#allocation12_spill] sm:$0xff] }
 0x406   :  { %v1231_v45 = vpop.permute.xlu0 %1230  ;;  %2017 = vmatpush1.msra.mxu0 %v1242_v62  ;;  %v1325_v51 = vpop.permute.xlu1 %1324  ;;  %6094 = vmatprep.mubr.msk.f32.mxu1 %vm1894_vm9, %v10113_v14  ;;  %v10126_v62 = vld [vmem:[#allocation28_spill] sm:$0xff] }
 0x407   :  { %2018 = vmatprep.subr.mxu0 %v1237_v18  ;;  %v1337_v36 = vsel %vm284_vm4, %v1323_v11, %v1325_v51  ;;  %v1244_v63 = vsel %vm237_vm5, %v1229_v44, %v1231_v45  ;;  %v1054_v44 = vsel %vm143_vm7, %v10120_v0, %v10125_v19 }
 0x408   :  { %2019 = vmatpush1.msra.mxu0 %v1236_v42  ;;  %2101 = vmatprep.subr.mxu1 %v1337_v36 }
 0x409   :  { %2102 = vmatpush1.msra.mxu1 %v1336_v9 }
 0x40a   :  { %v1043_v60 = vpop.permute.xlu0 %1042  ;;  %v1137_v50 = vpop.permute.xlu1 %1136  ;;  %2103 = vmatprep.subr.mxu1 %v1331_v4 }
 0x40b   :  { %2104 = vmatpush1.msra.mxu1 %v1330_v32  ;;  %v1151_v20 = vsel %vm190_vm6, %v1135_v61, %v1137_v50  ;;  %v1058_v29 = vsel %vm143_vm7, %v7278_v3, %v1043_v60  ;;  %v10122_v3 = vld [vmem:[#allocation24_spill] sm:$0xff] }
 0x40c   :  { %2020 = vmatprep.subr.mxu0 %v1151_v20  ;;  %v1147_v12 = vsel %vm190_vm6, %v10123_v56, %v10122_v3 }
 0x40d   :  { %2021 = vmatpush1.msra.mxu0 %v1150_v8 }
 0x40e   :  { %v1139_v16 = vpop.permute.xlu0 %1138  ;;  %v1233_v33 = vpop.permute.xlu1 %1232  ;;  %2022 = vmatprep.subr.mxu0 %v1145_v58 }
 0x40f   :  { %2023 = vmatpush1.msra.mxu0 %v1144_v40  ;;  %v1245_v48 = vsel %vm237_vm5, %v1231_v45, %v1233_v33  ;;  %v1152_v38 = vsel %vm190_vm6, %v1137_v50, %v1139_v16  ;;  %v10127_v45 = vld [vmem:[#allocation31_spill] sm:$0xff] }
 0x410   :  { %2105 = vmatprep.subr.mxu1 %v1245_v48  ;;  %v1721_v51 = vsel %vm484_vm0, %v10127_v45, %v10126_v62  ;;  %v1720_v14 = vsel %vm484_vm0, %v7094_v31, %v10127_v45 }
 0x411   :  { %2106 = vmatpush1.msra.mxu1 %v1244_v63 }
 0x412   :  { %v1045_v13 = vpop.permute.xlu1 %1044  ;;  %2107 = vmatprep.subr.mxu1 %v1239_v24  ;;  %v1047_v5 = vpop.permute.xlu0 %1046 }
 0x413   :  { %2108 = vmatpush1.msra.mxu1 %v1238_v57  ;;  %v1059_v21 = vsel %vm143_vm7, %v1043_v60, %v1045_v13  ;;  %v1060_v49 = vsel %vm143_vm7, %v1045_v13, %v1047_v5  ;;  %v10130_v57 = vld [vmem:[#allocation11_spill] sm:$0xff] }
 0x414   :  { %2024 = vmatprep.subr.mxu0 %v1059_v21 }
 0x415   :  { %2025 = vmatpush1.msra.mxu0 %v1058_v29 }
 0x416   :  { %v1141_v54 = vpop.permute.xlu1 %1140  ;;  %2026 = vmatprep.subr.mxu0 %v1053_v39  ;;  %v1711_v46 = vpop.permute.xlu0 %1710 }
 0x417   :  { %2027 = vmatpush1.msra.mxu0 %v1052_v59  ;;  %v1153_v27 = vsel %vm190_vm6, %v1139_v16, %v1141_v54  ;;  %v1726_v43 = vsel %vm484_vm0, %v7303_v7, %v1711_v46 }
 0x418   :  { %2109 = vmatprep.subr.mxu1 %v1153_v27 }
 0x419   :  { %2110 = vmatpush1.msra.mxu1 %v1152_v38 }
 0x41a   :  { %v1049_v11 = vpop.permute.xlu1 %1048  ;;  %2111 = vmatprep.subr.mxu1 %v1147_v12  ;;  %v1715_v52 = vpop.permute.xlu0 %1714 }
 0x41b   :  { %2112 = vmatpush1.msra.mxu1 %v1146_v10  ;;  %v1061_v2 = vsel %vm143_vm7, %v1047_v5, %v1049_v11 }
 0x41c   :  { %2113 = vmatprep.subr.mxu1 %v1061_v2 }
 0x41d   :  { %2114 = vmatpush1.msra.mxu1 %v1060_v49 }
 0x41e   :  { %v1713_v61 = vpop.permute.xlu1 %1712  ;;  %2115 = vmatprep.subr.mxu1 %v1055_v53  ;;  %v1701_v7 = vpop.permute.xlu0 %1700 }
 0x41f   :  { %2116 = vmatpush1.msra.mxu1 %v1054_v44  ;;  %v1727_v35 = vsel %vm484_vm0, %v1711_v46, %v1713_v61  ;;  %v1728_v36 = vsel %vm484_vm0, %v1713_v61, %v1715_v52  ;;  %v1722_v31 = vsel %vm484_vm0, %v10126_v62, %v1701_v7  ;;  %v10131_v62 = vld [vmem:[#allocation13_spill] sm:$0xff] }
 0x420   :  { %2056 = vmatprep.subr.mxu0 %v1727_v35 }
 0x421   :  { %2057 = vmatpush2.msra.mxu0 %v1726_v43 }
 0x422   :  { %v1717_v18 = vpop.permute.xlu1 %1716  ;;  %2058 = vmatprep.subr.mxu0 %v1721_v51 }
 0x423   :  { %2059 = vmatpush2.msra.mxu0 %v1720_v14  ;;  %v1729_v42 = vsel %vm484_vm0, %v1715_v52, %v1717_v18 }
 0x424   :  { %2061 = vmatmul.mubr.f32.vlgmr.msra.gmra.mxu0 %v7319_v37  ;;  %2145 = vmatprep.subr.mxu1 %v1729_v42 }
 0x425   :  { %2146 = vmatpush2.msra.mxu1 %v1728_v36  ;;  %6091 = vmatprep.mubr.msk.f32.mxu0 %vm1894_vm9, %v7327_v23 }
 0x426   :  { %v1703_v9 = vpop.permute.xlu1 %1702 }
 0x427   :  { %v1723_v60 = vsel %vm484_vm0, %v1701_v7, %v1703_v9 }
 0x428   :  { %2067 = vmatmul.mubr.f32.gmra.mxu0 %v7338_v41  ;;  %2147 = vmatprep.subr.mxu1 %v1723_v60 }
 0x429   :  { %2148 = vmatpush2.msra.mxu1 %v1722_v31  ;;  %6092 = vmatprep.mubr.msk.f32.mxu0 %vm1894_vm9, %v7347_v1 }
 0x42a   :  { %2150 = vmatmul.mubr.f32.vlgmr.msra.gmra.mxu1 %v7319_v37  ;;  %v10128_v37 = vmov 0.0  }
 0x42b   :  { %6095 = vmatprep.mubr.msk.f32.mxu1 %vm1894_vm9, %v7327_v23  ;;  %6157 = vrot.lane.b32.xlu0 %v10128_v37, %s6356_s21  ;;  %v7544_v15 = vpop.permute.xlu0 %1891 }
 0x42c   :  { %2073 = vmatmul.mubr.f32.gmra.mxu0 %v7361_v30  ;;  %6162 = vrot.lane.b32.xlu1 %v10128_v37, %s6356_s21 }
 0x42d   :  { %6093 = vmatprep.mubr.msk.f32.mxu0 %vm1894_vm9, %v7374_v55 }
 0x42e   :  { %2156 = vmatmul.mubr.f32.gmra.mxu1 %v7338_v41 }
 0x42f   :  { %6096 = vmatprep.mubr.msk.f32.mxu1 %vm1894_vm9, %v7347_v1  ;;  %6167 = vrot.lane.b32.xlu0 %v10128_v37, %s6357_s24  ;;  %v7546_v32 = vpop.permute.xlu0 %1881 }
 0x430   :  { %2079 = vmatmul.mubr.f32.gmra.mxu0 %v7385_v25  ;;  %6172 = vrot.lane.b32.xlu1 %v10128_v37, %s6357_s24 }
 0x432   :  { %2162 = vmatmul.mubr.f32.gmra.mxu1 %v7361_v30 }
 0x433   :  { %6097 = vmatprep.mubr.msk.f32.mxu1 %vm1894_vm9, %v7374_v55  ;;  %6177 = vrot.lane.b32.xlu0 %v10128_v37, %s6358_s25  ;;  %v7542_v55 = vpop.permute.xlu1 %1886 }
 0x434   :  { %6182 = vrot.lane.b32.xlu1 %v10128_v37, %s6358_s25 }
 0x436   :  { %2168 = vmatmul.mubr.f32.gmra.mxu1 %v7385_v25 }
 0x437   :  { %4384 = vmatprep.mubr.f32.mxu1 %v10128_v37  ;;  %6187 = vrot.lane.b32.xlu0 %v10128_v37, %s6359_s1  ;;  %v1877_v6 = vpop.permute.xlu1 %1876 }
 0x438   :  { %6192 = vrot.lane.b32.xlu1 %v10128_v37, %s6359_s1 }
 0x43b   :  { %6202 = vrot.lane.b32.xlu0 %v10128_v37, %s6353_s18 }
 0x43c   :  { %6197 = vrot.lane.b32.xlu1 %v10128_v37, %s6353_s18 }
 0x4af   :  { %v1973_v23 = vpop.f32.mrf.mxu1 }
 0x4b0   :  { %v1974_v20 = vadd.f32 %v1973_v23, %v1877_v6 }
 0x4b1   :  { %v1975_v41 = vpop.f32.mrf.mxu1 }
 0x4b2   :  { %v1976_v50 = vadd.f32 %v1975_v41, %v1877_v6  ;;  %v2174_v33 = vmax.f32 %v1974_v20, 0.0 }
 0x4b3   :  { %v1979_v1 = vpop.f32.mrf.mxu1 }
 0x4b4   :  { %v2175_v22 = vmax.f32 %v1976_v50, 0.0  ;;  %v1980_v58 = vadd.f32 %v1979_v1, %v7546_v32  ;;  %v7556_v5 = vmul.f32 %v2174_v33, %v10130_v57 }
 0x4b5   :  { %v1981_v30 = vpop.f32.mrf.mxu1 }
 0x4b6   :  { %v1982_v8 = vadd.f32 %v1981_v30, %v7546_v32  ;;  %v7553_v34 = vmul.f32 %v2175_v22, %v10129_v28  ;;  %v2180_v24 = vmax.f32 %v1980_v58, 0.0  ;;  %v2254_v12 = vmul.f32 %v7556_v5, %v7556_v5  ;;  %v10132_v58 = vld [vmem:[#allocation14_spill] sm:$0xff] }
 0x4b7   :  { %v1985_v25 = vpop.f32.mrf.mxu1 }
 0x4b8   :  { %v2181_v40 = vmax.f32 %v1982_v8, 0.0  ;;  %v1986_v48 = vadd.f32 %v1985_v25, %v7542_v55  ;;  %v2255_v59 = vmul.f32 %v7553_v34, %v7553_v34  ;;  %v7566_v27 = vmul.f32 %v2180_v24, %v10130_v57 }
 0x4b9   :  { %v1987_v4 = vpop.f32.mrf.mxu1  ;;  %v2222_v53 = vadd.f32 %v7553_v34, %v7556_v5 }
 0x4ba   :  { %v1988_v16 = vadd.f32 %v1987_v4, %v7542_v55  ;;  %v7561_v17 = vmul.f32 %v2181_v40, %v10129_v28  ;;  %v2186_v39 = vmax.f32 %v1986_v48, 0.0  ;;  %v2278_v61 = vadd.f32 %v2255_v59, %v2254_v12 }
 0x4bb   :  { %v2260_v44 = vmul.f32 %v7566_v27, %v7566_v27 }
 0x4bc   :  { %v1991_v26 = vpop.f32.mrf.mxu1  ;;  %v2187_v13 = vmax.f32 %v1988_v16, 0.0  ;;  %v2261_v49 = vmul.f32 %v7561_v17, %v7561_v17  ;;  %v7576_v47 = vmul.f32 %v2186_v39, %v10130_v57  ;;  %v2229_v31 = vadd.f32 %v7561_v17, %v7566_v27 }
 0x4bd   :  { %v1992_v21 = vadd.f32 %v1991_v26, %v7544_v15 }
 0x4be   :  { %v1993_v63 = vpop.f32.mrf.mxu1  ;;  %v7569_v46 = vmul.f32 %v2187_v13, %v10129_v28  ;;  %v2285_v23 = vadd.f32 %v2261_v49, %v2260_v44  ;;  %v2266_v41 = vmul.f32 %v7576_v47, %v7576_v47 }
 0x4bf   :  { %v1994_v29 = vadd.f32 %v1993_v63, %v7544_v15  ;;  %v2192_v11 = vmax.f32 %v1992_v21, 0.0 }
 0x4c0   :  { %v2267_v43 = vmul.f32 %v7569_v46, %v7569_v46  ;;  %v2236_v30 = vadd.f32 %v7569_v46, %v7576_v47 }
 0x4c1   :  { %v2193_v10 = vmax.f32 %v1994_v29, 0.0  ;;  %v7589_v14 = vmul.f32 %v2192_v11, %v10130_v57 }
 0x4c2   :  { %v2292_v40 = vadd.f32 %v2267_v43, %v2266_v41 }
 0x4c3   :  { %v7592_v42 = vmul.f32 %v2193_v10, %v10129_v28  ;;  %v7614_v48 = vmul.f32 %v7589_v14, %v7589_v14 }
 0x4c5   :  { %v2273_v11 = vmul.f32 %v7592_v42, %v7592_v42 }
 0x4e4   :  { %v2062_v0 = vpop.f32.mrf.mxu0 }
 0x4e5   :  { %v2063_v54 = vadd.f32 %v2062_v0, %v1877_v6 }
 0x4e6   :  { %v2064_v38 = vpop.f32.mrf.mxu0 }
 0x4e7   :  { %v2176_v3 = vmax.f32 %v2063_v54, 0.0  ;;  %v2065_v56 = vadd.f32 %v2064_v38, %v1877_v6 }
 0x4e8   :  { %v2068_v2 = vpop.f32.mrf.mxu0 }
 0x4e9   :  { %v2069_v19 = vadd.f32 %v2068_v2, %v7546_v32  ;;  %v7586_v45 = vmul.f32 %v2176_v3, %v10131_v62  ;;  %v2177_v51 = vmax.f32 %v2065_v56, 0.0 }
 0x4ea   :  { %v2070_v52 = vpop.f32.mrf.mxu0  ;;  %v2151_v35 = vpop.f32.mrf.mxu1 }
 0x4eb   :  { %v2182_v18 = vmax.f32 %v2069_v19, 0.0  ;;  %v2071_v36 = vadd.f32 %v2070_v52, %v7546_v32  ;;  %v2152_v7 = vadd.f32 %v2151_v35, %v1877_v6  ;;  %v2223_v26 = vadd.f32 %v2222_v53, %v7586_v45  ;;  %v10133_v53 = vld [vmem:[#allocation15_spill] sm:$0xff] }
 0x4ec   :  { %v2074_v9 = vpop.f32.mrf.mxu0  ;;  %v2153_v60 = vpop.f32.mrf.mxu1  ;;  %v2256_v22 = vmul.f32 %v7586_v45, %v7586_v45  ;;  %v7609_v16 = vmul.f32 %v2177_v51, %v10132_v58 }
 0x4ed   :  { %v7600_v1 = vmul.f32 %v2182_v18, %v10131_v62  ;;  %v2183_v25 = vmax.f32 %v2071_v36, 0.0  ;;  %v2075_v4 = vadd.f32 %v2074_v9, %v7542_v55  ;;  %v2154_v50 = vadd.f32 %v2153_v60, %v1877_v6  ;;  %v10134_v9 = vld [vmem:[#allocation16_spill] sm:$0xff] }
 0x4ee   :  { %v2076_v20 = vpop.f32.mrf.mxu0  ;;  %v2157_v8 = vpop.f32.mrf.mxu1  ;;  %v2243_v6 = vadd.f32 %v7592_v42, %v7589_v14  ;;  %v2178_v63 = vmax.f32 %v2152_v7, 0.0  ;;  %v2279_v10 = vadd.f32 %v2278_v61, %v2256_v22  ;;  %v2224_v2 = vadd.f32 %v2223_v26, %v7609_v16 }
 0x4ef   :  { %v2158_v33 = vadd.f32 %v2157_v8, %v7546_v32  ;;  %v2262_v21 = vmul.f32 %v7600_v1, %v7600_v1  ;;  %v2188_v29 = vmax.f32 %v2075_v4, 0.0  ;;  %v2077_v0 = vadd.f32 %v2076_v20, %v7542_v55 }
 0x4f0   :  { %v2080_v24 = vpop.f32.mrf.mxu0  ;;  %v2159_v13 = vpop.f32.mrf.mxu1  ;;  %v2230_v54 = vadd.f32 %v2229_v31, %v7600_v1  ;;  %v7624_v59 = vmul.f32 %v2183_v25, %v10132_v58  ;;  %v2179_v38 = vmax.f32 %v2154_v50, 0.0  ;;  %v2257_v19 = vmul.f32 %v7609_v16, %v7609_v16 }
 0x4f1   :  { %v2081_v39 = vadd.f32 %v2080_v24, %v7544_v15  ;;  %v2184_v3 = vmax.f32 %v2158_v33, 0.0  ;;  %v7632_v44 = vmul.f32 %v2178_v63, %v10133_v53  ;;  %v2160_v52 = vadd.f32 %v2159_v13, %v7546_v32 }
 0x4f2   :  { %v2082_v56 = vpop.f32.mrf.mxu0  ;;  %v2163_v12 = vpop.f32.mrf.mxu1  ;;  %v2286_v51 = vadd.f32 %v2285_v23, %v2262_v21  ;;  %v7637_v18 = vmul.f32 %v2188_v29, %v10131_v62  ;;  %v2189_v36 = vmax.f32 %v2077_v0, 0.0  ;;  %v2231_v7 = vadd.f32 %v2230_v54, %v7624_v59 }
 0x4f3   :  { %v2194_v49 = vmax.f32 %v2081_v39, 0.0  ;;  %v2083_v35 = vadd.f32 %v2082_v56, %v7544_v15  ;;  %v2164_v61 = vadd.f32 %v2163_v12, %v7542_v55  ;;  %v7642_v60 = vmul.f32 %v2179_v38, %v10134_v9 }
 0x4f4   :  { %v2165_v43 = vpop.f32.mrf.mxu1  ;;  %v7645_v31 = vmul.f32 %v2184_v3, %v10133_v53  ;;  %v2185_v41 = vmax.f32 %v2160_v52, 0.0  ;;  %v2263_v20 = vmul.f32 %v7624_v59, %v7624_v59  ;;  %v2225_v26 = vadd.f32 %v2224_v2, %v7632_v44 }
 0x4f5   :  { %v7648_v25 = vmul.f32 %v2194_v49, %v10131_v62  ;;  %v2195_v23 = vmax.f32 %v2083_v35, 0.0  ;;  %v2190_v4 = vmax.f32 %v2164_v61, 0.0  ;;  %v2166_v50 = vadd.f32 %v2165_v43, %v7542_v55 }
 0x4f6   :  { %v2169_v32 = vpop.f32.mrf.mxu1  ;;  %v7654_v8 = vmul.f32 %v2185_v41, %v10134_v9  ;;  %v2258_v63 = vmul.f32 %v7632_v44, %v7632_v44  ;;  %v2237_v24 = vadd.f32 %v2236_v30, %v7637_v18  ;;  %v2268_v13 = vmul.f32 %v7637_v18, %v7637_v18 }
 0x4f7   :  { %v2170_v22 = vadd.f32 %v2169_v32, %v7544_v15  ;;  %v7664_v55 = vmul.f32 %v2189_v36, %v10132_v58  ;;  %v2264_v21 = vmul.f32 %v7645_v31, %v7645_v31  ;;  %v2226_v29 = vadd.f32 %v2225_v26, %v7642_v60 }
 0x4f8   :  { %v2171_v33 = vpop.f32.mrf.mxu1  ;;  %v2244_v54 = vadd.f32 %v2243_v6, %v7648_v25  ;;  %v7672_v38 = vmul.f32 %v2195_v23, %v10132_v58  ;;  %v7675_v30 = vmul.f32 %v2190_v4, %v10133_v53  ;;  %v2191_v3 = vmax.f32 %v2166_v50, 0.0 }
 0x4f9   :  { %v2196_v0 = vmax.f32 %v2170_v22, 0.0  ;;  %v2172_v39 = vadd.f32 %v2171_v33, %v7544_v15  ;;  %2227 = vadd.xlane.f32.xlu0 %v2226_v29  ;;  %v2259_v56 = vmul.f32 %v7642_v60, %v7642_v60  ;;  %v2280_v12 = vadd.f32 %v2279_v10, %v2257_v19 }
 0x4fa   :  { %v2265_v2 = vmul.f32 %v7654_v8, %v7654_v8  ;;  %v2287_v49 = vadd.f32 %v2286_v51, %v2263_v20  ;;  %v2293_v52 = vadd.f32 %v2292_v40, %v2268_v13  ;;  %v2238_v15 = vadd.f32 %v2237_v24, %v7664_v55 }
 0x4fb   :  { %v2269_v6 = vmul.f32 %v7664_v55, %v7664_v55  ;;  %v2274_v35 = vmul.f32 %v7648_v25, %v7648_v25  ;;  %v7687_v43 = vmul.f32 %v2196_v0, %v10133_v53  ;;  %v2197_v36 = vmax.f32 %v2172_v39, 0.0 }
 0x4fc   :  { %v2281_v61 = vadd.f32 %v2280_v12, %v2258_v63  ;;  %v2288_v41 = vadd.f32 %v2287_v49, %v2264_v21  ;;  %v2299_v10 = vadd.f32 %v2273_v11, %v7614_v48  ;;  %v2245_v19 = vadd.f32 %v2244_v54, %v7672_v38 }
 0x4fd   :  { %v2270_v40 = vmul.f32 %v7675_v30, %v7675_v30  ;;  %v7694_v51 = vmul.f32 %v2191_v3, %v10134_v9  ;;  %v2232_v4 = vadd.f32 %v2231_v7, %v7645_v31  ;;  %v2239_v50 = vadd.f32 %v2238_v15, %v7675_v30 }
 0x4fe   :  { %v2282_v32 = vadd.f32 %v2281_v61, %v2259_v56  ;;  %v2289_v23 = vadd.f32 %v2288_v41, %v2265_v2  ;;  %v2300_v20 = vadd.f32 %v2299_v10, %v2274_v35  ;;  %v2275_v26 = vmul.f32 %v7672_v38, %v7672_v38  ;;  %v7713_v56 = vpop.permute.xlu0 %6157  ;;  %v7717_v2 = vpop.permute.xlu1 %6162 }
 0x4ff   :  { %v7701_v48 = vmul.f32 %v2197_v36, %v10134_v9  ;;  %v2246_v11 = vadd.f32 %v2245_v19, %v7687_v43  ;;  %v2294_v22 = vadd.f32 %v2293_v52, %v2269_v6  ;;  %v2271_v33 = vmul.f32 %v7694_v51, %v7694_v51 }
 0x500   :  { %2283 = vadd.xlane.f32.xlu0 %v2282_v32  ;;  %2290 = vadd.xlane.f32.xlu1 %v2289_v23  ;;  %v2276_v7 = vmul.f32 %v7687_v43, %v7687_v43  ;;  %v2233_v63 = vadd.f32 %v2232_v4, %v7654_v8  ;;  %v2240_v24 = vadd.f32 %v2239_v50, %v7694_v51 }
 0x501   :  { %v2295_v13 = vadd.f32 %v2294_v22, %v2270_v40  ;;  %v2247_v21 = vadd.f32 %v2246_v11, %v7701_v48  ;;  %v2301_v29 = vadd.f32 %v2300_v20, %v2275_v26  ;;  %v2277_v39 = vmul.f32 %v7701_v48, %v7701_v48 }
 0x502   :  { %v7715_v12 = vpop.permute.xlu0 %6167  ;;  %v7721_v52 = vpop.permute.xlu1 %6172 }
 0x503   :  { %v2296_v0 = vadd.f32 %v2295_v13, %v2271_v33  ;;  %v2302_v54 = vadd.f32 %v2301_v29, %v2276_v7 }
 0x504   :  { %2234 = vadd.xlane.f32.xlu0 %v2233_v63  ;;  %2241 = vadd.xlane.f32.xlu1 %v2240_v24 }
 0x505   :  { %v2303_v3 = vadd.f32 %v2302_v54, %v2277_v39 }
 0x506   :  { %v7719_v49 = vpop.permute.xlu0 %6177  ;;  %v7725_v6 = vpop.permute.xlu1 %6182 }
 0x508   :  { %2248 = vadd.xlane.f32.xlu0 %v2247_v21  ;;  %2297 = vadd.xlane.f32.xlu1 %v2296_v0 }
 0x50a   :  { %v7723_v15 = vpop.permute.xlu0 %6187  ;;  %v7729_v36 = vpop.permute.xlu1 %6192 }
 0x50c   :  { %2304 = vadd.xlane.f32.xlu0 %v2303_v3 }
 0x50e   :  { %v7727_v35 = vpop.permute.xlu0 %6202  ;;  %v7731_v41 = vpop.permute.xlu1 %6197 }
 0x50f   :  { %10135 = vst [vmem:[#allocation17_spill] sm:$0xff] %v7727_v35  ;;  %10136 = vst [vmem:[#allocation18_spill] sm:$0xff] %v7731_v41 }
 0x582   :  { %v2228_v61 = vpop.xlane.xlu0 %2227 }
 0x583   :  { %v2250_v10 = vmul.f32 0.001953125, %v2228_v61 }
 0x585   :  { %v2310_v32 = vmul.f32 %v2250_v10, %v2250_v10 }
 0x589   :  { %v2284_v19 = vpop.xlane.xlu0 %2283  ;;  %v2291_v40 = vpop.xlane.xlu1 %2290 }
 0x58a   :  { %v2306_v23 = vmul.f32 0.001953125, %v2284_v19  ;;  %v2307_v33 = vmul.f32 0.001953125, %v2291_v40  ;;  %v2318_v40 = vld [vmem:[%s9950_s8] sm:$0xff] }
 0x58c   :  { %v2314_v4 = vsub.f32 %v2306_v23, %v2310_v32 }
 0x58d   :  { %v2235_v50 = vpop.xlane.xlu0 %2234  ;;  %v2242_v20 = vpop.xlane.xlu1 %2241 }
 0x58e   :  { %v2322_v26 = vadd.f32 1e-05, %v2314_v4  ;;  %v2251_v11 = vmul.f32 0.001953125, %v2235_v50  ;;  %v2252_v22 = vmul.f32 0.001953125, %v2242_v20 }
 0x590   :  { %6270 = vrsqrt.f32 %v2322_v26  ;;  %v2311_v7 = vmul.f32 %v2251_v11, %v2251_v11  ;;  %v2312_v21 = vmul.f32 %v2252_v22, %v2252_v22  ;;  %v2319_v26 = vld [vmem:[%s9950_s8 + $0x8] sm:$0xff] }
 0x591   :  { %v2249_v63 = vpop.xlane.xlu0 %2248  ;;  %v2298_v24 = vpop.xlane.xlu1 %2297 }
 0x592   :  { %v2315_v13 = vsub.f32 %v2307_v33, %v2311_v7  ;;  %v2253_v29 = vmul.f32 0.001953125, %v2249_v63  ;;  %v2308_v0 = vmul.f32 0.001953125, %v2298_v24  ;;  %v2320_v7 = vld [vmem:[%s9950_s8 + $0x10] sm:$0xff] }
 0x594   :  { %v2323_v39 = vadd.f32 1e-05, %v2315_v13  ;;  %v2316_v54 = vsub.f32 %v2308_v0, %v2312_v21  ;;  %v2313_v61 = vmul.f32 %v2253_v29, %v2253_v29  ;;  %v2334_v21 = vld [vmem:[%s9951_s9] sm:$0xff] }
 0x595   :  { %v2305_v3 = vpop.xlane.xlu0 %2304 }
 0x596   :  { %6272 = vrsqrt.f32 %v2323_v39  ;;  %v2324_v19 = vadd.f32 1e-05, %v2316_v54  ;;  %v2309_v32 = vmul.f32 0.001953125, %v2305_v3  ;;  %v2335_v54 = vld [vmem:[%s9951_s9 + $0x8] sm:$0xff]  ;;  %v2321_v3 = vld [vmem:[%s9950_s8 + $0x18] sm:$0xff] }
 0x598   :  { %6274 = vrsqrt.f32 %v2324_v19  ;;  %v2317_v23 = vsub.f32 %v2309_v32, %v2313_v61 }
 0x59a   :  { %v2325_v4 = vadd.f32 1e-05, %v2317_v23 }
 0x59c   :  { %6276 = vrsqrt.f32 %v2325_v4 }
 0x59d   :  { %v6271_v50 = vpop.eup %6270 }
 0x59e   :  { %v2330_v20 = vmul.f32 %v6271_v50, %v2318_v40  ;;  %v2337_v40 = vld [vmem:[%s9951_s9 + $0x18] sm:$0xff] }
 0x5a0   :  { %2348 = vperm.xlu1 %6120, %v2330_v20   ;;  %v2338_v24 = vmul.f32 %v2330_v20, %v2250_v10 }
 0x5a2   :  { %v2342_v61 = vsub.f32 %v2334_v21, %v2338_v24 }
 0x5a3   :  { %v6273_v33 = vpop.eup %6272 }
 0x5a4   :  { %v2331_v63 = vmul.f32 %v6273_v33, %v2319_v26 }
 0x5a5   :  { %v6275_v13 = vpop.eup %6274 }
 0x5a6   :  { %v2339_v0 = vmul.f32 %v2331_v63, %v2251_v11  ;;  %2353 = vperm.xlu1 %6120, %v2331_v63   ;;  %v2332_v39 = vmul.f32 %v6275_v13, %v2320_v7  ;;  %v2336_v11 = vld [vmem:[%s9951_s9 + $0x10] sm:$0xff] }
 0x5a8   :  { %2358 = vperm.xlu0 %6119, %v2332_v39   ;;  %v2343_v10 = vsub.f32 %v2335_v54, %v2339_v0  ;;  %v2340_v23 = vmul.f32 %v2332_v39, %v2252_v22 }
 0x5a9   :  { %v6277_v19 = vpop.eup %6276 }
 0x5aa   :  { %2392 = vperm.xlu1 %6120, %v2342_v61   ;;  %v2333_v32 = vmul.f32 %v6277_v19, %v2321_v3  ;;  %v2344_v50 = vsub.f32 %v2336_v11, %v2340_v23 }
 0x5ac   :  { %2397 = vperm.xlu0 %6119, %v2343_v10   ;;  %v2341_v4 = vmul.f32 %v2333_v32, %v2253_v29 }
 0x5ae   :  { %2363 = vperm.xlu1 %6120, %v2333_v32   ;;  %v2345_v20 = vsub.f32 %v2337_v40, %v2341_v4 }
 0x5b0   :  { %2402 = vperm.xlu0 %6119, %v2344_v50  }
 0x5b2   :  { %2407 = vperm.xlu1 %6120, %v2345_v20  }
 0x61b   :  { %v2349_v26 = vpop.permute.xlu1 %2348 }
 0x61c   :  { %v2366_v22 = vmul.f32 %v2349_v26, %v7556_v5  ;;  %v2367_v7 = vmul.f32 %v2349_v26, %v7553_v34  ;;  %v2368_v34 = vmul.f32 %v2349_v26, %v7586_v45  ;;  %v2369_v45 = vmul.f32 %v2349_v26, %v7609_v16 }
 0x61d   :  { %v2370_v3 = vmul.f32 %v2349_v26, %v7632_v44  ;;  %v2371_v44 = vmul.f32 %v2349_v26, %v7642_v60 }
 0x621   :  { %v7757_v33 = vpop.permute.xlu1 %2353 }
 0x622   :  { %v2373_v23 = vmul.f32 %v7757_v33, %v7561_v17  ;;  %v2372_v17 = vmul.f32 %v7757_v33, %v7566_v27  ;;  %v2374_v27 = vmul.f32 %v7757_v33, %v7600_v1 }
 0x623   :  { %v7841_v32 = vpop.permute.xlu0 %2358 }
 0x624   :  { %v2379_v35 = vmul.f32 %v7841_v32, %v7569_v46 }
 0x625   :  { %v2393_v63 = vpop.permute.xlu1 %2392 }
 0x626   :  { %v2410_v24 = vadd.f32 %v2393_v63, %v2366_v22  ;;  %v2411_v13 = vadd.f32 %v2393_v63, %v2367_v7  ;;  %v2412_v5 = vadd.f32 %v2393_v63, %v2368_v34  ;;  %v2413_v39 = vadd.f32 %v2393_v63, %v2369_v45 }
 0x627   :  { %v2414_v16 = vadd.f32 %v2393_v63, %v2370_v3  ;;  %v2415_v19 = vadd.f32 %v2393_v63, %v2371_v44  ;;  %v2398_v60 = vpop.permute.xlu0 %2397  ;;  %v2375_v63 = vmul.f32 %v7757_v33, %v7624_v59 }
 0x628   :  { %v7762_v29 = vmul.f32 %v2410_v24, %v10130_v57  ;;  %v7765_v21 = vmul.f32 %v2411_v13, %v10129_v28  ;;  %v7785_v0 = vmul.f32 %v2412_v5, %v10131_v62  ;;  %v7805_v54 = vmul.f32 %v2413_v39, %v10132_v58 }
 0x629   :  { %v7817_v61 = vmul.f32 %v2414_v16, %v10133_v53  ;;  %v7837_v10 = vmul.f32 %v2415_v19, %v10134_v9  ;;  %v2417_v11 = vadd.f32 %v2398_v60, %v2373_v23  ;;  %v2416_v40 = vadd.f32 %v2398_v60, %v2372_v17  ;;  %v7906_v22 = vpop.permute.xlu1 %2363 }
 0x62a   :  { %10137 = vst [vmem:[#allocation21_spill] sm:$0xff] %v7762_v29  ;;  %10138 = vst [vmem:[#allocation19_spill] sm:$0xff] %v7765_v21  ;;  %3092 = vrot.lane.b32.xlu0 %v7762_v29, %s6356_s21  ;;  %3094 = vrot.lane.b32.xlu1 %v7765_v21, %s6356_s21  ;;  %v2418_v20 = vadd.f32 %v2398_v60, %v2374_v27  ;;  %v2376_v24 = vmul.f32 %v7757_v33, %v7645_v31 }
 0x62b   :  { %10139 = vst [vmem:[#allocation23_spill] sm:$0xff] %v7785_v0  ;;  %10140 = vst [vmem:[#allocation20_spill] sm:$0xff] %v7805_v54  ;;  %v7860_v4 = vmul.f32 %v2417_v11, %v10129_v28  ;;  %v7881_v50 = vmul.f32 %v2416_v40, %v10130_v57  ;;  %v7914_v1 = vpop.permute.xlu0 %2402  ;;  %v2419_v13 = vadd.f32 %v2398_v60, %v2375_v63 }
 0x62c   :  { %10141 = vst [vmem:[#allocation25_spill] sm:$0xff] %v7817_v61  ;;  %10142 = vst [vmem:[#allocation22_spill] sm:$0xff] %v7837_v10  ;;  %v7902_v26 = vmul.f32 %v2418_v20, %v10131_v62  ;;  %v2420_v5 = vadd.f32 %v2398_v60, %v2376_v24  ;;  %v2377_v16 = vmul.f32 %v7757_v33, %v7654_v8 }
 0x62d   :  { %10143 = vst [vmem:[#allocation27_spill] sm:$0xff] %v7860_v4  ;;  %10144 = vst [vmem:[#allocation24_spill] sm:$0xff] %v7881_v50  ;;  %v7916_v7 = vpop.permute.xlu1 %2407  ;;  %v7935_v59 = vmul.f32 %v2419_v13, %v10132_v58  ;;  %v2423_v41 = vadd.f32 %v7914_v1, %v2379_v35 }
 0x62e   :  { %2908 = vrot.lane.b32.xlu0 %v7762_v29, %s6357_s24  ;;  %2910 = vrot.lane.b32.xlu1 %v7765_v21, %s6357_s24  ;;  %10145 = vst [vmem:[#allocation29_spill] sm:$0xff] %v7902_v26  ;;  %v7940_v31 = vmul.f32 %v2420_v5, %v10133_v53  ;;  %v2421_v19 = vadd.f32 %v2398_v60, %v2377_v16 }
 0x62f   :  { %10146 = vst [vmem:[#allocation26_spill] sm:$0xff] %v7935_v59  ;;  %v8031_v46 = vmul.f32 %v2423_v41, %v10129_v28 }
 0x630   :  { %10147 = vst [vmem:[#allocation30_spill] sm:$0xff] %v7940_v31  ;;  %v7961_v17 = vmul.f32 %v2421_v19, %v10134_v9 }
 0x631   :  { %10161 = vst [vmem:[#allocation43_spill] sm:$0xff] %v8031_v46 }
 0x632   :  { %2724 = vrot.lane.b32.xlu0 %v7762_v29, %s6358_s25  ;;  %2726 = vrot.lane.b32.xlu1 %v7765_v21, %s6358_s25  ;;  %10148 = vst [vmem:[#allocation28_spill] sm:$0xff] %v7961_v17 }
 0x636   :  { %2540 = vrot.lane.b32.xlu0 %v7762_v29, %s6359_s1  ;;  %2542 = vrot.lane.b32.xlu1 %v7765_v21, %s6359_s1 }
 0x63a   :  { %3694 = vrot.lane.b32.xlu0 %v7785_v0, %s6353_s18  ;;  %3692 = vrot.lane.b32.xlu1 %v7765_v21, %s6353_s18 }
 0x63e   :  { %3510 = vrot.lane.b32.xlu0 %v7785_v0, %s6354_s19  ;;  %3690 = vrot.lane.b32.xlu1 %v7762_v29, %s6353_s18 }
 0x642   :  { %3326 = vrot.lane.b32.xlu0 %v7785_v0, %s6355_s20  ;;  %3508 = vrot.lane.b32.xlu1 %v7765_v21, %s6354_s19 }
 0x646   :  { %3878 = vrot.lane.b32.xlu0 %v7785_v0, %s6352_s0  ;;  %3506 = vrot.lane.b32.xlu1 %v7762_v29, %s6354_s19 }
 0x64a   :  { %3880 = vrot.lane.b32.xlu0 %v7805_v54, %s6352_s0  ;;  %3324 = vrot.lane.b32.xlu1 %v7765_v21, %s6355_s20 }
 0x64e   :  { %3096 = vrot.lane.b32.xlu0 %v7785_v0, %s6356_s21  ;;  %3322 = vrot.lane.b32.xlu1 %v7762_v29, %s6355_s20 }
 0x652   :  { %3100 = vrot.lane.b32.xlu0 %v7817_v61, %s6356_s21  ;;  %3876 = vrot.lane.b32.xlu1 %v7765_v21, %s6352_s0 }
 0x656   :  { %2912 = vrot.lane.b32.xlu0 %v7785_v0, %s6357_s24  ;;  %3874 = vrot.lane.b32.xlu1 %v7762_v29, %s6352_s0 }
 0x65a   :  { %2916 = vrot.lane.b32.xlu0 %v7817_v61, %s6357_s24  ;;  %3882 = vrot.lane.b32.xlu1 %v7817_v61, %s6352_s0 }
 0x65e   :  { %2728 = vrot.lane.b32.xlu0 %v7785_v0, %s6358_s25  ;;  %3098 = vrot.lane.b32.xlu1 %v7805_v54, %s6356_s21 }
 0x662   :  { %2732 = vrot.lane.b32.xlu0 %v7817_v61, %s6358_s25  ;;  %3102 = vrot.lane.b32.xlu1 %v7837_v10, %s6356_s21 }
 0x666   :  { %2544 = vrot.lane.b32.xlu0 %v7785_v0, %s6359_s1  ;;  %2914 = vrot.lane.b32.xlu1 %v7805_v54, %s6357_s24 }
 0x66a   :  { %2548 = vrot.lane.b32.xlu0 %v7817_v61, %s6359_s1  ;;  %2918 = vrot.lane.b32.xlu1 %v7837_v10, %s6357_s24 }
 0x66e   :  { %3696 = vrot.lane.b32.xlu0 %v7805_v54, %s6353_s18  ;;  %2730 = vrot.lane.b32.xlu1 %v7805_v54, %s6358_s25 }
 0x672   :  { %3108 = vrot.lane.b32.xlu0 %v7860_v4, %s6356_s21  ;;  %2734 = vrot.lane.b32.xlu1 %v7837_v10, %s6358_s25 }
 0x676   :  { %2924 = vrot.lane.b32.xlu0 %v7860_v4, %s6357_s24  ;;  %2546 = vrot.lane.b32.xlu1 %v7805_v54, %s6359_s1 }
 0x67a   :  { %2740 = vrot.lane.b32.xlu0 %v7860_v4, %s6358_s25  ;;  %2550 = vrot.lane.b32.xlu1 %v7837_v10, %s6359_s1 }
 0x67e   :  { %2556 = vrot.lane.b32.xlu0 %v7860_v4, %s6359_s1  ;;  %3698 = vrot.lane.b32.xlu1 %v7817_v61, %s6353_s18 }
 0x682   :  { %3706 = vrot.lane.b32.xlu0 %v7860_v4, %s6353_s18  ;;  %3106 = vrot.lane.b32.xlu1 %v7881_v50, %s6356_s21 }
 0x686   :  { %3704 = vrot.lane.b32.xlu0 %v7881_v50, %s6353_s18  ;;  %2922 = vrot.lane.b32.xlu1 %v7881_v50, %s6357_s24 }
 0x68a   :  { %3522 = vrot.lane.b32.xlu0 %v7860_v4, %s6354_s19  ;;  %2738 = vrot.lane.b32.xlu1 %v7881_v50, %s6358_s25 }
 0x68e   :  { %3520 = vrot.lane.b32.xlu0 %v7881_v50, %s6354_s19  ;;  %2554 = vrot.lane.b32.xlu1 %v7881_v50, %s6359_s1 }
 0x692   :  { %3338 = vrot.lane.b32.xlu0 %v7860_v4, %s6355_s20  ;;  %3708 = vrot.lane.b32.xlu1 %v7902_v26, %s6353_s18 }
 0x696   :  { %3336 = vrot.lane.b32.xlu0 %v7881_v50, %s6355_s20  ;;  %3524 = vrot.lane.b32.xlu1 %v7902_v26, %s6354_s19 }
 0x69a   :  { %3890 = vrot.lane.b32.xlu0 %v7860_v4, %s6352_s0  ;;  %3340 = vrot.lane.b32.xlu1 %v7902_v26, %s6355_s20 }
 0x69c   :  { %v7926_v34 = vpop.permute.xlu0 %3092  ;;  %v7928_v45 = vpop.permute.xlu1 %3094 }
 0x69e   :  { %3888 = vrot.lane.b32.xlu0 %v7881_v50, %s6352_s0  ;;  %3892 = vrot.lane.b32.xlu1 %v7902_v26, %s6352_s0 }
 0x6a0   :  { %v7937_v39 = vpop.permute.xlu0 %2908  ;;  %v7942_v3 = vpop.permute.xlu1 %2910 }
 0x6a2   :  { %3894 = vrot.lane.b32.xlu0 %v7935_v59, %s6352_s0  ;;  %3896 = vrot.lane.b32.xlu1 %v7940_v31, %s6352_s0 }
 0x6a4   :  { %v7950_v44 = vpop.permute.xlu0 %2724  ;;  %v7952_v23 = vpop.permute.xlu1 %2726 }
 0x6a6   :  { %3110 = vrot.lane.b32.xlu0 %v7902_v26, %s6356_s21  ;;  %3112 = vrot.lane.b32.xlu1 %v7935_v59, %s6356_s21 }
 0x6a8   :  { %v7958_v11 = vpop.permute.xlu0 %2540  ;;  %v7963_v8 = vpop.permute.xlu1 %2542 }
 0x6aa   :  { %3114 = vrot.lane.b32.xlu0 %v7940_v31, %s6356_s21  ;;  %3116 = vrot.lane.b32.xlu1 %v7961_v17, %s6356_s21 }
 0x6ac   :  { %v7969_v33 = vpop.permute.xlu0 %3694  ;;  %v7971_v60 = vpop.permute.xlu1 %3692 }
 0x6ae   :  { %2926 = vrot.lane.b32.xlu0 %v7902_v26, %s6357_s24  ;;  %2928 = vrot.lane.b32.xlu1 %v7935_v59, %s6357_s24 }
 0x6b0   :  { %v7977_v40 = vpop.permute.xlu0 %3510  ;;  %v7979_v27 = vpop.permute.xlu1 %3690 }
 0x6b1   :  { %10149 = vst [vmem:[#allocation31_spill] sm:$0xff] %v7977_v40  ;;  %10150 = vst [vmem:[#allocation32_spill] sm:$0xff] %v7979_v27 }
 0x6b2   :  { %2930 = vrot.lane.b32.xlu0 %v7940_v31, %s6357_s24  ;;  %2932 = vrot.lane.b32.xlu1 %v7961_v17, %s6357_s24 }
 0x6b4   :  { %v7985_v20 = vpop.permute.xlu0 %3326  ;;  %v7987_v63 = vpop.permute.xlu1 %3508 }
 0x6b5   :  { %10151 = vst [vmem:[#allocation33_spill] sm:$0xff] %v7985_v20  ;;  %10152 = vst [vmem:[#allocation34_spill] sm:$0xff] %v7987_v63 }
 0x6b6   :  { %2742 = vrot.lane.b32.xlu0 %v7902_v26, %s6358_s25  ;;  %2744 = vrot.lane.b32.xlu1 %v7935_v59, %s6358_s25 }
 0x6b8   :  { %v7993_v24 = vpop.permute.xlu0 %3878  ;;  %v7995_v13 = vpop.permute.xlu1 %3506 }
 0x6b9   :  { %10153 = vst [vmem:[#allocation35_spill] sm:$0xff] %v7993_v24  ;;  %10154 = vst [vmem:[#allocation36_spill] sm:$0xff] %v7995_v13 }
 0x6ba   :  { %2746 = vrot.lane.b32.xlu0 %v7940_v31, %s6358_s25  ;;  %2748 = vrot.lane.b32.xlu1 %v7961_v17, %s6358_s25 }
 0x6bc   :  { %v8001_v5 = vpop.permute.xlu0 %3880  ;;  %v8003_v16 = vpop.permute.xlu1 %3324 }
 0x6bd   :  { %10155 = vst [vmem:[#allocation37_spill] sm:$0xff] %v8001_v5  ;;  %10156 = vst [vmem:[#allocation38_spill] sm:$0xff] %v8003_v16 }
 0x6be   :  { %2558 = vrot.lane.b32.xlu0 %v7902_v26, %s6359_s1  ;;  %2560 = vrot.lane.b32.xlu1 %v7935_v59, %s6359_s1 }
 0x6c0   :  { %v8009_v19 = vpop.permute.xlu0 %3096  ;;  %v8011_v0 = vpop.permute.xlu1 %3322 }
 0x6c1   :  { %10157 = vst [vmem:[#allocation39_spill] sm:$0xff] %v8009_v19  ;;  %10158 = vst [vmem:[#allocation40_spill] sm:$0xff] %v8011_v0  ;;  %v2378_v19 = vmul.f32 %v7841_v32, %v7576_v47 }
 0x6c2   :  { %2562 = vrot.lane.b32.xlu0 %v7940_v31, %s6359_s1  ;;  %2564 = vrot.lane.b32.xlu1 %v7961_v17, %s6359_s1 }
 0x6c3   :  { %v2422_v35 = vadd.f32 %v7914_v1, %v2378_v19 }
 0x6c4   :  { %v8020_v5 = vpop.permute.xlu0 %3100  ;;  %v8022_v26 = vpop.permute.xlu1 %3876 }
 0x6c5   :  { %10159 = vst [vmem:[#allocation41_spill] sm:$0xff] %v8020_v5  ;;  %10160 = vst [vmem:[#allocation42_spill] sm:$0xff] %v8022_v26  ;;  %v8045_v47 = vmul.f32 %v2422_v35, %v10130_v57 }
 0x6c6   :  { %3710 = vrot.lane.b32.xlu0 %v7935_v59, %s6353_s18  ;;  %3712 = vrot.lane.b32.xlu1 %v7940_v31, %s6353_s18 }
 0x6c7   :  { %10165 = vst [vmem:[#allocation47_spill] sm:$0xff] %v8045_v47 }
 0x6c8   :  { %v8033_v29 = vpop.permute.xlu0 %2912  ;;  %v8036_v21 = vpop.permute.xlu1 %3874 }
 0x6c9   :  { %10162 = vst [vmem:[#allocation44_spill] sm:$0xff] %v8033_v29  ;;  %10163 = vst [vmem:[#allocation45_spill] sm:$0xff] %v8036_v21  ;;  %v2380_v29 = vmul.f32 %v7841_v32, %v7637_v18 }
 0x6ca   :  { %3122 = vrot.lane.b32.xlu0 %v8031_v46, %s6356_s21  ;;  %3714 = vrot.lane.b32.xlu1 %v7961_v17, %s6353_s18 }
 0x6cb   :  { %v2424_v35 = vadd.f32 %v7914_v1, %v2380_v29 }
 0x6cc   :  { %v8042_v5 = vpop.permute.xlu0 %2916  ;;  %v8047_v26 = vpop.permute.xlu1 %3882 }
 0x6cd   :  { %10164 = vst [vmem:[#allocation46_spill] sm:$0xff] %v8042_v5  ;;  %10166 = vst [vmem:[#allocation48_spill] sm:$0xff] %v8047_v26  ;;  %v8073_v18 = vmul.f32 %v2424_v35, %v10131_v62 }
 0x6ce   :  { %2938 = vrot.lane.b32.xlu0 %v8031_v46, %s6357_s24  ;;  %3120 = vrot.lane.b32.xlu1 %v8045_v47, %s6356_s21 }
 0x6cf   :  { %10171 = vst [vmem:[#allocation53_spill] sm:$0xff] %v8073_v18 }
 0x6d0   :  { %v8053_v41 = vpop.permute.xlu0 %2728  ;;  %v8055_v19 = vpop.permute.xlu1 %3098 }
 0x6d1   :  { %10167 = vst [vmem:[#allocation49_spill] sm:$0xff] %v8053_v41  ;;  %10168 = vst [vmem:[#allocation50_spill] sm:$0xff] %v8055_v19 }
 0x6d2   :  { %2754 = vrot.lane.b32.xlu0 %v8031_v46, %s6358_s25  ;;  %2936 = vrot.lane.b32.xlu1 %v8045_v47, %s6357_s24 }
 0x6d4   :  { %v8064_v5 = vpop.permute.xlu0 %2732  ;;  %v8066_v26 = vpop.permute.xlu1 %3102 }
 0x6d5   :  { %10169 = vst [vmem:[#allocation51_spill] sm:$0xff] %v8064_v5  ;;  %10170 = vst [vmem:[#allocation52_spill] sm:$0xff] %v8066_v26  ;;  %v2381_v26 = vmul.f32 %v7841_v32, %v7664_v55 }
 0x6d6   :  { %2570 = vrot.lane.b32.xlu0 %v8031_v46, %s6359_s1  ;;  %2752 = vrot.lane.b32.xlu1 %v8045_v47, %s6358_s25 }
 0x6d8   :  { %v8075_v41 = vpop.permute.xlu0 %2544  ;;  %v8077_v19 = vpop.permute.xlu1 %2914 }
 0x6d9   :  { %10172 = vst [vmem:[#allocation54_spill] sm:$0xff] %v8075_v41  ;;  %10173 = vst [vmem:[#allocation55_spill] sm:$0xff] %v8077_v19 }
 0x6da   :  { %3722 = vrot.lane.b32.xlu0 %v8073_v18, %s6353_s18  ;;  %2568 = vrot.lane.b32.xlu1 %v8045_v47, %s6359_s1 }
 0x6dc   :  { %v8083_v29 = vpop.permute.xlu0 %2548  ;;  %v8085_v5 = vpop.permute.xlu1 %2918 }
 0x6dd   :  { %10174 = vst [vmem:[#allocation56_spill] sm:$0xff] %v8083_v29  ;;  %10175 = vst [vmem:[#allocation57_spill] sm:$0xff] %v8085_v5  ;;  %v2425_v29 = vadd.f32 %v7914_v1, %v2381_v26  ;;  %v2382_v26 = vmul.f32 %v7841_v32, %v7675_v30 }
 0x6de   :  { %3538 = vrot.lane.b32.xlu0 %v8073_v18, %s6354_s19  ;;  %3720 = vrot.lane.b32.xlu1 %v8031_v46, %s6353_s18 }
 0x6df   :  { %v8111_v55 = vmul.f32 %v2425_v29, %v10132_v58 }
 0x6e0   :  { %v8091_v35 = vpop.permute.xlu0 %3696  ;;  %v8093_v41 = vpop.permute.xlu1 %2730 }
 0x6e1   :  { %10176 = vst [vmem:[#allocation58_spill] sm:$0xff] %v8091_v35  ;;  %10177 = vst [vmem:[#allocation59_spill] sm:$0xff] %v8093_v41 }
 0x6e2   :  { %3354 = vrot.lane.b32.xlu0 %v8073_v18, %s6355_s20  ;;  %3718 = vrot.lane.b32.xlu1 %v8045_v47, %s6353_s18  ;;  %10179 = vst [vmem:[#allocation61_spill] sm:$0xff] %v8111_v55 }
 0x6e4   :  { %v8102_v5 = vpop.permute.xlu0 %3108  ;;  %v8104_v19 = vpop.permute.xlu1 %2734 }
 0x6e5   :  { %10178 = vst [vmem:[#allocation60_spill] sm:$0xff] %v8104_v19  ;;  %v2426_v19 = vadd.f32 %v7914_v1, %v2382_v26 }
 0x6e6   :  { %3906 = vrot.lane.b32.xlu0 %v8073_v18, %s6352_s0  ;;  %3536 = vrot.lane.b32.xlu1 %v8031_v46, %s6354_s19 }
 0x6e7   :  { %v8133_v30 = vmul.f32 %v2426_v19, %v10133_v53 }
 0x6e8   :  { %v8113_v35 = vpop.permute.xlu0 %2924  ;;  %v8115_v41 = vpop.permute.xlu1 %2546 }
 0x6e9   :  { %10180 = vst [vmem:[#allocation62_spill] sm:$0xff] %v8115_v41  ;;  %10182 = vst [vmem:[#allocation64_spill] sm:$0xff] %v8133_v30 }
 0x6ea   :  { %3908 = vrot.lane.b32.xlu0 %v8111_v55, %s6352_s0  ;;  %3534 = vrot.lane.b32.xlu1 %v8045_v47, %s6354_s19 }
 0x6ec   :  { %v8124_v21 = vpop.permute.xlu0 %2740  ;;  %v8126_v24 = vpop.permute.xlu1 %2550 }
 0x6ed   :  { %10181 = vst [vmem:[#allocation63_spill] sm:$0xff] %v8126_v24 }
 0x6ee   :  { %3124 = vrot.lane.b32.xlu0 %v8073_v18, %s6356_s21  ;;  %3352 = vrot.lane.b32.xlu1 %v8031_v46, %s6355_s20 }
 0x6f0   :  { %v8135_v29 = vpop.permute.xlu0 %2556  ;;  %v8137_v41 = vpop.permute.xlu1 %3698 }
 0x6f1   :  { %10183 = vst [vmem:[#allocation65_spill] sm:$0xff] %v8137_v41 }
 0x6f2   :  { %3128 = vrot.lane.b32.xlu0 %v8133_v30, %s6356_s21  ;;  %3350 = vrot.lane.b32.xlu1 %v8045_v47, %s6355_s20 }
 0x6f4   :  { %v8143_v26 = vpop.permute.xlu0 %3706  ;;  %v8145_v24 = vpop.permute.xlu1 %3106 }
 0x6f6   :  { %2940 = vrot.lane.b32.xlu0 %v8073_v18, %s6357_s24  ;;  %3904 = vrot.lane.b32.xlu1 %v8031_v46, %s6352_s0  ;;  %v2383_v46 = vmul.f32 %v7841_v32, %v7694_v51 }
 0x6f8   :  { %v8151_v19 = vpop.permute.xlu0 %3704  ;;  %v8153_v50 = vpop.permute.xlu1 %2922  ;;  %v2427_v16 = vadd.f32 %v7914_v1, %v2383_v46 }
 0x6fa   :  { %2944 = vrot.lane.b32.xlu0 %v8133_v30, %s6357_s24  ;;  %3902 = vrot.lane.b32.xlu1 %v8045_v47, %s6352_s0  ;;  %v8181_v13 = vmul.f32 %v2427_v16, %v10134_v9 }
 0x6fc   :  { %v8159_v41 = vpop.permute.xlu0 %3522  ;;  %v8161_v4 = vpop.permute.xlu1 %2738  ;;  %10187 = vst [vmem:[#allocation69_spill] sm:$0xff] %v8181_v13 }
 0x6fd   :  { %10184 = vst [vmem:[#allocation66_spill] sm:$0xff] %v8159_v41 }
 0x6fe   :  { %2756 = vrot.lane.b32.xlu0 %v8073_v18, %s6358_s25  ;;  %3910 = vrot.lane.b32.xlu1 %v8133_v30, %s6352_s0 }
 0x700   :  { %v8169_v0 = vpop.permute.xlu0 %3520  ;;  %v8172_v20 = vpop.permute.xlu1 %2554 }
 0x701   :  { %10185 = vst [vmem:[#allocation67_spill] sm:$0xff] %v8169_v0 }
 0x702   :  { %2760 = vrot.lane.b32.xlu0 %v8133_v30, %s6358_s25  ;;  %3126 = vrot.lane.b32.xlu1 %v8111_v55, %s6356_s21 }
 0x704   :  { %v8178_v47 = vpop.permute.xlu0 %3338  ;;  %v8183_v51 = vpop.permute.xlu1 %3708 }
 0x705   :  { %10186 = vst [vmem:[#allocation68_spill] sm:$0xff] %v8178_v47  ;;  %v2384_v47 = vmul.f32 %v7906_v22, %v7589_v14 }
 0x706   :  { %2572 = vrot.lane.b32.xlu0 %v8073_v18, %s6359_s1  ;;  %3130 = vrot.lane.b32.xlu1 %v8181_v13, %s6356_s21 }
 0x708   :  { %v8189_v32 = vpop.permute.xlu0 %3336  ;;  %v8191_v1 = vpop.permute.xlu1 %3524 }
 0x709   :  { %10188 = vst [vmem:[#allocation70_spill] sm:$0xff] %v8189_v32  ;;  %10189 = vst [vmem:[#allocation71_spill] sm:$0xff] %v8191_v1 }
 0x70a   :  { %2576 = vrot.lane.b32.xlu0 %v8133_v30, %s6359_s1  ;;  %2942 = vrot.lane.b32.xlu1 %v8111_v55, %s6357_s24 }
 0x70c   :  { %v8197_v16 = vpop.permute.xlu0 %3890  ;;  %v8199_v46 = vpop.permute.xlu1 %3340 }
 0x70d   :  { %10190 = vst [vmem:[#allocation72_spill] sm:$0xff] %v8197_v16  ;;  %10191 = vst [vmem:[#allocation73_spill] sm:$0xff] %v8199_v46  ;;  %v2428_v16 = vadd.f32 %v7916_v7, %v2384_v47 }
 0x70e   :  { %3724 = vrot.lane.b32.xlu0 %v8111_v55, %s6353_s18  ;;  %2946 = vrot.lane.b32.xlu1 %v8181_v13, %s6357_s24 }
 0x70f   :  { %v8225_v14 = vmul.f32 %v2428_v16, %v10130_v57 }
 0x710   :  { %v8205_v18 = vpop.permute.xlu0 %3888  ;;  %v8207_v32 = vpop.permute.xlu1 %3892 }
 0x711   :  { %10192 = vst [vmem:[#allocation74_spill] sm:$0xff] %v8205_v18  ;;  %10193 = vst [vmem:[#allocation75_spill] sm:$0xff] %v8207_v32 }
 0x712   :  { %3728 = vrot.lane.b32.xlu0 %v8181_v13, %s6353_s18  ;;  %2758 = vrot.lane.b32.xlu1 %v8111_v55, %s6358_s25 }
 0x714   :  { %v8216_v46 = vpop.permute.xlu0 %3894  ;;  %v8218_v63 = vpop.permute.xlu1 %3896 }
 0x715   :  { %10194 = vst [vmem:[#allocation76_spill] sm:$0xff] %v8216_v46  ;;  %10195 = vst [vmem:[#allocation77_spill] sm:$0xff] %v8218_v63  ;;  %v2385_v63 = vmul.f32 %v7906_v22, %v7592_v42 }
 0x716   :  { %3542 = vrot.lane.b32.xlu0 %v8133_v30, %s6354_s19  ;;  %2762 = vrot.lane.b32.xlu1 %v8181_v13, %s6358_s25 }
 0x718   :  { %v8227_v18 = vpop.permute.xlu0 %3110  ;;  %v8229_v32 = vpop.permute.xlu1 %3112 }
 0x719   :  { %10196 = vst [vmem:[#allocation78_spill] sm:$0xff] %v8227_v18  ;;  %10197 = vst [vmem:[#allocation79_spill] sm:$0xff] %v8229_v32 }
 0x71a   :  { %3134 = vrot.lane.b32.xlu0 %v8225_v14, %s6356_s21  ;;  %2574 = vrot.lane.b32.xlu1 %v8111_v55, %s6359_s1 }
 0x71c   :  { %v8235_v47 = vpop.permute.xlu0 %3114  ;;  %v8237_v46 = vpop.permute.xlu1 %3116 }
 0x71d   :  { %10198 = vst [vmem:[#allocation80_spill] sm:$0xff] %v8235_v47  ;;  %10199 = vst [vmem:[#allocation81_spill] sm:$0xff] %v8237_v46  ;;  %v2429_v46 = vadd.f32 %v7916_v7, %v2385_v63 }
 0x71e   :  { %3528 = vrot.lane.b32.xlu0 %v7940_v31, %s6354_s19  ;;  %2578 = vrot.lane.b32.xlu1 %v8181_v13, %s6359_s1 }
 0x720   :  { %v8243_v16 = vpop.permute.xlu0 %2926  ;;  %v8245_v57 = vpop.permute.xlu1 %2928 }
 0x721   :  { %10200 = vst [vmem:[#allocation82_spill] sm:$0xff] %v8243_v16  ;;  %10201 = vst [vmem:[#allocation83_spill] sm:$0xff] %v8245_v57  ;;  %v8265_v57 = vmul.f32 %v2429_v46, %v10129_v28 }
 0x722   :  { %2950 = vrot.lane.b32.xlu0 %v8225_v14, %s6357_s24  ;;  %3726 = vrot.lane.b32.xlu1 %v8133_v30, %s6353_s18 }
 0x723   :  { %10205 = vst [vmem:[#allocation87_spill] sm:$0xff] %v8265_v57 }
 0x724   :  { %v8253_v47 = vpop.permute.xlu0 %2930  ;;  %v8256_v18 = vpop.permute.xlu1 %2932 }
 0x725   :  { %10202 = vst [vmem:[#allocation84_spill] sm:$0xff] %v8253_v47  ;;  %10203 = vst [vmem:[#allocation85_spill] sm:$0xff] %v8256_v18 }
 0x726   :  { %3512 = vrot.lane.b32.xlu0 %v7805_v54, %s6354_s19  ;;  %3540 = vrot.lane.b32.xlu1 %v8111_v55, %s6354_s19 }
 0x728   :  { %v8262_v16 = vpop.permute.xlu0 %2742  ;;  %v8267_v42 = vpop.permute.xlu1 %2744 }
 0x729   :  { %10204 = vst [vmem:[#allocation86_spill] sm:$0xff] %v8262_v16  ;;  %10206 = vst [vmem:[#allocation88_spill] sm:$0xff] %v8267_v42 }
 0x72a   :  { %2766 = vrot.lane.b32.xlu0 %v8225_v14, %s6358_s25  ;;  %3136 = vrot.lane.b32.xlu1 %v8265_v57, %s6356_s21 }
 0x72c   :  { %v8273_v63 = vpop.permute.xlu0 %2746  ;;  %v8275_v47 = vpop.permute.xlu1 %2748 }
 0x72d   :  { %10207 = vst [vmem:[#allocation89_spill] sm:$0xff] %v8273_v63  ;;  %10208 = vst [vmem:[#allocation90_spill] sm:$0xff] %v8275_v47 }
 0x72e   :  { %2582 = vrot.lane.b32.xlu0 %v8225_v14, %s6359_s1  ;;  %3526 = vrot.lane.b32.xlu1 %v7935_v59, %s6354_s19 }
 0x730   :  { %v8281_v46 = vpop.permute.xlu0 %2558  ;;  %v8283_v28 = vpop.permute.xlu1 %2560 }
 0x731   :  { %10209 = vst [vmem:[#allocation91_spill] sm:$0xff] %v8281_v46  ;;  %10210 = vst [vmem:[#allocation92_spill] sm:$0xff] %v8283_v28 }
 0x732   :  { %3544 = vrot.lane.b32.xlu0 %v8181_v13, %s6354_s19  ;;  %2952 = vrot.lane.b32.xlu1 %v8265_v57, %s6357_s24 }
 0x734   :  { %v8289_v18 = vpop.permute.xlu0 %2562  ;;  %v8291_v63 = vpop.permute.xlu1 %2564 }
 0x735   :  { %10211 = vst [vmem:[#allocation93_spill] sm:$0xff] %v8289_v18  ;;  %10212 = vst [vmem:[#allocation94_spill] sm:$0xff] %v8291_v63 }
 0x736   :  { %3734 = vrot.lane.b32.xlu0 %v8265_v57, %s6353_s18  ;;  %3700 = vrot.lane.b32.xlu1 %v7837_v10, %s6353_s18 }
 0x738   :  { %v8297_v47 = vpop.permute.xlu0 %3710  ;;  %v8299_v46 = vpop.permute.xlu1 %3712 }
 0x739   :  { %10213 = vst [vmem:[#allocation95_spill] sm:$0xff] %v8297_v47  ;;  %10214 = vst [vmem:[#allocation96_spill] sm:$0xff] %v8299_v46 }
 0x73a   :  { %3358 = vrot.lane.b32.xlu0 %v8133_v30, %s6355_s20  ;;  %2768 = vrot.lane.b32.xlu1 %v8265_v57, %s6358_s25  ;;  %v2386_v30 = vmul.f32 %v7906_v22, %v7648_v25 }
 0x73c   :  { %v8305_v28 = vpop.permute.xlu0 %3122  ;;  %v8307_v18 = vpop.permute.xlu1 %3714  ;;  %v2430_v46 = vadd.f32 %v7916_v7, %v2386_v30 }
 0x73d   :  { %10215 = vst [vmem:[#allocation97_spill] sm:$0xff] %v8307_v18 }
 0x73e   :  { %3732 = vrot.lane.b32.xlu0 %v8225_v14, %s6353_s18  ;;  %3514 = vrot.lane.b32.xlu1 %v7817_v61, %s6354_s19  ;;  %v8335_v32 = vmul.f32 %v2430_v46, %v10131_v62 }
 0x740   :  { %v8313_v63 = vpop.permute.xlu0 %2938  ;;  %v8315_v47 = vpop.permute.xlu1 %3120  ;;  %10216 = vst [vmem:[#allocation98_spill] sm:$0xff] %v8335_v32 }
 0x742   :  { %3550 = vrot.lane.b32.xlu0 %v8265_v57, %s6354_s19  ;;  %2584 = vrot.lane.b32.xlu1 %v8265_v57, %s6359_s1 }
 0x744   :  { %v8323_v18 = vpop.permute.xlu0 %2754  ;;  %v8326_v16 = vpop.permute.xlu1 %2936 }
 0x746   :  { %6212 = vrot.lane.b32.xlu0 %v10128_v37, %s6354_s19  ;;  %6207 = vrot.lane.b32.xlu1 %v10128_v37, %s6354_s19 }
 0x748   :  { %v8332_v42 = vpop.permute.xlu0 %2570  ;;  %v8337_v25 = vpop.permute.xlu1 %2752 }
 0x74a   :  { %3548 = vrot.lane.b32.xlu0 %v8225_v14, %s6354_s19  ;;  %3736 = vrot.lane.b32.xlu1 %v8335_v32, %s6353_s18 }
 0x74c   :  { %v8343_v30 = vpop.permute.xlu0 %3722  ;;  %v8345_v40 = vpop.permute.xlu1 %2568 }
 0x74e   :  { %3366 = vrot.lane.b32.xlu0 %v8265_v57, %s6355_s20  ;;  %3356 = vrot.lane.b32.xlu1 %v8111_v55, %s6355_s20 }
 0x750   :  { %v8351_v46 = vpop.permute.xlu0 %3538  ;;  %v8353_v62 = vpop.permute.xlu1 %3720 }
 0x751   :  { %10217 = vst [vmem:[#allocation99_spill] sm:$0xff] %v8351_v46 }
 0x752   :  { %3344 = vrot.lane.b32.xlu0 %v7940_v31, %s6355_s20  ;;  %3552 = vrot.lane.b32.xlu1 %v8335_v32, %s6354_s19  ;;  %v2388_v31 = vmul.f32 %v7906_v22, %v7687_v43  ;;  %v2387_v43 = vmul.f32 %v7906_v22, %v7672_v38 }
 0x754   :  { %v8359_v0 = vpop.permute.xlu0 %3354  ;;  %v8361_v41 = vpop.permute.xlu1 %3718 }
 0x755   :  { %10218 = vst [vmem:[#allocation100_spill] sm:$0xff] %v8359_v0  ;;  %v2432_v0 = vadd.f32 %v7916_v7, %v2388_v31 }
 0x756   :  { %3364 = vrot.lane.b32.xlu0 %v8225_v14, %s6355_s20  ;;  %3530 = vrot.lane.b32.xlu1 %v7961_v17, %s6354_s19 }
 0x757   :  { %v8392_v31 = vmul.f32 %v2432_v0, %v10133_v53  ;;  %v2389_v0 = vmul.f32 %v7906_v22, %v7701_v48 }
 0x758   :  { %v8367_v55 = vpop.permute.xlu0 %3906  ;;  %v8369_v1 = vpop.permute.xlu1 %3536 }
 0x759   :  { %10219 = vst [vmem:[#allocation101_spill] sm:$0xff] %v8367_v55  ;;  %v4219_v55 = vld [vmem:[%s9952_s10 + $0x8] sm:$0xff]  ;;  %10222 = vst [vmem:[#allocation104_spill] sm:$0xff] %v8392_v31  ;;  %v2433_v53 = vadd.f32 %v7916_v7, %v2389_v0 }
 0x75a   :  { %3918 = vrot.lane.b32.xlu0 %v8265_v57, %s6352_s0  ;;  %3368 = vrot.lane.b32.xlu1 %v8335_v32, %s6355_s20  ;;  %v2431_v57 = vadd.f32 %v7916_v7, %v2387_v43 }
 0x75b   :  { %4307 = vmatprep.mubr.f32.mxu0 %v4219_v55 }
 0x75c   :  { %v8378_v46 = vpop.permute.xlu0 %3908  ;;  %v8380_v27 = vpop.permute.xlu1 %3534 }
 0x75d   :  { %10220 = vst [vmem:[#allocation102_spill] sm:$0xff] %v8378_v46  ;;  %10221 = vst [vmem:[#allocation103_spill] sm:$0xff] %v8380_v27 }
 0x75e   :  { %3916 = vrot.lane.b32.xlu0 %v8225_v14, %s6352_s0  ;;  %3342 = vrot.lane.b32.xlu1 %v7935_v59, %s6355_s20  ;;  %v8406_v59 = vmul.f32 %v2431_v57, %v10132_v58  ;;  %v8428_v58 = vmul.f32 %v2433_v53, %v10134_v9 }
 0x760   :  { %v8394_v46 = vpop.permute.xlu0 %3124  ;;  %v8397_v27 = vpop.permute.xlu1 %3352  ;;  %10225 = vst [vmem:[#allocation107_spill] sm:$0xff] %v8406_v59 }
 0x761   :  { %10223 = vst [vmem:[#allocation105_spill] sm:$0xff] %v8394_v46 }
 0x762   :  { %3924 = vrot.lane.b32.xlu0 %v8392_v31, %s6352_s0  ;;  %3920 = vrot.lane.b32.xlu1 %v8335_v32, %s6352_s0 }
 0x764   :  { %v8403_v38 = vpop.permute.xlu0 %3128  ;;  %v8408_v55 = vpop.permute.xlu1 %3350 }
 0x765   :  { %10224 = vst [vmem:[#allocation106_spill] sm:$0xff] %v8403_v38 }
 0x766   :  { %3138 = vrot.lane.b32.xlu0 %v8335_v32, %s6356_s21  ;;  %3922 = vrot.lane.b32.xlu1 %v8406_v59, %s6352_s0 }
 0x768   :  { %v8416_v43 = vpop.permute.xlu0 %2940  ;;  %v8419_v46 = vpop.permute.xlu1 %3904 }
 0x769   :  { %10226 = vst [vmem:[#allocation108_spill] sm:$0xff] %v8416_v43 }
 0x76a   :  { %3142 = vrot.lane.b32.xlu0 %v8392_v31, %s6356_s21  ;;  %3140 = vrot.lane.b32.xlu1 %v8406_v59, %s6356_s21 }
 0x76c   :  { %v8425_v57 = vpop.permute.xlu0 %2944  ;;  %v8430_v48 = vpop.permute.xlu1 %3902 }
 0x76d   :  { %10227 = vst [vmem:[#allocation109_spill] sm:$0xff] %v8425_v57 }
 0x76e   :  { %2954 = vrot.lane.b32.xlu0 %v8335_v32, %s6357_s24  ;;  %3144 = vrot.lane.b32.xlu1 %v8428_v58, %s6356_s21 }
 0x770   :  { %v8436_v22 = vpop.permute.xlu0 %2756  ;;  %v8438_v7 = vpop.permute.xlu1 %3910 }
 0x771   :  { %10228 = vst [vmem:[#allocation110_spill] sm:$0xff] %v8436_v22  ;;  %10229 = vst [vmem:[#allocation111_spill] sm:$0xff] %v8438_v7 }
 0x772   :  { %2958 = vrot.lane.b32.xlu0 %v8392_v31, %s6357_s24  ;;  %2956 = vrot.lane.b32.xlu1 %v8406_v59, %s6357_s24 }
 0x774   :  { %v8444_v53 = vpop.permute.xlu0 %2760  ;;  %v8446_v0 = vpop.permute.xlu1 %3126 }
 0x775   :  { %10230 = vst [vmem:[#allocation112_spill] sm:$0xff] %v8444_v53 }
 0x776   :  { %2770 = vrot.lane.b32.xlu0 %v8335_v32, %s6358_s25  ;;  %2960 = vrot.lane.b32.xlu1 %v8428_v58, %s6357_s24 }
 0x778   :  { %v8452_v9 = vpop.permute.xlu0 %2572  ;;  %v8454_v57 = vpop.permute.xlu1 %3130 }
 0x779   :  { %10231 = vst [vmem:[#allocation113_spill] sm:$0xff] %v8452_v9  ;;  %10232 = vst [vmem:[#allocation114_spill] sm:$0xff] %v8454_v57 }
 0x77a   :  { %2774 = vrot.lane.b32.xlu0 %v8392_v31, %s6358_s25  ;;  %2772 = vrot.lane.b32.xlu1 %v8406_v59, %s6358_s25 }
 0x77c   :  { %v8460_v22 = vpop.permute.xlu0 %2576  ;;  %v8462_v53 = vpop.permute.xlu1 %2942 }
 0x77d   :  { %10233 = vst [vmem:[#allocation115_spill] sm:$0xff] %v8460_v22  ;;  %10234 = vst [vmem:[#allocation116_spill] sm:$0xff] %v8462_v53  ;;  %v6164_v53 = vunpack.i.l.bf16 %v7717_v2 }
 0x77e   :  { %2586 = vrot.lane.b32.xlu0 %v8335_v32, %s6359_s1  ;;  %2776 = vrot.lane.b32.xlu1 %v8428_v58, %s6358_s25 }
 0x780   :  { %v8468_v38 = vpop.permute.xlu0 %3724  ;;  %v8470_v9 = vpop.permute.xlu1 %2946 }
 0x781   :  { %10235 = vst [vmem:[#allocation117_spill] sm:$0xff] %v8468_v38  ;;  %10236 = vst [vmem:[#allocation118_spill] sm:$0xff] %v8470_v9 }
 0x782   :  { %2590 = vrot.lane.b32.xlu0 %v8392_v31, %s6359_s1  ;;  %2588 = vrot.lane.b32.xlu1 %v8406_v59, %s6359_s1 }
 0x784   :  { %v8476_v57 = vpop.permute.xlu0 %3728  ;;  %v8478_v22 = vpop.permute.xlu1 %2758 }
 0x785   :  { %10237 = vst [vmem:[#allocation119_spill] sm:$0xff] %v8476_v57  ;;  %10238 = vst [vmem:[#allocation120_spill] sm:$0xff] %v8478_v22 }
 0x786   :  { %3738 = vrot.lane.b32.xlu0 %v8406_v59, %s6353_s18  ;;  %2592 = vrot.lane.b32.xlu1 %v8428_v58, %s6359_s1 }
 0x788   :  { %v8484_v32 = vpop.permute.xlu0 %3542  ;;  %v8486_v38 = vpop.permute.xlu1 %2762 }
 0x789   :  { %10239 = vst [vmem:[#allocation121_spill] sm:$0xff] %v8484_v32  ;;  %10240 = vst [vmem:[#allocation122_spill] sm:$0xff] %v8486_v38 }
 0x78a   :  { %3328 = vrot.lane.b32.xlu0 %v7805_v54, %s6355_s20  ;;  %3740 = vrot.lane.b32.xlu1 %v8392_v31, %s6353_s18 }
 0x78c   :  { %v3135_v9 = vpop.permute.xlu0 %3134  ;;  %v8492_v57 = vpop.permute.xlu1 %2574 }
 0x78d   :  { %10241 = vst [vmem:[#allocation123_spill] sm:$0xff] %v8492_v57 }
 0x78e   :  { %3742 = vrot.lane.b32.xlu0 %v8428_v58, %s6353_s18  ;;  %3516 = vrot.lane.b32.xlu1 %v7837_v10, %s6354_s19 }
 0x790   :  { %v8498_v22 = vpop.permute.xlu0 %3528  ;;  %v8500_v32 = vpop.permute.xlu1 %2578 }
 0x791   :  { %10242 = vst [vmem:[#allocation124_spill] sm:$0xff] %v8498_v22  ;;  %10243 = vst [vmem:[#allocation125_spill] sm:$0xff] %v8500_v32 }
 0x792   :  { %3554 = vrot.lane.b32.xlu0 %v8406_v59, %s6354_s19  ;;  %3556 = vrot.lane.b32.xlu1 %v8392_v31, %s6354_s19 }
 0x794   :  { %v2951_v54 = vpop.permute.xlu0 %2950  ;;  %v8506_v38 = vpop.permute.xlu1 %3726 }
 0x795   :  { %10244 = vst [vmem:[#allocation126_spill] sm:$0xff] %v8506_v38  ;;  %v6159_v38 = vunpack.i.l.bf16 %v7713_v56 }
 0x796   :  { %3558 = vrot.lane.b32.xlu0 %v8428_v58, %s6354_s19  ;;  %3330 = vrot.lane.b32.xlu1 %v7817_v61, %s6355_s20 }
 0x798   :  { %v8512_v57 = vpop.permute.xlu0 %3512  ;;  %v8514_v22 = vpop.permute.xlu1 %3540 }
 0x799   :  { %10245 = vst [vmem:[#allocation127_spill] sm:$0xff] %v8512_v57  ;;  %10246 = vst [vmem:[#allocation128_spill] sm:$0xff] %v8514_v22  ;;  %v6160_v57 = vunpack.i.h.bf16 %v7713_v56 }
 0x79a   :  { %3370 = vrot.lane.b32.xlu0 %v8406_v59, %s6355_s20  ;;  %3372 = vrot.lane.b32.xlu1 %v8392_v31, %s6355_s20  ;;  %v3164_v31 = vsel %vm284_vm4, %v6159_v38, %v3135_v9  ;;  %v3159_v59 = vsel %vm284_vm4, %v8315_v47, %v8305_v28  ;;  %v6169_v38 = vunpack.i.l.bf16 %v7715_v12 }
 0x79b   :  { %v3158_v56 = vsel %vm284_vm4, %v6160_v57, %v8315_v47  ;;  %v3147_v47 = vsel %vm284_vm4, %v7926_v34, %v7928_v45 }
 0x79c   :  { %v8520_v32 = vpop.permute.xlu0 %2766  ;;  %v8523_v43 = vpop.permute.xlu1 %3136 }
 0x79d   :  { %v3165_v61 = vsel %vm284_vm4, %v3135_v9, %v8523_v43  ;;  %v3153_v9 = vsel %vm284_vm4, %v8145_v24, %v8102_v5 }
 0x79e   :  { %3360 = vrot.lane.b32.xlu0 %v8181_v13, %s6355_s20  ;;  %6217 = vrot.lane.b32.xlu1 %v10128_v37, %s6355_s20 }
 0x79f   :  { %4243 = vmatprep.subr.mxu0 %v3165_v61  ;;  %v6165_v61 = vunpack.i.h.bf16 %v7717_v2 }
 0x7a0   :  { %4244 = vmatpush1.msra.mxu0 %v3164_v31  ;;  %v8536_v22 = vpop.permute.xlu0 %2582  ;;  %v8539_v7 = vpop.permute.xlu1 %3526 }
 0x7a1   :  { %4245 = vmatprep.subr.mxu0 %v3159_v59  ;;  %v3152_v59 = vsel %vm284_vm4, %v6164_v53, %v8145_v24  ;;  %v3146_v2 = vsel %vm284_vm4, %v6165_v61, %v7926_v34  ;;  %v6170_v53 = vunpack.i.h.bf16 %v7715_v12  ;;  %v2975_v34 = vsel %vm237_vm5, %v8326_v16, %v8313_v63 }
 0x7a2   :  { %4246 = vmatpush1.msra.mxu0 %v3158_v56  ;;  %6222 = vrot.lane.b32.xlu0 %v10128_v37, %s6355_s20  ;;  %v2980_v56 = vsel %vm237_vm5, %v6169_v38, %v2951_v54  ;;  %v6174_v61 = vunpack.i.l.bf16 %v7721_v52 }
 0x7a3   :  { %3346 = vrot.lane.b32.xlu1 %v7961_v17, %s6355_s20  ;;  %4247 = vmatprep.subr.mxu0 %v3153_v9  ;;  %v2974_v12 = vsel %vm237_vm5, %v6170_v53, %v8326_v16  ;;  %v2963_v16 = vsel %vm237_vm5, %v7937_v39, %v7942_v3 }
 0x7a4   :  { %4248 = vmatpush1.msra.mxu0 %v3152_v59  ;;  %v8556_v31 = vpop.permute.xlu0 %3544  ;;  %v8559_v57 = vpop.permute.xlu1 %2952  ;;  %v2968_v38 = vsel %vm237_vm5, %v6174_v61, %v8153_v50 }
 0x7a5   :  { %4249 = vmatprep.subr.mxu0 %v3147_v47  ;;  %v2981_v24 = vsel %vm237_vm5, %v2951_v54, %v8559_v57  ;;  %v2969_v54 = vsel %vm237_vm5, %v8153_v50, %v8113_v35  ;;  %v6175_v47 = vunpack.i.h.bf16 %v7721_v52 }
 0x7a6   :  { %4250 = vmatpush1.msra.mxu0 %v3146_v2  ;;  %3374 = vrot.lane.b32.xlu0 %v8428_v58, %s6355_s20 }
 0x7a7   :  { %3332 = vrot.lane.b32.xlu1 %v7837_v10, %s6355_s20  ;;  %4251 = vmatprep.subr.mxu0 %v2981_v24  ;;  %v6179_v24 = vunpack.i.l.bf16 %v7719_v49  ;;  %v2962_v52 = vsel %vm237_vm5, %v6175_v47, %v7937_v39  ;;  %v2791_v39 = vsel %vm190_vm6, %v8337_v25, %v8323_v18  ;;  %v6185_v47 = vunpack.i.h.bf16 %v7725_v6 }
 0x7a8   :  { %4252 = vmatpush1.msra.mxu0 %v2980_v56  ;;  %v8574_v9 = vpop.permute.xlu0 %3734  ;;  %v8577_v59 = vpop.permute.xlu1 %3700  ;;  %v6180_v56 = vunpack.i.h.bf16 %v7719_v49 }
 0x7a9   :  { %4253 = vmatprep.subr.mxu0 %v2975_v34  ;;  %v2796_v34 = vsel %vm190_vm6, %v6179_v24, %v8520_v32  ;;  %v4225_v24 = vld [vmem:[%s9953_s11 + $0x8] sm:$0xff] }
 0x7aa   :  { %4254 = vmatpush1.msra.mxu0 %v2974_v12  ;;  %3912 = vrot.lane.b32.xlu0 %v8181_v13, %s6352_s0  ;;  %v6184_v12 = vunpack.i.l.bf16 %v7725_v6  ;;  %v2790_v49 = vsel %vm190_vm6, %v6180_v56, %v8337_v25  ;;  %v2779_v25 = vsel %vm190_vm6, %v7950_v44, %v7952_v23  ;;  %v6190_v56 = vunpack.i.h.bf16 %v7723_v15  ;;  %v10287_v13 = vld [vmem:[#allocation37_spill] sm:$0xff] }
 0x7ab   :  { %6227 = vrot.lane.b32.xlu1 %v10128_v37, %s6352_s0  ;;  %4255 = vmatprep.subr.mxu0 %v2969_v54 }
 0x7ac   :  { %4256 = vmatpush1.msra.mxu0 %v2968_v38  ;;  %v8594_v2 = vpop.permute.xlu0 %3358  ;;  %v8597_v53 = vpop.permute.xlu1 %2768  ;;  %v2784_v38 = vsel %vm190_vm6, %v6184_v12, %v8161_v4 }
 0x7ad   :  { %4257 = vmatprep.subr.mxu0 %v2963_v16  ;;  %v2797_v50 = vsel %vm190_vm6, %v8520_v32, %v8597_v53  ;;  %v2785_v32 = vsel %vm190_vm6, %v8161_v4, %v8124_v21 }
 0x7ae   :  { %4258 = vmatpush1.msra.mxu0 %v2962_v52  ;;  %3926 = vrot.lane.b32.xlu0 %v8428_v58, %s6352_s0  ;;  %v6189_v52 = vunpack.i.l.bf16 %v7723_v15  ;;  %v2606_v15 = vsel %vm143_vm7, %v6190_v56, %v8345_v40  ;;  %v3758_v56 = vsel %vm437_vm1, %v8361_v41, %v8353_v62 }
 0x7af   :  { %3898 = vrot.lane.b32.xlu1 %v7961_v17, %s6352_s0  ;;  %4259 = vmatprep.subr.mxu0 %v2797_v50  ;;  %v2778_v50 = vsel %vm190_vm6, %v6185_v47, %v7950_v44  ;;  %v2607_v44 = vsel %vm143_vm7, %v8345_v40, %v8332_v42  ;;  %v6195_v47 = vunpack.i.h.bf16 %v7729_v36 }
 0x7b0   :  { %4260 = vmatpush1.msra.mxu0 %v2796_v34  ;;  %v3733_v61 = vpop.permute.xlu0 %3732  ;;  %v8615_v54 = vpop.permute.xlu1 %3514  ;;  %v2612_v34 = vsel %vm143_vm7, %v6189_v52, %v8536_v22 }
 0x7b1   :  { %4261 = vmatprep.subr.mxu0 %v2791_v39  ;;  %v4224_v39 = vld [vmem:[%s9953_s11] sm:$0xff]  ;;  %v2594_v40 = vsel %vm143_vm7, %v6195_v47, %v7958_v11  ;;  %v10249_v47 = vld [vmem:[#allocation103_spill] sm:$0xff] }
 0x7b2   :  { %4262 = vmatpush1.msra.mxu0 %v2790_v49  ;;  %3900 = vrot.lane.b32.xlu0 %v10128_v37, %s6352_s0  ;;  %v6194_v49 = vunpack.i.l.bf16 %v7729_v36 }
 0x7b3   :  { %3884 = vrot.lane.b32.xlu1 %v7837_v10, %s6352_s0  ;;  %4263 = vmatprep.subr.mxu0 %v2785_v32  ;;  %v10279_v10 = vld [vmem:[#allocation102_spill] sm:$0xff] }
 0x7b4   :  { %4264 = vmatpush1.msra.mxu0 %v2784_v38  ;;  %v3551_v16 = vpop.permute.xlu0 %3550  ;;  %v8636_v6 = vpop.permute.xlu1 %2584  ;;  %v2600_v38 = vsel %vm143_vm7, %v6194_v49, %v8172_v20 }
 0x7b5   :  { %4265 = vmatprep.subr.mxu0 %v2779_v25  ;;  %v2613_v4 = vsel %vm143_vm7, %v8536_v22, %v8636_v6  ;;  %v2601_v22 = vsel %vm143_vm7, %v8172_v20, %v8135_v29  ;;  %v2595_v25 = vsel %vm143_vm7, %v7958_v11, %v7963_v8  ;;  %v3764_v20 = vsel %vm437_vm1, %v3733_v61, %v8574_v9 }
 0x7b6   :  { %4266 = vmatpush1.msra.mxu0 %v2778_v50  ;;  %3886 = vrot.lane.b32.xlu0 %v10128_v37, %s6352_s0  ;;  %v3759_v50 = vsel %vm437_vm1, %v8353_v62, %v8343_v30  ;;  %v3747_v61 = vsel %vm437_vm1, %v7971_v60, %v7969_v33  ;;  %v10247_v62 = vld [vmem:[#allocation32_spill] sm:$0xff] }
 0x7b7   :  { %4233 = vperm.xlu1 %6120, %v4225_v24   ;;  %4267 = vmatprep.subr.mxu0 %v2613_v4  ;;  %v3746_v41 = vsel %vm437_vm1, %v10247_v62, %v7971_v60  ;;  %v3574_v60 = vsel %vm390_vm2, %v10249_v47, %v8369_v1  ;;  %v3390_v47 = vsel %vm343_vm3, %v8408_v55, %v8397_v27 }
 0x7b8   :  { %4268 = vmatpush1.msra.mxu0 %v2612_v34  ;;  %v8654_v12 = vpop.permute.xlu0 %6212  ;;  %v8657_v32 = vpop.permute.xlu1 %6207  ;;  %v3753_v34 = vsel %vm437_vm1, %v8143_v26, %v8183_v51 }
 0x7b9   :  { %4269 = vmatprep.subr.mxu0 %v2607_v44 }
 0x7ba   :  { %4270 = vmatpush1.msra.mxu0 %v2606_v15  ;;  %4228 = vperm.xlu0 %6119, %v4224_v39  }
 0x7bb   :  { %4271 = vmatprep.subr.mxu0 %v2601_v22  ;;  %6232 = vrot.lane.b32.xlu1 %v10128_v37, %s6356_s21 }
 0x7bc   :  { %4272 = vmatpush1.msra.mxu0 %v2600_v38  ;;  %v3549_v24 = vpop.permute.xlu0 %3548  ;;  %v8670_v52 = vpop.permute.xlu1 %3736 }
 0x7bd   :  { %4273 = vmatprep.subr.mxu0 %v2595_v25  ;;  %v3765_v36 = vsel %vm437_vm1, %v8574_v9, %v8670_v52  ;;  %v3752_v9 = vsel %vm437_vm1, %v8151_v19, %v8143_v26  ;;  %v3580_v26 = vsel %vm390_vm2, %v3549_v24, %v3551_v16  ;;  %v10248_v19 = vld [vmem:[#allocation99_spill] sm:$0xff] }
 0x7be   :  { %4274 = vmatpush1.msra.mxu0 %v2594_v40  ;;  %v3575_v15 = vsel %vm390_vm2, %v8369_v1, %v10248_v19  ;;  %v10250_v25 = vld [vmem:[#allocation71_spill] sm:$0xff]  ;;  %v10251_v40 = vld [vmem:[#allocation66_spill] sm:$0xff]  ;;  %v10255_v1 = vld [vmem:[#allocation36_spill] sm:$0xff]  ;;  %6237 = vrot.lane.b32.xlu0 %v10128_v37, %s6357_s24 }
 0x7bf   :  { %4275 = vmatprep.subr.mxu0 %v3765_v36  ;;  %v3569_v36 = vsel %vm390_vm2, %v10251_v40, %v10250_v25  ;;  %6242 = vrot.lane.b32.xlu1 %v10128_v37, %s6358_s25 }
 0x7c0   :  { %4276 = vmatpush2.msra.mxu0 %v3764_v20  ;;  %v3367_v4 = vpop.permute.xlu0 %3366  ;;  %v8685_v11 = vpop.permute.xlu1 %3356  ;;  %v10253_v20 = vld [vmem:[#allocation31_spill] sm:$0xff] }
 0x7c1   :  { %4277 = vmatprep.subr.mxu0 %v3759_v50  ;;  %v10254_v50 = vld [vmem:[#allocation34_spill] sm:$0xff] }
 0x7c2   :  { %4278 = vmatpush2.msra.mxu0 %v3758_v56  ;;  %v3563_v56 = vsel %vm390_vm2, %v10254_v50, %v10253_v20  ;;  %6247 = vrot.lane.b32.xlu0 %v10128_v37, %s6359_s1 }
 0x7c3   :  { %4279 = vmatprep.subr.mxu0 %v3753_v34 }
 0x7c4   :  { %4280 = vmatpush2.msra.mxu0 %v3752_v9  ;;  %v8696_v39 = vpop.permute.xlu0 %3344  ;;  %v8701_v44 = vpop.permute.xlu1 %3552  ;;  %v3562_v9 = vsel %vm390_vm2, %v10255_v1, %v10254_v50  ;;  %v10261_v50 = vld [vmem:[#allocation38_spill] sm:$0xff] }
 0x7c5   :  { %4281 = vmatprep.subr.mxu0 %v3747_v61  ;;  %v3581_v49 = vsel %vm390_vm2, %v3551_v16, %v8701_v44  ;;  %v10252_v16 = vld [vmem:[#allocation67_spill] sm:$0xff] }
 0x7c6   :  { %4282 = vmatpush2.msra.mxu0 %v3746_v41  ;;  %v3568_v24 = vsel %vm390_vm2, %v10252_v16, %v10251_v40  ;;  %v10257_v40 = vld [vmem:[#allocation73_spill] sm:$0xff] }
 0x7c7   :  { %4283 = vmatprep.subr.mxu0 %v3581_v49  ;;  %v10256_v49 = vld [vmem:[#allocation100_spill] sm:$0xff] }
 0x7c8   :  { %4284 = vmatpush2.msra.mxu0 %v3580_v26  ;;  %v3365_v22 = vpop.permute.xlu0 %3364  ;;  %v8712_v38 = vpop.permute.xlu1 %3530  ;;  %v3391_v26 = vsel %vm343_vm3, %v8397_v27, %v10256_v49  ;;  %v10262_v27 = vld [vmem:[#allocation40_spill] sm:$0xff] }
 0x7c9   :  { %4285 = vmatprep.subr.mxu0 %v3575_v15  ;;  %v3396_v41 = vsel %vm343_vm3, %v3365_v22, %v3367_v4  ;;  %v3378_v55 = vsel %vm343_vm3, %v10262_v27, %v10261_v50  ;;  %v10269_v27 = vld [vmem:[#allocation74_spill] sm:$0xff] }
 0x7ca   :  { %4286 = vmatpush2.msra.mxu0 %v3574_v60 }
 0x7cb   :  { %4287 = vmatprep.subr.mxu0 %v3569_v36  ;;  %v10258_v36 = vld [vmem:[#allocation68_spill] sm:$0xff] }
 0x7cc   :  { %4288 = vmatpush2.msra.mxu0 %v3568_v24  ;;  %v3919_v34 = vpop.permute.xlu0 %3918  ;;  %v8726_v61 = vpop.permute.xlu1 %3368  ;;  %v3385_v16 = vsel %vm343_vm3, %v10258_v36, %v10257_v40  ;;  %v10260_v24 = vld [vmem:[#allocation33_spill] sm:$0xff] }
 0x7cd   :  { %4289 = vmatprep.subr.mxu0 %v3563_v56  ;;  %v3397_v62 = vsel %vm343_vm3, %v3367_v4, %v8726_v61  ;;  %v10259_v4 = vld [vmem:[#allocation70_spill] sm:$0xff]  ;;  %v3379_v56 = vsel %vm343_vm3, %v10261_v50, %v10260_v24  ;;  %v10265_v50 = vld [vmem:[#allocation43_spill] sm:$0xff] }
 0x7ce   :  { %4290 = vmatpush2.msra.mxu0 %v3562_v9  ;;  %v3384_v22 = vsel %vm343_vm3, %v10259_v4, %v10258_v36  ;;  %v3942_v4 = vsel %vm484_vm0, %v8430_v48, %v8419_v46  ;;  %v10273_v48 = vld [vmem:[#allocation42_spill] sm:$0xff] }
 0x7cf   :  { %4291 = vmatprep.subr.mxu0 %v3397_v62 }
 0x7d0   :  { %4292 = vmatpush2.msra.mxu0 %v3396_v41  ;;  %v3917_v15 = vpop.permute.xlu0 %3916  ;;  %v8737_v60 = vpop.permute.xlu1 %3342 }
 0x7d1   :  { %4293 = vmatprep.subr.mxu0 %v3391_v26  ;;  %v3948_v41 = vsel %vm484_vm0, %v3917_v15, %v3919_v34  ;;  %v10263_v26 = vld [vmem:[#allocation87_spill] sm:$0xff] }
 0x7d2   :  { %4294 = vmatpush2.msra.mxu0 %v3390_v47  ;;  %v10264_v47 = vld [vmem:[#allocation101_spill] sm:$0xff]  ;;  %v10267_v15 = vld [vmem:[#allocation75_spill] sm:$0xff] }
 0x7d3   :  { %4295 = vmatprep.subr.mxu0 %v3385_v16  ;;  %v3943_v36 = vsel %vm484_vm0, %v8419_v46, %v10264_v47  ;;  %v10272_v46 = vld [vmem:[#allocation35_spill] sm:$0xff] }
 0x7d4   :  { %4296 = vmatpush2.msra.mxu0 %v3384_v22  ;;  %v8748_v1 = vpop.permute.xlu0 %3924  ;;  %v3921_v9 = vpop.permute.xlu1 %3920 }
 0x7d5   :  { %4297 = vmatprep.subr.mxu0 %v3379_v56  ;;  %v3949_v62 = vsel %vm484_vm0, %v3919_v34, %v3921_v9  ;;  %v10266_v34 = vld [vmem:[#allocation47_spill] sm:$0xff]  ;;  %v10268_v56 = vld [vmem:[#allocation72_spill] sm:$0xff] }
 0x7d6   :  { %4298 = vmatpush2.msra.mxu0 %v3378_v55  ;;  %4344 = vmatprep.subr.mxu1 %v3949_v62  ;;  %v3936_v55 = vsel %vm484_vm0, %v10269_v27, %v10268_v56  ;;  %v10270_v62 = vld [vmem:[#allocation27_spill] sm:$0xff] }
 0x7d7   :  { %4299 = vmatprep.subr.mxu0 %v10263_v26  ;;  %4345 = vmatpush1.msra.mxu1 %v3948_v41  ;;  %v10271_v41 = vld [vmem:[#allocation24_spill] sm:$0xff]  ;;  %v3931_v26 = vsel %vm484_vm0, %v10273_v48, %v10272_v46  ;;  %v8792_v27 = vld [vmem:[%s9952_s10 + $0x10] sm:$0xff] }
 0x7d8   :  { %4300 = vmatpush2.msra.mxu0 %v8225_v14  ;;  %v3139_v16 = vpop.permute.xlu0 %3138  ;;  %v3923_v22 = vpop.permute.xlu1 %3922  ;;  %4346 = vmatprep.subr.mxu1 %v3943_v36  ;;  %v3937_v14 = vsel %vm484_vm0, %v10268_v56, %v10267_v15 }
 0x7d9   :  { %4301 = vmatprep.subr.mxu0 %v10265_v50  ;;  %4347 = vmatpush1.msra.mxu1 %v3942_v4  ;;  %v8781_v4 = vld [vmem:[%s9952_s10] sm:$0xff] }
 0x7da   :  { %4302 = vmatpush2.msra.mxu0 %v10266_v34  ;;  %4348 = vmatprep.subr.mxu1 %v3937_v14  ;;  %v10274_v50 = vld [vmem:[#allocation45_spill] sm:$0xff]  ;;  %v10275_v14 = vld [vmem:[#allocation19_spill] sm:$0xff] }
 0x7db   :  { %4303 = vmatprep.subr.mxu0 %v10270_v62  ;;  %4349 = vmatpush1.msra.mxu1 %v3936_v55  ;;  %v3930_v34 = vsel %vm484_vm0, %v10274_v50, %v10273_v48  ;;  %v10276_v55 = vld [vmem:[#allocation21_spill] sm:$0xff]  ;;  %v3166_v48 = vsel %vm284_vm4, %v8523_v43, %v3139_v16 }
 0x7dc   :  { %4304 = vmatpush2.msra.mxu0 %v10271_v41  ;;  %v8776_v36 = vpop.permute.xlu0 %3142  ;;  %v8786_v56 = vpop.permute.xlu1 %3140  ;;  %4350 = vmatprep.subr.mxu1 %v3931_v26  ;;  %v3951_v41 = vsel %vm484_vm0, %v3923_v22, %v8748_v1  ;;  %v3950_v26 = vsel %vm484_vm0, %v3921_v9, %v3923_v22  ;;  %v8822_v9 = vld [vmem:[%s9952_s10 + $0x18] sm:$0xff] }
 0x7dd   :  { %4305 = vmatprep.subr.mxu0 %v10275_v14  ;;  %4351 = vmatpush1.msra.mxu1 %v3930_v34  ;;  %v3167_v62 = vsel %vm284_vm4, %v3139_v16, %v8786_v56  ;;  %v8808_v34 = vld [vmem:[%s9952_s10 + $0x20] sm:$0xff]  ;;  %v3944_v16 = vsel %vm484_vm0, %v10264_v47, %v10279_v10  ;;  %v10280_v22 = vld [vmem:[#allocation79_spill] sm:$0xff] }
 0x7de   :  { %4306 = vmatpush2.msra.mxu0 %v10276_v55  ;;  %4397 = vmatprep.subr.mxu1 %v3167_v62  ;;  %v10277_v55 = vld [vmem:[#allocation105_spill] sm:$0xff] }
 0x7df   :  { %4308 = vmatmul.mubr.f32.vlgmr.msra.gmra.mxu0 %v8781_v4  ;;  %4498 = vmatprep.subr.mxu0 %v3951_v41  ;;  %v3161_v62 = vsel %vm284_vm4, %v10277_v55, %v8446_v0  ;;  %v10278_v41 = vld [vmem:[#allocation111_spill] sm:$0xff]  ;;  %v3160_v43 = vsel %vm284_vm4, %v8305_v28, %v10277_v55  ;;  %v10283_v28 = vld [vmem:[#allocation76_spill] sm:$0xff] }
 0x7e0   :  { %6098 = vmatmul.mubr.msk.f32.vlgmr.msra.gmra.mxu1 %vm4236_vm10, %v8792_v27  ;;  %v2955_v50 = vpop.permute.xlu0 %2954  ;;  %4499 = vmatpush1.msra.mxu0 %v3950_v26  ;;  %v3145_v14 = vpop.permute.xlu1 %3144  ;;  %v3945_v17 = vsel %vm484_vm0, %v10279_v10, %v10278_v41  ;;  %v10282_v26 = vld [vmem:[#allocation77_spill] sm:$0xff]  ;;  %v10286_v41 = vld [vmem:[#allocation48_spill] sm:$0xff] }
 0x7e1   :  { %4398 = vmatpush1.msra.mxu1 %v3166_v48  ;;  %4500 = vmatprep.subr.mxu0 %v3945_v17  ;;  %v10281_v48 = vld [vmem:[#allocation78_spill] sm:$0xff]  ;;  %v3939_v55 = vsel %vm484_vm0, %v10283_v28, %v10282_v26  ;;  %v10285_v26 = vld [vmem:[#allocation39_spill] sm:$0xff] }
 0x7e2   :  { %4399 = vmatprep.subr.mxu1 %v3161_v62  ;;  %4313 = vmatprep.mubr.f32.mxu0 %v8808_v34  ;;  %v3155_v17 = vsel %vm284_vm4, %v10281_v48, %v10280_v22  ;;  %v8837_v62 = vld [vmem:[%s9952_s10 + $0x28] sm:$0xff]  ;;  %v3154_v10 = vsel %vm284_vm4, %v8102_v5, %v10281_v48  ;;  %v3933_v5 = vsel %vm484_vm0, %v10287_v13, %v10286_v41 }
 0x7e3   :  { %4400 = vmatpush1.msra.mxu1 %v3160_v43  ;;  %4501 = vmatpush1.msra.mxu0 %v3944_v16  ;;  %v3938_v16 = vsel %vm484_vm0, %v10267_v15, %v10283_v28  ;;  %v3148_v15 = vsel %vm284_vm4, %v7928_v45, %v10285_v26  ;;  %v3932_v28 = vsel %vm484_vm0, %v10272_v46, %v10287_v13  ;;  %v10288_v45 = vld [vmem:[#allocation116_spill] sm:$0xff] }
 0x7e4   :  { %4401 = vmatprep.subr.mxu1 %v3155_v17  ;;  %v8839_v43 = vpop.permute.xlu0 %2958  ;;  %4314 = vmatmul.mubr.f32.gmra.mxu0 %v8822_v9  ;;  %v2957_v47 = vpop.permute.xlu1 %2956  ;;  %v10284_v17 = vld [vmem:[#allocation50_spill] sm:$0xff]  ;;  %v3169_v41 = vsel %vm284_vm4, %v8776_v36, %v3145_v14  ;;  %v3168_v13 = vsel %vm284_vm4, %v8786_v56, %v8776_v36  ;;  %v10294_v56 = vld [vmem:[#allocation81_spill] sm:$0xff] }
 0x7e5   :  { %4502 = vmatprep.subr.mxu0 %v3939_v55  ;;  %4390 = vmatprep.mubr.f32.mxu1 %v10128_v37  ;;  %v3149_v55 = vsel %vm284_vm4, %v10285_v26, %v10284_v17  ;;  %v2983_v48 = vsel %vm237_vm5, %v2955_v50, %v2957_v47  ;;  %v10289_v26 = vld [vmem:[#allocation108_spill] sm:$0xff] }
 0x7e6   :  { %4402 = vmatpush1.msra.mxu1 %v3154_v10  ;;  %4503 = vmatpush1.msra.mxu0 %v3938_v16  ;;  %v2976_v46 = vsel %vm237_vm5, %v8313_v63, %v10289_v26 }
 0x7e7   :  { %6099 = vmatmul.mubr.msk.f32.gmra.mxu1 %vm4236_vm10, %v8837_v62  ;;  %4403 = vmatprep.subr.mxu1 %v3149_v55  ;;  %v2982_v55 = vsel %vm237_vm5, %v8559_v57, %v2955_v50  ;;  %v10290_v57 = vld [vmem:[#allocation114_spill] sm:$0xff] }
 0x7e8   :  { %4504 = vmatprep.subr.mxu0 %v3933_v5  ;;  %v2771_v10 = vpop.permute.xlu0 %2770  ;;  %4404 = vmatpush1.msra.mxu1 %v3148_v15  ;;  %v2961_v16 = vpop.permute.xlu1 %2960  ;;  %v2977_v5 = vsel %vm237_vm5, %v10289_v26, %v10288_v45  ;;  %v10291_v50 = vld [vmem:[#allocation106_spill] sm:$0xff]  ;;  %v10295_v26 = vld [vmem:[#allocation80_spill] sm:$0xff] }
 0x7e9   :  { %4505 = vmatpush1.msra.mxu0 %v3932_v28  ;;  %4405 = vmatprep.subr.mxu1 %v2983_v48  ;;  %v10292_v48 = vld [vmem:[#allocation83_spill] sm:$0xff]  ;;  %v10293_v15 = vld [vmem:[#allocation82_spill] sm:$0xff]  ;;  %v3162_v36 = vsel %vm284_vm4, %v8446_v0, %v10291_v50  ;;  %v3156_v0 = vsel %vm284_vm4, %v10280_v22, %v10295_v26  ;;  %v2798_v22 = vsel %vm190_vm6, %v8597_v53, %v2771_v10 }
 0x7ea   :  { %4538 = vmatprep.mubr.f32.mxu0 %v10128_v37  ;;  %4551 = vmatprep.subr.mxu0 %v3169_v41  ;;  %v3163_v41 = vsel %vm284_vm4, %v10291_v50, %v10290_v57  ;;  %v2971_v28 = vsel %vm237_vm5, %v10293_v15, %v10292_v48  ;;  %v2970_v63 = vsel %vm237_vm5, %v8113_v35, %v10293_v15  ;;  %v10298_v15 = vld [vmem:[#allocation52_spill] sm:$0xff]  ;;  %v10302_v53 = vld [vmem:[#allocation118_spill] sm:$0xff] }
 0x7eb   :  { %4406 = vmatpush1.msra.mxu1 %v2982_v55  ;;  %6100 = vmatmul.mubr.msk.f32.vlgmr.msra.gmra.mxu0 %vm4236_vm10, %v8792_v27 }
 0x7ec   :  { %4407 = vmatprep.subr.mxu1 %v2977_v5  ;;  %v8880_v14 = vpop.permute.xlu0 %2774  ;;  %4552 = vmatpush1.msra.mxu0 %v3168_v13  ;;  %v8888_v55 = vpop.permute.xlu1 %2772  ;;  %v3157_v5 = vsel %vm284_vm4, %v10295_v26, %v10294_v56  ;;  %v10296_v13 = vld [vmem:[#allocation55_spill] sm:$0xff]  ;;  %v10300_v26 = vld [vmem:[#allocation120_spill] sm:$0xff] }
 0x7ed   :  { %4408 = vmatpush1.msra.mxu1 %v2976_v46  ;;  %4553 = vmatprep.subr.mxu0 %v3163_v41  ;;  %v10297_v46 = vld [vmem:[#allocation44_spill] sm:$0xff]  ;;  %v2799_v41 = vsel %vm190_vm6, %v2771_v10, %v8888_v55  ;;  %v10303_v10 = vld [vmem:[#allocation109_spill] sm:$0xff] }
 0x7ee   :  { %4409 = vmatprep.subr.mxu1 %v2971_v28  ;;  %4554 = vmatpush1.msra.mxu0 %v3162_v36  ;;  %v2965_v57 = vsel %vm237_vm5, %v10297_v46, %v10296_v13  ;;  %v2964_v35 = vsel %vm237_vm5, %v7942_v3, %v10297_v46  ;;  %v10299_v28 = vld [vmem:[#allocation41_spill] sm:$0xff]  ;;  %v2985_v3 = vsel %vm237_vm5, %v8839_v43, %v2961_v16 }
 0x7ef   :  { %4410 = vmatpush1.msra.mxu1 %v2970_v63  ;;  %4555 = vmatprep.subr.mxu0 %v3157_v5  ;;  %v3151_v36 = vsel %vm284_vm4, %v10299_v28, %v10298_v15  ;;  %v3150_v56 = vsel %vm284_vm4, %v10284_v17, %v10299_v28  ;;  %v10301_v5 = vld [vmem:[#allocation110_spill] sm:$0xff]  ;;  %v2979_v16 = vsel %vm237_vm5, %v10303_v10, %v10302_v53 }
 0x7f0   :  { %4411 = vmatprep.subr.mxu1 %v2965_v57  ;;  %v2587_v50 = vpop.permute.xlu0 %2586  ;;  %4556 = vmatpush1.msra.mxu0 %v3156_v0  ;;  %v2777_v63 = vpop.permute.xlu1 %2776  ;;  %v2793_v46 = vsel %vm190_vm6, %v10301_v5, %v10300_v26  ;;  %v2984_v57 = vsel %vm237_vm5, %v2957_v47, %v8839_v43  ;;  %v2792_v17 = vsel %vm190_vm6, %v8323_v18, %v10301_v5  ;;  %v10304_v0 = vld [vmem:[#allocation88_spill] sm:$0xff]  ;;  %v10306_v47 = vld [vmem:[#allocation85_spill] sm:$0xff]  ;;  %v10311_v53 = vld [vmem:[#allocation46_spill] sm:$0xff] }
 0x7f1   :  { %4412 = vmatpush1.msra.mxu1 %v2964_v35  ;;  %4557 = vmatprep.subr.mxu0 %v3151_v36  ;;  %v10305_v35 = vld [vmem:[#allocation86_spill] sm:$0xff]  ;;  %v2978_v43 = vsel %vm237_vm5, %v10288_v45, %v10303_v10  ;;  %v10307_v36 = vld [vmem:[#allocation84_spill] sm:$0xff] }
 0x7f2   :  { %4413 = vmatprep.subr.mxu1 %v2799_v41  ;;  %4558 = vmatpush1.msra.mxu0 %v3150_v56  ;;  %v2787_v15 = vsel %vm190_vm6, %v10305_v35, %v10304_v0  ;;  %v2786_v18 = vsel %vm190_vm6, %v8124_v21, %v10305_v35  ;;  %v2973_v56 = vsel %vm237_vm5, %v10307_v36, %v10306_v47 }
 0x7f3   :  { %4414 = vmatpush1.msra.mxu1 %v2798_v22  ;;  %4559 = vmatprep.subr.mxu0 %v2985_v3  ;;  %v10308_v22 = vld [vmem:[#allocation59_spill] sm:$0xff]  ;;  %v10309_v3 = vld [vmem:[#allocation49_spill] sm:$0xff]  ;;  %v2972_v45 = vsel %vm237_vm5, %v10292_v48, %v10307_v36  ;;  %v2966_v35 = vsel %vm237_vm5, %v10296_v13, %v10311_v53  ;;  %v2614_v48 = vsel %vm143_vm7, %v8636_v6, %v2587_v50 }
 0x7f4   :  { %4415 = vmatprep.subr.mxu1 %v2793_v46  ;;  %v8928_v41 = vpop.permute.xlu0 %2590  ;;  %4560 = vmatpush1.msra.mxu0 %v2984_v57  ;;  %v8936_v28 = vpop.permute.xlu1 %2588  ;;  %v2781_v5 = vsel %vm190_vm6, %v10309_v3, %v10308_v22  ;;  %v2780_v21 = vsel %vm190_vm6, %v7952_v23, %v10309_v3  ;;  %v2801_v23 = vsel %vm190_vm6, %v8880_v14, %v2777_v63  ;;  %v10315_v63 = vld [vmem:[#allocation112_spill] sm:$0xff]  ;;  %v10317_v3 = vld [vmem:[#allocation91_spill] sm:$0xff] }
 0x7f5   :  { %4416 = vmatpush1.msra.mxu1 %v2792_v17  ;;  %4561 = vmatprep.subr.mxu0 %v2979_v16  ;;  %v2615_v46 = vsel %vm143_vm7, %v2587_v50, %v8936_v28  ;;  %v10310_v17 = vld [vmem:[#allocation57_spill] sm:$0xff]  ;;  %v2800_v47 = vsel %vm190_vm6, %v8888_v55, %v8880_v14  ;;  %v10314_v50 = vld [vmem:[#allocation122_spill] sm:$0xff]  ;;  %v2794_v14 = vsel %vm190_vm6, %v10300_v26, %v10315_v63 }
 0x7f6   :  { %4417 = vmatprep.subr.mxu1 %v2787_v15  ;;  %4562 = vmatpush1.msra.mxu0 %v2978_v43  ;;  %v2967_v10 = vsel %vm237_vm5, %v10311_v53, %v10310_v17  ;;  %v10312_v15 = vld [vmem:[#allocation123_spill] sm:$0xff]  ;;  %v10313_v43 = vld [vmem:[#allocation113_spill] sm:$0xff]  ;;  %v2795_v36 = vsel %vm190_vm6, %v10315_v63, %v10314_v50  ;;  %v10318_v55 = vld [vmem:[#allocation90_spill] sm:$0xff] }
 0x7f7   :  { %4418 = vmatpush1.msra.mxu1 %v2786_v18  ;;  %4563 = vmatprep.subr.mxu0 %v2973_v56  ;;  %v2609_v18 = vsel %vm143_vm7, %v10313_v43, %v10312_v15  ;;  %v2608_v13 = vsel %vm143_vm7, %v8332_v42, %v10313_v43  ;;  %v10316_v56 = vld [vmem:[#allocation92_spill] sm:$0xff]  ;;  %v2602_v42 = vsel %vm143_vm7, %v8135_v29, %v10317_v3  ;;  %v10320_v17 = vld [vmem:[#allocation62_spill] sm:$0xff]  ;;  %v10323_v43 = vld [vmem:[#allocation51_spill] sm:$0xff] }
 0x7f8   :  { %4419 = vmatprep.subr.mxu1 %v2781_v5  ;;  %v3739_v57 = vpop.permute.xlu0 %3738  ;;  %4564 = vmatpush1.msra.mxu0 %v2972_v45  ;;  %v2593_v16 = vpop.permute.xlu1 %2592  ;;  %v2603_v5 = vsel %vm143_vm7, %v10317_v3, %v10316_v56  ;;  %v10319_v45 = vld [vmem:[#allocation89_spill] sm:$0xff]  ;;  %v10321_v53 = vld [vmem:[#allocation54_spill] sm:$0xff]  ;;  %v2616_v3 = vsel %vm143_vm7, %v8936_v28, %v8928_v41 }
 0x7f9   :  { %4420 = vmatpush1.msra.mxu1 %v2780_v21  ;;  %4565 = vmatprep.subr.mxu0 %v2967_v10  ;;  %v2789_v21 = vsel %vm190_vm6, %v10319_v45, %v10318_v55  ;;  %v2597_v10 = vsel %vm143_vm7, %v10321_v53, %v10320_v17  ;;  %v2788_v26 = vsel %vm190_vm6, %v10304_v0, %v10319_v45  ;;  %v10324_v50 = vld [vmem:[#allocation126_spill] sm:$0xff]  ;;  %v10325_v63 = vld [vmem:[#allocation117_spill] sm:$0xff] }
 0x7fa   :  { %4421 = vmatprep.subr.mxu1 %v2615_v46  ;;  %4566 = vmatpush1.msra.mxu0 %v2966_v35  ;;  %v2596_v29 = vsel %vm143_vm7, %v7963_v8, %v10321_v53  ;;  %v3766_v0 = vsel %vm437_vm1, %v8670_v52, %v3739_v57  ;;  %v2617_v8 = vsel %vm143_vm7, %v8928_v41, %v2593_v16  ;;  %v10330_v28 = vld [vmem:[#allocation94_spill] sm:$0xff] }
 0x7fb   :  { %4422 = vmatpush1.msra.mxu1 %v2614_v48  ;;  %4567 = vmatprep.subr.mxu0 %v2801_v23  ;;  %v10322_v23 = vld [vmem:[#allocation60_spill] sm:$0xff] }
 0x7fc   :  { %4423 = vmatprep.subr.mxu1 %v2609_v18  ;;  %v8977_v6 = vpop.permute.xlu0 %3328  ;;  %4568 = vmatpush1.msra.mxu0 %v2800_v47  ;;  %v8985_v46 = vpop.permute.xlu1 %3740  ;;  %v2783_v18 = vsel %vm190_vm6, %v10323_v43, %v10322_v23 }
 0x7fd   :  { %4424 = vmatpush1.msra.mxu1 %v2608_v13  ;;  %4569 = vmatprep.subr.mxu0 %v2795_v36  ;;  %v3767_v35 = vsel %vm437_vm1, %v3739_v57, %v8985_v46  ;;  %v2782_v13 = vsel %vm190_vm6, %v10308_v22, %v10323_v43  ;;  %v3761_v36 = vsel %vm437_vm1, %v10325_v63, %v10324_v50  ;;  %v10326_v57 = vld [vmem:[#allocation125_spill] sm:$0xff] }
 0x7fe   :  { %4425 = vmatprep.subr.mxu1 %v2603_v5  ;;  %4570 = vmatpush1.msra.mxu0 %v2794_v14  ;;  %v3760_v22 = vsel %vm437_vm1, %v8343_v30, %v10325_v63  ;;  %v10327_v5 = vld [vmem:[#allocation115_spill] sm:$0xff]  ;;  %v10328_v14 = vld [vmem:[#allocation96_spill] sm:$0xff] }
 0x7ff   :  { %4426 = vmatpush1.msra.mxu1 %v2602_v42  ;;  %4571 = vmatprep.subr.mxu0 %v2789_v21  ;;  %v2611_v16 = vsel %vm143_vm7, %v10327_v5, %v10326_v57  ;;  %v10329_v42 = vld [vmem:[#allocation95_spill] sm:$0xff]  ;;  %v2610_v41 = vsel %vm143_vm7, %v10312_v15, %v10327_v5  ;;  %v10331_v21 = vld [vmem:[#allocation93_spill] sm:$0xff] }
 0x800   :  { %4427 = vmatprep.subr.mxu1 %v2597_v10  ;;  %v3743_v48 = vpop.permute.xlu0 %3742  ;;  %4572 = vmatpush1.msra.mxu0 %v2788_v26  ;;  %v9010_v47 = vpop.permute.xlu1 %3516  ;;  %v3755_v55 = vsel %vm437_vm1, %v10329_v42, %v10328_v14  ;;  %v3754_v30 = vsel %vm437_vm1, %v8183_v51, %v10329_v42  ;;  %v2605_v53 = vsel %vm143_vm7, %v10331_v21, %v10330_v28  ;;  %v10332_v10 = vld [vmem:[#allocation65_spill] sm:$0xff] }
 0x801   :  { %4428 = vmatpush1.msra.mxu1 %v2596_v29  ;;  %4573 = vmatprep.subr.mxu0 %v2783_v18  ;;  %v2604_v15 = vsel %vm143_vm7, %v10316_v56, %v10331_v21  ;;  %v10334_v18 = vld [vmem:[#allocation18_spill] sm:$0xff]  ;;  %v3768_v57 = vsel %vm437_vm1, %v8985_v46, %v3743_v48 }
 0x802   :  { %4429 = vmatprep.subr.mxu1 %v3767_v35  ;;  %4574 = vmatpush1.msra.mxu0 %v2782_v13  ;;  %v10333_v35 = vld [vmem:[#allocation58_spill] sm:$0xff]  ;;  %v6199_v13 = vunpack.i.l.bf16 %v10334_v18 }
 0x803   :  { %4430 = vmatpush2.msra.mxu1 %v3766_v0  ;;  %4575 = vmatprep.subr.mxu0 %v2617_v8  ;;  %v3749_v26 = vsel %vm437_vm1, %v10333_v35, %v10332_v10  ;;  %v3748_v51 = vsel %vm437_vm1, %v7969_v33, %v10333_v35  ;;  %v10335_v0 = vld [vmem:[#allocation63_spill] sm:$0xff]  ;;  %v10336_v8 = vld [vmem:[#allocation56_spill] sm:$0xff]  ;;  %v6200_v33 = vunpack.i.h.bf16 %v10334_v18  ;;  %v6209_v18 = vunpack.i.l.bf16 %v8657_v32 }
 0x804   :  { %4431 = vmatprep.subr.mxu1 %v3761_v36  ;;  %v3555_v52 = vpop.permute.xlu0 %3554  ;;  %4576 = vmatpush1.msra.mxu0 %v2616_v3  ;;  %v9034_v45 = vpop.permute.xlu1 %3556  ;;  %v2599_v63 = vsel %vm143_vm7, %v10336_v8, %v10335_v0  ;;  %v2598_v56 = vsel %vm143_vm7, %v10320_v17, %v10336_v8  ;;  %v10337_v3 = vld [vmem:[#allocation121_spill] sm:$0xff]  ;;  %v3392_v8 = vsel %vm343_vm3, %v10256_v49, %v8685_v11  ;;  %v6215_v49 = vunpack.i.h.bf16 %v8654_v12 }
 0x805   :  { %4432 = vmatpush2.msra.mxu1 %v3760_v22  ;;  %4577 = vmatprep.subr.mxu0 %v2611_v16  ;;  %v3583_v29 = vsel %vm390_vm2, %v3555_v52, %v9034_v45  ;;  %v3582_v23 = vsel %vm390_vm2, %v8701_v44, %v3555_v52  ;;  %v3769_v44 = vsel %vm437_vm1, %v3743_v48, %v6199_v13  ;;  %v10338_v22 = vld [vmem:[#allocation128_spill] sm:$0xff]  ;;  %v10339_v16 = vld [vmem:[#allocation17_spill] sm:$0xff] }
 0x806   :  { %4433 = vmatprep.subr.mxu1 %v3755_v55  ;;  %4578 = vmatpush1.msra.mxu0 %v2610_v41  ;;  %v3577_v52 = vsel %vm390_vm2, %v10338_v22, %v10337_v3  ;;  %v3576_v17 = vsel %vm390_vm2, %v10248_v19, %v10338_v22  ;;  %v6204_v42 = vunpack.i.l.bf16 %v10339_v16  ;;  %v10340_v55 = vld [vmem:[#allocation119_spill] sm:$0xff]  ;;  %v3570_v19 = vsel %vm390_vm2, %v10250_v25, %v8539_v7 }
 0x807   :  { %4434 = vmatpush2.msra.mxu1 %v3754_v30  ;;  %4579 = vmatprep.subr.mxu0 %v2605_v53  ;;  %v3763_v41 = vsel %vm437_vm1, %v10340_v55, %v6200_v33  ;;  %v10341_v30 = vld [vmem:[#allocation124_spill] sm:$0xff]  ;;  %v3762_v46 = vsel %vm437_vm1, %v10324_v50, %v10340_v55  ;;  %v6205_v48 = vunpack.i.h.bf16 %v10339_v16  ;;  %v10342_v53 = vld [vmem:[#allocation97_spill] sm:$0xff] }
 0x808   :  { %4435 = vmatprep.subr.mxu1 %v3749_v26  ;;  %v3559_v43 = vpop.permute.xlu0 %3558  ;;  %4580 = vmatpush1.msra.mxu0 %v2604_v15  ;;  %v9062_v36 = vpop.permute.xlu1 %3330  ;;  %v3571_v28 = vsel %vm390_vm2, %v8539_v7, %v10341_v30  ;;  %v3757_v35 = vsel %vm437_vm1, %v10342_v53, %v6204_v42  ;;  %v10343_v26 = vld [vmem:[#allocation127_spill] sm:$0xff]  ;;  %v3756_v50 = vsel %vm437_vm1, %v10328_v14, %v10342_v53  ;;  %v10346_v16 = vld [vmem:[#allocation61_spill] sm:$0xff] }
 0x809   :  { %4436 = vmatpush2.msra.mxu1 %v3748_v51  ;;  %4581 = vmatprep.subr.mxu0 %v2599_v63  ;;  %v3564_v7 = vsel %vm390_vm2, %v10253_v20, %v10343_v26  ;;  %v3751_v13 = vsel %vm437_vm1, %v8577_v59, %v6205_v48  ;;  %v3750_v20 = vsel %vm437_vm1, %v10332_v10, %v8577_v59  ;;  %v6214_v59 = vunpack.i.l.bf16 %v8654_v12  ;;  %v10347_v55 = vld [vmem:[#allocation53_spill] sm:$0xff]  ;;  %v10350_v48 = vld [vmem:[#allocation20_spill] sm:$0xff] }
 0x80a   :  { %4437 = vmatprep.subr.mxu1 %v3583_v29  ;;  %4582 = vmatpush1.msra.mxu0 %v2598_v56  ;;  %v3565_v29 = vsel %vm390_vm2, %v10343_v26, %v8615_v54  ;;  %v3584_v0 = vsel %vm390_vm2, %v9034_v45, %v3559_v43  ;;  %v3387_v56 = vsel %vm343_vm3, %v8737_v60, %v8696_v39  ;;  %v10351_v26 = vld [vmem:[#allocation23_spill] sm:$0xff] }
 0x80b   :  { %4438 = vmatpush2.msra.mxu1 %v3582_v23  ;;  %4583 = vmatprep.subr.mxu0 %v3769_v44  ;;  %v6210_v23 = vunpack.i.h.bf16 %v8657_v32  ;;  %v3393_v32 = vsel %vm343_vm3, %v8685_v11, %v8594_v2  ;;  %v3578_v45 = vsel %vm390_vm2, %v10337_v3, %v8556_v31  ;;  %v3386_v11 = vsel %vm343_vm3, %v10257_v40, %v8737_v60 }
 0x80c   :  { %4439 = vmatprep.subr.mxu1 %v3577_v52  ;;  %v3371_v5 = vpop.permute.xlu0 %3370  ;;  %4584 = vmatpush2.msra.mxu0 %v3768_v57  ;;  %v9083_v21 = vpop.permute.xlu1 %3372  ;;  %v3573_v44 = vsel %vm390_vm2, %v8712_v38, %v6214_v59  ;;  %v3381_v22 = vsel %vm343_vm3, %v8977_v6, %v9062_v36  ;;  %v3380_v12 = vsel %vm343_vm3, %v10260_v24, %v8977_v6  ;;  %v10345_v6 = vld [vmem:[#allocation98_spill] sm:$0xff] }
 0x80d   :  { %4440 = vmatpush2.msra.mxu1 %v3576_v17  ;;  %4585 = vmatprep.subr.mxu0 %v3763_v41  ;;  %v3399_v15 = vsel %vm343_vm3, %v3371_v5, %v9083_v21  ;;  %v3398_v25 = vsel %vm343_vm3, %v8726_v61, %v3371_v5  ;;  %v3585_v61 = vsel %vm390_vm2, %v3559_v43, %v6209_v18  ;;  %v10344_v17 = vld [vmem:[#allocation107_spill] sm:$0xff]  ;;  %v10358_v59 = vld [vmem:[#allocation30_spill] sm:$0xff] }
 0x80e   :  { %4441 = vmatprep.subr.mxu1 %v3571_v28  ;;  %4586 = vmatpush2.msra.mxu0 %v3762_v46  ;;  %v3579_v10 = vsel %vm390_vm2, %v8556_v31, %v6210_v23  ;;  %v3572_v31 = vsel %vm390_vm2, %v10341_v30, %v8712_v38  ;;  %v3567_v3 = vsel %vm390_vm2, %v9010_v47, %v6215_v49  ;;  %v10349_v28 = vld [vmem:[#allocation29_spill] sm:$0xff]  ;;  %v10352_v23 = vld [vmem:[#allocation104_spill] sm:$0xff] }
 0x80f   :  { %4442 = vmatpush2.msra.mxu1 %v3570_v19  ;;  %4587 = vmatprep.subr.mxu0 %v3757_v35  ;;  %v3566_v38 = vsel %vm390_vm2, %v8615_v54, %v9010_v47  ;;  %v10348_v47 = vld [vmem:[#allocation26_spill] sm:$0xff] }
 0x810   :  { %4443 = vmatprep.subr.mxu1 %v3565_v29  ;;  %v9107_v51 = vpop.permute.xlu0 %3360  ;;  %4588 = vmatpush2.msra.mxu0 %v3756_v50  ;;  %v6218_v14 = vpop.permute.xlu1 %6217 }
 0x811   :  { %4444 = vmatpush2.msra.mxu1 %v3564_v7  ;;  %4589 = vmatprep.subr.mxu0 %v3751_v13  ;;  %v6219_v43 = vunpack.i.l.bf16 %v6218_v14  ;;  %v6220_v40 = vunpack.i.h.bf16 %v6218_v14  ;;  %v3394_v46 = vsel %vm343_vm3, %v8594_v2, %v9107_v51  ;;  %v10353_v13 = vld [vmem:[#allocation69_spill] sm:$0xff] }
 0x812   :  { %4445 = vmatprep.subr.mxu1 %v3399_v15  ;;  %4590 = vmatpush2.msra.mxu0 %v3750_v20 }
 0x813   :  { %4446 = vmatpush2.msra.mxu1 %v3398_v25  ;;  %4591 = vmatprep.subr.mxu0 %v3585_v61  ;;  %v3395_v54 = vsel %vm343_vm3, %v9107_v51, %v6220_v40  ;;  %v10355_v61 = vld [vmem:[#allocation64_spill] sm:$0xff] }
 0x814   :  { %4447 = vmatprep.subr.mxu1 %v3393_v32  ;;  %v6223_v63 = vpop.permute.xlu0 %6222  ;;  %4592 = vmatpush2.msra.mxu0 %v3584_v0  ;;  %v10356_v32 = vld [vmem:[#allocation28_spill] sm:$0xff]  ;;  %v10357_v0 = vld [vmem:[#allocation77_spill] sm:$0xff] }
 0x815   :  { %4448 = vmatpush2.msra.mxu1 %v3392_v8  ;;  %v3347_v33 = vpop.permute.xlu1 %3346  ;;  %4593 = vmatprep.subr.mxu0 %v3579_v10  ;;  %v6224_v5 = vunpack.i.l.bf16 %v6223_v63  ;;  %v6225_v19 = vunpack.i.h.bf16 %v6223_v63  ;;  %v10359_v10 = vld [vmem:[#allocation22_spill] sm:$0xff] }
 0x816   :  { %4449 = vmatprep.subr.mxu1 %v3387_v56  ;;  %4594 = vmatpush2.msra.mxu0 %v3578_v45  ;;  %v3388_v29 = vsel %vm343_vm3, %v8696_v39, %v3347_v33  ;;  %v10360_v56 = vld [vmem:[#allocation25_spill] sm:$0xff] }
 0x817   :  { %4450 = vmatpush2.msra.mxu1 %v3386_v11  ;;  %4595 = vmatprep.subr.mxu0 %v3573_v44  ;;  %v3389_v53 = vsel %vm343_vm3, %v3347_v33, %v6224_v5  ;;  %v10361_v33 = vld [vmem:[#allocation48_spill] sm:$0xff] }
 0x818   :  { %4451 = vmatprep.subr.mxu1 %v3381_v22  ;;  %v3375_v60 = vpop.permute.xlu0 %3374  ;;  %4596 = vmatpush2.msra.mxu0 %v3572_v31 }
 0x819   :  { %4452 = vmatpush2.msra.mxu1 %v3380_v12  ;;  %v3333_v52 = vpop.permute.xlu1 %3332  ;;  %v3401_v57 = vsel %vm343_vm3, %v3375_v60, %v6219_v43  ;;  %4597 = vmatprep.subr.mxu0 %v3567_v3  ;;  %v3400_v24 = vsel %vm343_vm3, %v9083_v21, %v3375_v60  ;;  %v6306_v21 = vld [vmem:[%s9952_s10 + $0x8] sm:$0xff] }
 0x81a   :  { %4453 = vmatprep.subr.mxu1 %v10344_v17  ;;  %4598 = vmatpush2.msra.mxu0 %v3566_v38  ;;  %v3383_v2 = vsel %vm343_vm3, %v3333_v52, %v6225_v19  ;;  %v3382_v25 = vsel %vm343_vm3, %v9062_v36, %v3333_v52  ;;  %v10362_v19 = vld [vmem:[#allocation12_spill] sm:$0xff] }
 0x81b   :  { %4454 = vmatpush2.msra.mxu1 %v10345_v6  ;;  %4599 = vmatprep.subr.mxu0 %v3401_v57 }
 0x81c   :  { %4455 = vmatprep.subr.mxu1 %v10346_v16  ;;  %v3913_v42 = vpop.permute.xlu0 %3912  ;;  %4600 = vmatpush2.msra.mxu0 %v3400_v24 }
 0x81d   :  { %4456 = vmatpush2.msra.mxu1 %v10347_v55  ;;  %v6228_v41 = vpop.permute.xlu1 %6227  ;;  %4601 = vmatprep.subr.mxu0 %v3395_v54 }
 0x81e   :  { %4457 = vmatprep.subr.mxu1 %v10348_v47  ;;  %v6229_v30 = vunpack.i.l.bf16 %v6228_v41  ;;  %4461 = vmatprep.mubr.f32.mxu1 %v6306_v21  ;;  %v6230_v50 = vunpack.i.h.bf16 %v6228_v41 }
 0x81f   :  { %4458 = vmatpush2.msra.mxu1 %v10349_v28  ;;  %4602 = vmatpush2.msra.mxu0 %v3394_v46 }
 0x820   :  { %4459 = vmatprep.subr.mxu1 %v10350_v48  ;;  %v3927_v35 = vpop.permute.xlu0 %3926  ;;  %4603 = vmatprep.subr.mxu0 %v3389_v53  ;;  %v3947_v36 = vsel %vm484_vm0, %v3913_v42, %v6230_v50 }
 0x821   :  { %4460 = vmatpush2.msra.mxu1 %v10351_v26  ;;  %v3953_v15 = vsel %vm484_vm0, %v3927_v35, %v6229_v30  ;;  %4604 = vmatpush2.msra.mxu0 %v3388_v29  ;;  %v3899_v7 = vpop.permute.xlu1 %3898  ;;  %v3952_v39 = vsel %vm484_vm0, %v8748_v1, %v3927_v35  ;;  %v10354_v1 = vld [vmem:[#allocation111_spill] sm:$0xff] }
 0x822   :  { %4462 = vmatmul.mubr.f32.vlgmr.msra.gmra.mxu1 %v8781_v4  ;;  %4605 = vmatprep.subr.mxu0 %v3383_v2  ;;  %v3940_v8 = vsel %vm484_vm0, %v10357_v0, %v3899_v7  ;;  %v10363_v29 = vld [vmem:[#allocation11_spill] sm:$0xff] }
 0x823   :  { %4467 = vmatprep.mubr.f32.mxu1 %v8808_v34  ;;  %4606 = vmatpush2.msra.mxu0 %v3382_v25  ;;  %v10364_v25 = vld [vmem:[#allocation13_spill] sm:$0xff] }
 0x824   :  { %4652 = vmatprep.subr.mxu1 %v3953_v15  ;;  %v3901_v51 = vpop.permute.xlu0 %3900  ;;  %4607 = vmatprep.subr.mxu0 %v8428_v58  ;;  %v3946_v58 = vsel %vm484_vm0, %v10354_v1, %v3913_v42 }
 0x825   :  { %4544 = vmatprep.mubr.f32.mxu0 %v10128_v37  ;;  %4608 = vmatpush2.msra.mxu0 %v10352_v23  ;;  %v3941_v18 = vsel %vm484_vm0, %v3899_v7, %v3901_v51  ;;  %v3885_v20 = vpop.permute.xlu1 %3884 }
 0x826   :  { %4468 = vmatmul.mubr.f32.gmra.mxu1 %v8822_v9  ;;  %6101 = vmatmul.mubr.msk.f32.gmra.mxu0 %vm4236_vm10, %v8837_v62  ;;  %v3934_v45 = vsel %vm484_vm0, %v10361_v33, %v3885_v20 }
 0x827   :  { %4653 = vmatpush1.msra.mxu1 %v3952_v39  ;;  %4609 = vmatprep.subr.mxu0 %v10353_v13 }
 0x828   :  { %4654 = vmatprep.subr.mxu1 %v3947_v36  ;;  %v3887_v14 = vpop.permute.xlu0 %3886  ;;  %4610 = vmatpush2.msra.mxu0 %v10355_v61 }
 0x829   :  { %4655 = vmatpush1.msra.mxu1 %v3946_v58  ;;  %4611 = vmatprep.subr.mxu0 %v10356_v32  ;;  %v3935_v63 = vsel %vm484_vm0, %v3885_v20, %v3887_v14  ;;  %v10365_v20 = vld [vmem:[#allocation14_spill] sm:$0xff] }
 0x82a   :  { %4656 = vmatprep.subr.mxu1 %v3941_v18  ;;  %4612 = vmatpush2.msra.mxu0 %v10358_v59 }
 0x82b   :  { %4657 = vmatpush1.msra.mxu1 %v3940_v8  ;;  %4613 = vmatprep.subr.mxu0 %v10359_v10 }
 0x82c   :  { %4615 = vmatprep.mubr.f32.mxu0 %v6306_v21  ;;  %4614 = vmatpush2.msra.mxu0 %v10360_v56 }
 0x82d   :  { %4658 = vmatprep.subr.mxu1 %v3935_v63  ;;  %4616 = vmatmul.mubr.f32.vlgmr.msra.gmra.mxu0 %v8781_v4 }
 0x82e   :  { %4659 = vmatpush1.msra.mxu1 %v3934_v45  ;;  %4692 = vmatprep.mubr.f32.mxu1 %v10128_v37 }
 0x82f   :  { %4621 = vmatprep.mubr.f32.mxu0 %v8808_v34  ;;  %6102 = vmatmul.mubr.msk.f32.vlgmr.msra.gmra.mxu1 %vm4236_vm10, %v8792_v27 }
 0x830   :  { %4698 = vmatprep.mubr.f32.mxu1 %v10128_v37 }
 0x831   :  { %4622 = vmatmul.mubr.f32.gmra.mxu0 %v8822_v9 }
 0x832   :  { %v9222_v31 = vpop.permute.xlu1 %4233 }
 0x833   :  { %6103 = vmatmul.mubr.msk.f32.gmra.mxu1 %vm4236_vm10, %v8837_v62 }
 0x835   :  { %v4229_v49 = vpop.permute.xlu0 %4228 }
 0x89f   :  { %v4309_v4 = vpop.f32.mrf.mxu0 }
 0x8a0   :  { %v4386_v27 = vpop.f32.mrf.mxu1  ;;  %v4310_v44 = vadd.f32 %v4309_v4, %v4229_v49 }
 0x8a1   :  { %v4311_v34 = vpop.f32.mrf.mxu0 }
 0x8a2   :  { %v4388_v11 = vpop.f32.mrf.mxu1  ;;  %v4312_v43 = vadd.f32 %v4311_v34, %v4229_v49  ;;  %v4387_v52 = vadd.f32 %v4386_v27, %v4310_v44 }
 0x8a4   :  { %v4315_v9 = vpop.f32.mrf.mxu0  ;;  %v4389_v60 = vadd.f32 %v4388_v11, %v4312_v43  ;;  %v4705_v42 = vmax.f32 %v4387_v52, 0.0 }
 0x8a5   :  { %v4316_v12 = vadd.f32 %v4315_v9, %v9222_v31 }
 0x8a6   :  { %v4317_v22 = vpop.f32.mrf.mxu0  ;;  %v4706_v24 = vmax.f32 %v4389_v60, 0.0  ;;  %v9231_v15 = vmul.f32 %v4705_v42, %v10363_v29 }
 0x8a7   :  { %v4392_v62 = vpop.f32.mrf.mxu1  ;;  %v4318_v40 = vadd.f32 %v4317_v22, %v9222_v31 }
 0x8a8   :  { %v4393_v6 = vadd.f32 %v4392_v62, %v4316_v12  ;;  %v9228_v48 = vmul.f32 %v4706_v24, %v10362_v19  ;;  %v4745_v58 = vmul.f32 %v9231_v15, %v9231_v15  ;;  %v10366_v24 = vld [vmem:[#allocation15_spill] sm:$0xff] }
 0x8a9   :  { %v4394_v3 = vpop.f32.mrf.mxu1 }
 0x8aa   :  { %v4395_v5 = vadd.f32 %v4394_v3, %v4318_v40  ;;  %v4711_v53 = vmax.f32 %v4393_v6, 0.0  ;;  %v4746_v36 = vmul.f32 %v9228_v48, %v9228_v48  ;;  %v4729_v63 = vadd.f32 %v9228_v48, %v9231_v15 }
 0x8ab   :  { %v4540_v57 = vpop.f32.mrf.mxu0 }
 0x8ac   :  { %v4712_v35 = vmax.f32 %v4395_v5, 0.0  ;;  %v9240_v18 = vmul.f32 %v4711_v53, %v10363_v29  ;;  %v4757_v10 = vadd.f32 %v4746_v36, %v4745_v58 }
 0x8ad   :  { %v4542_v55 = vpop.f32.mrf.mxu0 }
 0x8ae   :  { %v9243_v13 = vmul.f32 %v4712_v35, %v10362_v19  ;;  %v4751_v56 = vmul.f32 %v9240_v18, %v9240_v18 }
 0x8b0   :  { %v4752_v33 = vmul.f32 %v9243_v13, %v9243_v13  ;;  %v4736_v27 = vadd.f32 %v9243_v13, %v9240_v18 }
 0x8e2   :  { %v4463_v38 = vpop.f32.mrf.mxu1 }
 0x8e3   :  { %v4464_v17 = vadd.f32 %v4463_v38, %v4229_v49 }
 0x8e4   :  { %v4465_v16 = vpop.f32.mrf.mxu1 }
 0x8e5   :  { %v4541_v41 = vadd.f32 %v4540_v57, %v4464_v17  ;;  %v4466_v54 = vadd.f32 %v4465_v16, %v4229_v49  ;;  %v4764_v57 = vadd.f32 %v4752_v33, %v4751_v56  ;;  %v9310_v56 = vpop.permute.xlu0 %6237  ;;  %v9312_v33 = vpop.permute.xlu1 %6232 }
 0x8e6   :  { %v4469_v47 = vpop.f32.mrf.mxu1  ;;  %v4546_v46 = vpop.f32.mrf.mxu0 }
 0x8e7   :  { %v4707_v30 = vmax.f32 %v4541_v41, 0.0  ;;  %v4543_v28 = vadd.f32 %v4542_v55, %v4466_v54  ;;  %v4470_v21 = vadd.f32 %v4469_v47, %v9222_v31 }
 0x8e8   :  { %v4471_v26 = vpop.f32.mrf.mxu1  ;;  %v4548_v7 = vpop.f32.mrf.mxu0 }
 0x8e9   :  { %v4472_v2 = vadd.f32 %v4471_v26, %v9222_v31  ;;  %v4547_v50 = vadd.f32 %v4546_v46, %v4470_v21  ;;  %v9235_v39 = vmul.f32 %v4707_v30, %v10364_v25  ;;  %v4708_v51 = vmax.f32 %v4543_v28, 0.0  ;;  %v10367_v21 = vld [vmem:[#allocation16_spill] sm:$0xff] }
 0x8eb   :  { %v4713_v23 = vmax.f32 %v4547_v50, 0.0  ;;  %v4549_v1 = vadd.f32 %v4548_v7, %v4472_v2  ;;  %v4747_v14 = vmul.f32 %v9235_v39, %v9235_v39  ;;  %v9250_v61 = vmul.f32 %v4708_v51, %v10365_v20 }
 0x8ec   :  { %v4730_v34 = vadd.f32 %v4729_v63, %v9235_v39 }
 0x8ed   :  { %v9253_v32 = vmul.f32 %v4713_v23, %v10364_v25  ;;  %v4714_v0 = vmax.f32 %v4549_v1, 0.0  ;;  %v4617_v8 = vpop.f32.mrf.mxu0  ;;  %v4748_v43 = vmul.f32 %v9250_v61, %v9250_v61  ;;  %v4758_v60 = vadd.f32 %v4757_v10, %v4747_v14 }
 0x8ee   :  { %v4618_v59 = vadd.f32 %v4617_v8, %v4229_v49  ;;  %v4731_v47 = vadd.f32 %v4730_v34, %v9250_v61 }
 0x8ef   :  { %v4619_v45 = vpop.f32.mrf.mxu0  ;;  %v4694_v4 = vpop.f32.mrf.mxu1  ;;  %v4753_v62 = vmul.f32 %v9253_v32, %v9253_v32  ;;  %v9269_v44 = vmul.f32 %v4714_v0, %v10365_v20  ;;  %v4759_v30 = vadd.f32 %v4758_v60, %v4748_v43 }
 0x8f0   :  { %v4620_v11 = vadd.f32 %v4619_v45, %v4229_v49  ;;  %v4695_v9 = vadd.f32 %v4694_v4, %v4618_v59  ;;  %v4737_v49 = vadd.f32 %v4736_v27, %v9253_v32  ;;  %v9314_v45 = vpop.permute.xlu0 %6247  ;;  %v9316_v4 = vpop.permute.xlu1 %6242 }
 0x8f1   :  { %v4623_v22 = vpop.f32.mrf.mxu0  ;;  %v4696_v12 = vpop.f32.mrf.mxu1  ;;  %v4765_v55 = vadd.f32 %v4764_v57, %v4753_v62  ;;  %v4754_v41 = vmul.f32 %v9269_v44, %v9269_v44 }
 0x8f2   :  { %v4709_v40 = vmax.f32 %v4695_v9, 0.0  ;;  %v4624_v3 = vadd.f32 %v4623_v22, %v9222_v31  ;;  %v4697_v52 = vadd.f32 %v4696_v12, %v4620_v11  ;;  %v4738_v26 = vadd.f32 %v4737_v49, %v9269_v44 }
 0x8f3   :  { %v4625_v38 = vpop.f32.mrf.mxu0  ;;  %v4700_v17 = vpop.f32.mrf.mxu1  ;;  %v4766_v36 = vadd.f32 %v4765_v55, %v4754_v41 }
 0x8f4   :  { %v9274_v6 = vmul.f32 %v4709_v40, %v10366_v24  ;;  %v4710_v5 = vmax.f32 %v4697_v52, 0.0  ;;  %v4626_v16 = vadd.f32 %v4625_v38, %v9222_v31  ;;  %v4701_v42 = vadd.f32 %v4700_v17, %v4624_v3  ;;  %v4777_v38 = vld [vmem:[%s9954_s12] sm:$0xff] }
 0x8f5   :  { %v4702_v54 = vpop.f32.mrf.mxu1 }
 0x8f6   :  { %v4749_v28 = vmul.f32 %v9274_v6, %v9274_v6  ;;  %v9283_v46 = vmul.f32 %v4710_v5, %v10367_v21  ;;  %v4715_v53 = vmax.f32 %v4701_v42, 0.0  ;;  %v4703_v35 = vadd.f32 %v4702_v54, %v4626_v16  ;;  %v4778_v16 = vld [vmem:[%s9954_s12 + $0x8] sm:$0xff]  ;;  %v4785_v54 = vld [vmem:[%s9955_s13] sm:$0xff] }
 0x8f7   :  { %v4732_v31 = vadd.f32 %v4731_v47, %v9274_v6  ;;  %v4786_v47 = vld [vmem:[%s9955_s13 + $0x8] sm:$0xff] }
 0x8f8   :  { %v9288_v2 = vmul.f32 %v4715_v53, %v10366_v24  ;;  %v4716_v50 = vmax.f32 %v4703_v35, 0.0  ;;  %v4750_v7 = vmul.f32 %v9283_v46, %v9283_v46  ;;  %v4760_v51 = vadd.f32 %v4759_v30, %v4749_v28 }
 0x8f9   :  { %v4733_v23 = vadd.f32 %v4732_v31, %v9283_v46 }
 0x8fa   :  { %v4755_v1 = vmul.f32 %v9288_v2, %v9288_v2  ;;  %v9296_v58 = vmul.f32 %v4716_v50, %v10367_v21  ;;  %v4761_v14 = vadd.f32 %v4760_v51, %v4750_v7  ;;  %v4739_v0 = vadd.f32 %v4738_v26, %v9288_v2 }
 0x8fb   :  { %4734 = vadd.xlane.f32.xlu0 %v4733_v23 }
 0x8fc   :  { %4762 = vadd.xlane.f32.xlu1 %v4761_v14  ;;  %v4756_v8 = vmul.f32 %v9296_v58, %v9296_v58  ;;  %v4767_v63 = vadd.f32 %v4766_v36, %v4755_v1  ;;  %v4740_v59 = vadd.f32 %v4739_v0, %v9296_v58 }
 0x8fe   :  { %v4768_v10 = vadd.f32 %v4767_v63, %v4756_v8 }
 0x900   :  { %4741 = vadd.xlane.f32.xlu1 %v4740_v59  ;;  %4769 = vadd.xlane.f32.xlu0 %v4768_v10 }
 0x911   :  { %6257 = vrot.lane.b32.xlu1 %v10128_v37, %s6354_s19 }
 0x915   :  { %5581 = vrot.lane.b32.xlu1 %v10128_v37, %s6352_s0 }
 0x916   :  { %6252 = vrot.lane.b32.xlu0 %v10128_v37, %s6353_s18 }
 0x91a   :  { %6262 = vrot.lane.b32.xlu0 %v10128_v37, %s6355_s20 }
 0x984   :  { %v4735_v27 = vpop.xlane.xlu0 %4734 }
 0x985   :  { %v4743_v34 = vmul.f32 0.001953125, %v4735_v27  ;;  %v4763_v11 = vpop.xlane.xlu1 %4762 }
 0x986   :  { %v4771_v9 = vmul.f32 0.001953125, %v4763_v11 }
 0x987   :  { %v4773_v43 = vmul.f32 %v4743_v34, %v4743_v34 }
 0x989   :  { %v4775_v62 = vsub.f32 %v4771_v9, %v4773_v43  ;;  %v4742_v22 = vpop.xlane.xlu1 %4741  ;;  %v4770_v12 = vpop.xlane.xlu0 %4769 }
 0x98a   :  { %v4744_v60 = vmul.f32 0.001953125, %v4742_v22  ;;  %v4772_v52 = vmul.f32 0.001953125, %v4770_v12 }
 0x98b   :  { %v4779_v40 = vadd.f32 1e-05, %v4775_v62 }
 0x98c   :  { %v4774_v3 = vmul.f32 %v4744_v60, %v4744_v60 }
 0x98d   :  { %6278 = vrsqrt.f32 %v4779_v40  ;;  %v9330_v35 = vpop.permute.xlu1 %6257  ;;  %v9332_v26 = vpop.permute.xlu0 %6252 }
 0x98e   :  { %v4776_v57 = vsub.f32 %v4772_v52, %v4774_v3 }
 0x990   :  { %v4780_v49 = vadd.f32 1e-05, %v4776_v57 }
 0x991   :  { %v9334_v31 = vpop.permute.xlu1 %5581  ;;  %v9336_v50 = vpop.permute.xlu0 %6262 }
 0x992   :  { %6280 = vrsqrt.f32 %v4780_v49  ;;  %10368 = vst [vmem:[#allocation32_spill] sm:$0xff] %v9334_v31 }
 0x99a   :  { %v6279_v17 = vpop.eup %6278 }
 0x99b   :  { %v4783_v5 = vmul.f32 %v6279_v17, %v4777_v38 }
 0x99d   :  { %4793 = vperm.xlu1 %6120, %v4783_v5   ;;  %v4787_v41 = vmul.f32 %v4783_v5, %v4743_v34 }
 0x99f   :  { %v6281_v42 = vpop.eup %6280  ;;  %v4789_v28 = vsub.f32 %v4785_v54, %v4787_v41 }
 0x9a0   :  { %v4784_v55 = vmul.f32 %v6281_v42, %v4778_v16  ;;  %v9522_v42 = vld [vmem:[%s9956_s14 + $0x8] sm:$0xff] }
 0x9a1   :  { %6104 = vmatprep.mubr.msk.f32.mxu1 %vm1894_vm9, %v9522_v42  ;;  %6105 = vmatprep.mubr.msk.f32.mxu0 %vm1894_vm9, %v9522_v42 }
 0x9a2   :  { %4798 = vperm.xlu0 %6119, %v4784_v55   ;;  %v4788_v30 = vmul.f32 %v4784_v55, %v4744_v60 }
 0x9a4   :  { %v4790_v53 = vsub.f32 %v4786_v47, %v4788_v30 }
 0x9a6   :  { %4815 = vperm.xlu0 %6119, %v4789_v28   ;;  %4820 = vperm.xlu1 %6120, %v4790_v53  }
 0xa18   :  { %v4794_v51 = vpop.permute.xlu1 %4793 }
 0xa19   :  { %v4802_v23 = vmul.f32 %v4794_v51, %v9228_v48  ;;  %v4803_v1 = vmul.f32 %v4794_v51, %v9235_v39  ;;  %v4801_v0 = vmul.f32 %v4794_v51, %v9231_v15  ;;  %v4804_v15 = vmul.f32 %v4794_v51, %v9250_v61 }
 0xa1a   :  { %v4806_v27 = vmul.f32 %v4794_v51, %v9283_v46  ;;  %v4805_v61 = vmul.f32 %v4794_v51, %v9274_v6 }
 0xa1d   :  { %v9338_v7 = vpop.permute.xlu0 %4798 }
 0xa1e   :  { %v4808_v62 = vmul.f32 %v9338_v7, %v9243_v13  ;;  %v4807_v12 = vmul.f32 %v9338_v7, %v9240_v18  ;;  %v4809_v3 = vmul.f32 %v9338_v7, %v9253_v32  ;;  %v4811_v16 = vmul.f32 %v9338_v7, %v9288_v2 }
 0xa1f   :  { %v4810_v47 = vmul.f32 %v9338_v7, %v9269_v44 }
 0xa21   :  { %v4816_v36 = vpop.permute.xlu0 %4815  ;;  %v4821_v6 = vpop.permute.xlu1 %4820 }
 0xa22   :  { %v4824_v14 = vadd.f32 %v4816_v36, %v4802_v23  ;;  %v4825_v8 = vadd.f32 %v4816_v36, %v4803_v1  ;;  %v4823_v63 = vadd.f32 %v4816_v36, %v4801_v0  ;;  %v4826_v39 = vadd.f32 %v4816_v36, %v4804_v15 }
 0xa23   :  { %v4828_v34 = vadd.f32 %v4816_v36, %v4806_v27  ;;  %v4827_v9 = vadd.f32 %v4816_v36, %v4805_v61  ;;  %v4830_v22 = vadd.f32 %v4821_v6, %v4808_v62  ;;  %v4829_v60 = vadd.f32 %v4821_v6, %v4807_v12 }
 0xa24   :  { %v9344_v59 = vmul.f32 %v4824_v14, %v10362_v19  ;;  %v9347_v10 = vmul.f32 %v4825_v8, %v10364_v25  ;;  %v9354_v48 = vmul.f32 %v4823_v63, %v10363_v29  ;;  %v9387_v11 = vmul.f32 %v4826_v39, %v10365_v20 }
 0xa25   :  { %v9395_v43 = vmul.f32 %v4828_v34, %v10367_v21  ;;  %v9402_v46 = vmul.f32 %v4827_v9, %v10366_v24  ;;  %v9457_v40 = vmul.f32 %v4830_v22, %v10362_v19  ;;  %v9464_v13 = vmul.f32 %v4829_v60, %v10363_v29 }
 0xa26   :  { %5465 = vrot.lane.b32.xlu0 %v9344_v59, %s6353_s18  ;;  %5467 = vrot.lane.b32.xlu1 %v9347_v10, %s6353_s18  ;;  %v4831_v19 = vadd.f32 %v4821_v6, %v4809_v3  ;;  %v4833_v55 = vadd.f32 %v4821_v6, %v4811_v16  ;;  %v4832_v30 = vadd.f32 %v4821_v6, %v4810_v47 }
 0xa27   :  { %10369 = vst [vmem:[#allocation99_spill] sm:$0xff] %v9395_v43  ;;  %10370 = vst [vmem:[#allocation103_spill] sm:$0xff] %v9402_v46  ;;  %v4812_v36 = vmul.f32 %v9338_v7, %v9296_v58 }
 0xa28   :  { %v9477_v18 = vmul.f32 %v4831_v19, %v10364_v25  ;;  %v9542_v28 = vmul.f32 %v4833_v55, %v10366_v24  ;;  %v9556_v1 = vmul.f32 %v4832_v30, %v10365_v20 }
 0xa29   :  { %v4834_v44 = vadd.f32 %v4821_v6, %v4812_v36 }
 0xa2a   :  { %5463 = vrot.lane.b32.xlu0 %v9354_v48, %s6353_s18  ;;  %5375 = vrot.lane.b32.xlu1 %v9347_v10, %s6354_s19  ;;  %10371 = vst [vmem:[#allocation71_spill] sm:$0xff] %v9542_v28 }
 0xa2b   :  { %v9568_v58 = vmul.f32 %v4834_v44, %v10367_v21 }
 0xa2e   :  { %5373 = vrot.lane.b32.xlu0 %v9344_v59, %s6354_s19  ;;  %5283 = vrot.lane.b32.xlu1 %v9347_v10, %s6355_s20 }
 0xa32   :  { %5371 = vrot.lane.b32.xlu0 %v9354_v48, %s6354_s19  ;;  %5167 = vrot.lane.b32.xlu1 %v9344_v59, %s6356_s21 }
 0xa36   :  { %5281 = vrot.lane.b32.xlu0 %v9344_v59, %s6355_s20  ;;  %5073 = vrot.lane.b32.xlu1 %v9354_v48, %s6357_s24 }
 0xa3a   :  { %5279 = vrot.lane.b32.xlu0 %v9354_v48, %s6355_s20  ;;  %4983 = vrot.lane.b32.xlu1 %v9344_v59, %s6358_s25 }
 0xa3e   :  { %5165 = vrot.lane.b32.xlu0 %v9354_v48, %s6356_s21  ;;  %4889 = vrot.lane.b32.xlu1 %v9354_v48, %s6359_s1 }
 0xa42   :  { %5075 = vrot.lane.b32.xlu0 %v9344_v59, %s6357_s24  ;;  %5559 = vrot.lane.b32.xlu1 %v9347_v10, %s6352_s0 }
 0xa46   :  { %4981 = vrot.lane.b32.xlu0 %v9354_v48, %s6358_s25  ;;  %5469 = vrot.lane.b32.xlu1 %v9387_v11, %s6353_s18 }
 0xa4a   :  { %4891 = vrot.lane.b32.xlu0 %v9344_v59, %s6359_s1  ;;  %5473 = vrot.lane.b32.xlu1 %v9395_v43, %s6353_s18 }
 0xa4e   :  { %5557 = vrot.lane.b32.xlu0 %v9344_v59, %s6352_s0  ;;  %5379 = vrot.lane.b32.xlu1 %v9402_v46, %s6354_s19 }
 0xa52   :  { %5555 = vrot.lane.b32.xlu0 %v9354_v48, %s6352_s0  ;;  %5285 = vrot.lane.b32.xlu1 %v9387_v11, %s6355_s20 }
 0xa56   :  { %5471 = vrot.lane.b32.xlu0 %v9402_v46, %s6353_s18  ;;  %5289 = vrot.lane.b32.xlu1 %v9395_v43, %s6355_s20 }
 0xa5a   :  { %5377 = vrot.lane.b32.xlu0 %v9387_v11, %s6354_s19  ;;  %5171 = vrot.lane.b32.xlu1 %v9387_v11, %s6356_s21 }
 0xa5e   :  { %5381 = vrot.lane.b32.xlu0 %v9395_v43, %s6354_s19  ;;  %5175 = vrot.lane.b32.xlu1 %v9395_v43, %s6356_s21 }
 0xa62   :  { %5287 = vrot.lane.b32.xlu0 %v9402_v46, %s6355_s20  ;;  %5079 = vrot.lane.b32.xlu1 %v9387_v11, %s6357_s24 }
 0xa66   :  { %5169 = vrot.lane.b32.xlu0 %v9347_v10, %s6356_s21  ;;  %5083 = vrot.lane.b32.xlu1 %v9395_v43, %s6357_s24 }
 0xa6a   :  { %5173 = vrot.lane.b32.xlu0 %v9402_v46, %s6356_s21  ;;  %4987 = vrot.lane.b32.xlu1 %v9387_v11, %s6358_s25 }
 0xa6e   :  { %5077 = vrot.lane.b32.xlu0 %v9347_v10, %s6357_s24  ;;  %4991 = vrot.lane.b32.xlu1 %v9395_v43, %s6358_s25 }
 0xa72   :  { %5081 = vrot.lane.b32.xlu0 %v9402_v46, %s6357_s24  ;;  %4895 = vrot.lane.b32.xlu1 %v9387_v11, %s6359_s1 }
 0xa76   :  { %4985 = vrot.lane.b32.xlu0 %v9347_v10, %s6358_s25  ;;  %4899 = vrot.lane.b32.xlu1 %v9395_v43, %s6359_s1 }
 0xa7a   :  { %4989 = vrot.lane.b32.xlu0 %v9402_v46, %s6358_s25  ;;  %5563 = vrot.lane.b32.xlu1 %v9402_v46, %s6352_s0 }
 0xa7e   :  { %4893 = vrot.lane.b32.xlu0 %v9347_v10, %s6359_s1  ;;  %5479 = vrot.lane.b32.xlu1 %v9457_v40, %s6353_s18 }
 0xa82   :  { %4897 = vrot.lane.b32.xlu0 %v9402_v46, %s6359_s1  ;;  %5477 = vrot.lane.b32.xlu1 %v9464_v13, %s6353_s18 }
 0xa86   :  { %5561 = vrot.lane.b32.xlu0 %v9387_v11, %s6352_s0  ;;  %5387 = vrot.lane.b32.xlu1 %v9457_v40, %s6354_s19 }
 0xa8a   :  { %5481 = vrot.lane.b32.xlu0 %v9477_v18, %s6353_s18  ;;  %5385 = vrot.lane.b32.xlu1 %v9464_v13, %s6354_s19 }
 0xa8e   :  { %5389 = vrot.lane.b32.xlu0 %v9477_v18, %s6354_s19  ;;  %5295 = vrot.lane.b32.xlu1 %v9457_v40, %s6355_s20 }
 0xa92   :  { %5297 = vrot.lane.b32.xlu0 %v9477_v18, %s6355_s20  ;;  %5293 = vrot.lane.b32.xlu1 %v9464_v13, %s6355_s20 }
 0xa96   :  { %5181 = vrot.lane.b32.xlu0 %v9457_v40, %s6356_s21  ;;  %5179 = vrot.lane.b32.xlu1 %v9464_v13, %s6356_s21 }
 0xa98   :  { %v5466_v29 = vpop.permute.xlu0 %5465  ;;  %v5468_v25 = vpop.permute.xlu1 %5467 }
 0xa99   :  { %v9498_v32 = vsel %vm437_vm1, %v5466_v29, %v5468_v25 }
 0xa9a   :  { %5087 = vrot.lane.b32.xlu0 %v9464_v13, %s6357_s24  ;;  %5089 = vrot.lane.b32.xlu1 %v9457_v40, %s6357_s24 }
 0xa9c   :  { %v5464_v52 = vpop.permute.xlu0 %5463  ;;  %v9502_v57 = vpop.permute.xlu1 %5375 }
 0xa9d   :  { %v9505_v49 = vsel %vm437_vm1, %v5464_v52, %v5466_v29 }
 0xa9e   :  { %4997 = vrot.lane.b32.xlu0 %v9457_v40, %s6358_s25  ;;  %4995 = vrot.lane.b32.xlu1 %v9464_v13, %s6358_s25 }
 0xaa0   :  { %v5374_v38 = vpop.permute.xlu0 %5373  ;;  %v5284_v17 = vpop.permute.xlu1 %5283 }
 0xaa1   :  { %v9513_v5 = vsel %vm390_vm2, %v5374_v38, %v9502_v57 }
 0xaa2   :  { %4903 = vrot.lane.b32.xlu0 %v9464_v13, %s6359_s1  ;;  %4905 = vrot.lane.b32.xlu1 %v9457_v40, %s6359_s1 }
 0xaa4   :  { %v5372_v41 = vpop.permute.xlu0 %5371  ;;  %v9530_v2 = vpop.permute.xlu1 %5167 }
 0xaa5   :  { %v9533_v54 = vsel %vm390_vm2, %v5372_v41, %v5374_v38 }
 0xaa6   :  { %5573 = vrot.lane.b32.xlu0 %v9477_v18, %s6352_s0  ;;  %5571 = vrot.lane.b32.xlu1 %v9457_v40, %s6352_s0 }
 0xaa8   :  { %v5282_v53 = vpop.permute.xlu0 %5281  ;;  %v9544_v51 = vpop.permute.xlu1 %5073 }
 0xaa9   :  { %v9547_v23 = vsel %vm343_vm3, %v5282_v53, %v5284_v17 }
 0xaaa   :  { %5485 = vrot.lane.b32.xlu0 %v9542_v28, %s6353_s18  ;;  %5569 = vrot.lane.b32.xlu1 %v9464_v13, %s6352_s0 }
 0xaac   :  { %v5280_v24 = vpop.permute.xlu0 %5279  ;;  %v9558_v14 = vpop.permute.xlu1 %4983 }
 0xaad   :  { %v9561_v0 = vsel %vm343_vm3, %v5280_v24, %v5282_v53 }
 0xaae   :  { %5391 = vrot.lane.b32.xlu0 %v9556_v1, %s6354_s19  ;;  %5483 = vrot.lane.b32.xlu1 %v9556_v1, %s6353_s18 }
 0xab0   :  { %v9570_v7 = vpop.permute.xlu0 %5165  ;;  %v9572_v8 = vpop.permute.xlu1 %4889 }
 0xab1   :  { %v9577_v20 = vsel %vm284_vm4, %v9570_v7, %v9530_v2 }
 0xab2   :  { %5395 = vrot.lane.b32.xlu0 %v9568_v58, %s6354_s19  ;;  %5487 = vrot.lane.b32.xlu1 %v9568_v58, %s6353_s18 }
 0xab4   :  { %v9583_v63 = vpop.permute.xlu0 %5075  ;;  %v9585_v15 = vpop.permute.xlu1 %5559 }
 0xab5   :  { %v9590_v21 = vsel %vm237_vm5, %v9544_v51, %v9583_v63 }
 0xab6   :  { %5301 = vrot.lane.b32.xlu0 %v9542_v28, %s6355_s20  ;;  %5393 = vrot.lane.b32.xlu1 %v9542_v28, %s6354_s19 }
 0xab8   :  { %v9596_v39 = vpop.permute.xlu0 %4981  ;;  %v5470_v27 = vpop.permute.xlu1 %5469 }
 0xab9   :  { %v9601_v34 = vsel %vm190_vm6, %v9596_v39, %v9558_v14  ;;  %v9604_v61 = vsel %vm437_vm1, %v5468_v25, %v5470_v27 }
 0xaba   :  { %5183 = vrot.lane.b32.xlu0 %v9477_v18, %s6356_s21  ;;  %5299 = vrot.lane.b32.xlu1 %v9556_v1, %s6355_s20 }
 0xabc   :  { %v9610_v9 = vpop.permute.xlu0 %4891  ;;  %v9612_v6 = vpop.permute.xlu1 %5473 }
 0xabd   :  { %v9617_v62 = vsel %vm143_vm7, %v9572_v8, %v9610_v9 }
 0xabe   :  { %5187 = vrot.lane.b32.xlu0 %v9542_v28, %s6356_s21  ;;  %5303 = vrot.lane.b32.xlu1 %v9568_v58, %s6355_s20 }
 0xac0   :  { %v5558_v22 = vpop.permute.xlu0 %5557  ;;  %v5380_v12 = vpop.permute.xlu1 %5379 }
 0xac1   :  { %v9625_v60 = vsel %vm484_vm0, %v5558_v22, %v9585_v15 }
 0xac2   :  { %5091 = vrot.lane.b32.xlu0 %v9477_v18, %s6357_s24  ;;  %5185 = vrot.lane.b32.xlu1 %v9556_v1, %s6356_s21 }
 0xac4   :  { %v5556_v3 = vpop.permute.xlu0 %5555  ;;  %v5286_v19 = vpop.permute.xlu1 %5285 }
 0xac5   :  { %v9632_v29 = vsel %vm484_vm0, %v5556_v3, %v5558_v22  ;;  %v9635_v25 = vsel %vm343_vm3, %v5284_v17, %v5286_v19 }
 0xac6   :  { %5095 = vrot.lane.b32.xlu0 %v9542_v28, %s6357_s24  ;;  %5189 = vrot.lane.b32.xlu1 %v9568_v58, %s6356_s21 }
 0xac8   :  { %v5472_v52 = vpop.permute.xlu0 %5471  ;;  %v9641_v38 = vpop.permute.xlu1 %5289 }
 0xac9   :  { %v9645_v16 = vsel %vm437_vm1, %v5472_v52, %v9612_v6  ;;  %v9648_v55 = vsel %vm437_vm1, %v5470_v27, %v5472_v52 }
 0xaca   :  { %4999 = vrot.lane.b32.xlu0 %v9477_v18, %s6358_s25  ;;  %5093 = vrot.lane.b32.xlu1 %v9556_v1, %s6357_s24 }
 0xacc   :  { %v5378_v17 = vpop.permute.xlu0 %5377  ;;  %v5172_v41 = vpop.permute.xlu1 %5171 }
 0xacd   :  { %v9656_v47 = vsel %vm390_vm2, %v9502_v57, %v5378_v17  ;;  %v9659_v30 = vsel %vm390_vm2, %v5378_v17, %v5380_v12 }
 0xace   :  { %5003 = vrot.lane.b32.xlu0 %v9542_v28, %s6358_s25  ;;  %5097 = vrot.lane.b32.xlu1 %v9568_v58, %s6357_s24 }
 0xad0   :  { %v9665_v53 = vpop.permute.xlu0 %5381  ;;  %v5176_v36 = vpop.permute.xlu1 %5175 }
 0xad1   :  { %v9669_v44 = vsel %vm390_vm2, %v5380_v12, %v9665_v53 }
 0xad2   :  { %4907 = vrot.lane.b32.xlu0 %v9477_v18, %s6359_s1  ;;  %5001 = vrot.lane.b32.xlu1 %v9556_v1, %s6358_s25 }
 0xad4   :  { %v5288_v57 = vpop.permute.xlu0 %5287  ;;  %v5080_v24 = vpop.permute.xlu1 %5079 }
 0xad5   :  { %v9677_v27 = vsel %vm343_vm3, %v5288_v57, %v9641_v38  ;;  %v9680_v22 = vsel %vm343_vm3, %v5286_v19, %v5288_v57 }
 0xad6   :  { %4911 = vrot.lane.b32.xlu0 %v9542_v28, %s6359_s1  ;;  %5005 = vrot.lane.b32.xlu1 %v9568_v58, %s6358_s25 }
 0xad8   :  { %v5170_v12 = vpop.permute.xlu0 %5169  ;;  %v5084_v3 = vpop.permute.xlu1 %5083 }
 0xad9   :  { %v9688_v52 = vsel %vm284_vm4, %v9530_v2, %v5170_v12  ;;  %v9691_v17 = vsel %vm284_vm4, %v5170_v12, %v5172_v41 }
 0xada   :  { %10372 = vst [vmem:[#allocation66_spill] sm:$0xff] %v9688_v52  ;;  %10373 = vst [vmem:[#allocation67_spill] sm:$0xff] %v9691_v17  ;;  %5575 = vrot.lane.b32.xlu0 %v9556_v1, %s6352_s0  ;;  %4909 = vrot.lane.b32.xlu1 %v9556_v1, %s6359_s1 }
 0xadc   :  { %v5174_v19 = vpop.permute.xlu0 %5173  ;;  %v4988_v57 = vpop.permute.xlu1 %4987 }
 0xadd   :  { %v9698_v31 = vsel %vm284_vm4, %v5172_v41, %v5174_v19  ;;  %v9701_v46 = vsel %vm284_vm4, %v5174_v19, %v5176_v36  ;;  %v5729_v41 = vld [vmem:[%s9957_s15] sm:$0xff] }
 0xade   :  { %10374 = vst [vmem:[#allocation31_spill] sm:$0xff] %v9698_v31  ;;  %10375 = vst [vmem:[#allocation34_spill] sm:$0xff] %v9701_v46  ;;  %5579 = vrot.lane.b32.xlu0 %v9568_v58, %s6352_s0  ;;  %4913 = vrot.lane.b32.xlu1 %v9568_v58, %s6359_s1 }
 0xae0   :  { %v5078_v2 = vpop.permute.xlu0 %5077  ;;  %v4992_v12 = vpop.permute.xlu1 %4991 }
 0xae1   :  { %v9709_v52 = vsel %vm237_vm5, %v9583_v63, %v5078_v2  ;;  %v9712_v17 = vsel %vm237_vm5, %v5078_v2, %v5080_v24 }
 0xae2   :  { %10376 = vst [vmem:[#allocation36_spill] sm:$0xff] %v9709_v52  ;;  %10377 = vst [vmem:[#allocation100_spill] sm:$0xff] %v9712_v17  ;;  %5565 = vrot.lane.b32.xlu0 %v9395_v43, %s6352_s0  ;;  %5577 = vrot.lane.b32.xlu1 %v9542_v28, %s6352_s0 }
 0xae4   :  { %v5082_v36 = vpop.permute.xlu0 %5081  ;;  %v4896_v19 = vpop.permute.xlu1 %4895 }
 0xae5   :  { %v9722_v31 = vsel %vm237_vm5, %v5080_v24, %v5082_v36  ;;  %v9725_v63 = vsel %vm237_vm5, %v5082_v36, %v5084_v3 }
 0xae6   :  { %5732 = vperm.xlu0 %6119, %v5729_v41   ;;  %5567 = vrot.lane.b32.xlu1 %v10128_v37, %s6352_s0 }
 0xae8   :  { %v4986_v2 = vpop.permute.xlu0 %4985  ;;  %v4900_v52 = vpop.permute.xlu1 %4899 }
 0xae9   :  { %v9731_v17 = vsel %vm190_vm6, %v9558_v14, %v4986_v2  ;;  %v9734_v46 = vsel %vm190_vm6, %v4986_v2, %v4988_v57 }
 0xaea   :  { %10378 = vst [vmem:[#allocation73_spill] sm:$0xff] %v9731_v17  ;;  %10379 = vst [vmem:[#allocation68_spill] sm:$0xff] %v9734_v46 }
 0xaec   :  { %v4990_v43 = vpop.permute.xlu0 %4989  ;;  %v9736_v28 = vpop.permute.xlu1 %5563 }
 0xaed   :  { %10380 = vst [vmem:[#allocation70_spill] sm:$0xff] %v9736_v28  ;;  %v9739_v24 = vsel %vm190_vm6, %v4988_v57, %v4990_v43  ;;  %v9742_v3 = vsel %vm190_vm6, %v4990_v43, %v4992_v12 }
 0xaf0   :  { %v4894_v41 = vpop.permute.xlu0 %4893  ;;  %v5480_v37 = vpop.permute.xlu1 %5479 }
 0xaf1   :  { %v9746_v36 = vsel %vm143_vm7, %v9610_v9, %v4894_v41  ;;  %v9749_v14 = vsel %vm143_vm7, %v4894_v41, %v4896_v19 }
 0xaf2   :  { %10381 = vst [vmem:[#allocation33_spill] sm:$0xff] %v9746_v36 }
 0xaf4   :  { %v4898_v2 = vpop.permute.xlu0 %4897  ;;  %v5478_v17 = vpop.permute.xlu1 %5477 }
 0xaf5   :  { %v9752_v46 = vsel %vm143_vm7, %v4896_v19, %v4898_v2  ;;  %v9755_v57 = vsel %vm143_vm7, %v4898_v2, %v4900_v52  ;;  %v5497_v19 = vsel %vm437_vm1, %v5478_v17, %v5480_v37 }
 0xaf8   :  { %v9757_v28 = vpop.permute.xlu0 %5561  ;;  %v5388_v43 = vpop.permute.xlu1 %5387 }
 0xaf9   :  { %10382 = vst [vmem:[#allocation38_spill] sm:$0xff] %v9757_v28  ;;  %v9762_v12 = vsel %vm484_vm0, %v9585_v15, %v9757_v28 }
 0xafa   :  { %10383 = vst [vmem:[#allocation40_spill] sm:$0xff] %v9762_v12 }
 0xafc   :  { %v9764_v9 = vpop.permute.xlu0 %5481  ;;  %v5386_v41 = vpop.permute.xlu1 %5385 }
 0xafd   :  { %v5498_v36 = vsel %vm437_vm1, %v5480_v37, %v9764_v9  ;;  %v5405_v12 = vsel %vm390_vm2, %v5386_v41, %v5388_v43 }
 0xafe   :  { %5738 = vmatprep.subr.mxu1 %v5498_v36 }
 0xaff   :  { %5739 = vmatpush1.msra.mxu1 %v5497_v19 }
 0xb00   :  { %5740 = vmatprep.subr.mxu1 %v9498_v32  ;;  %v9770_v52 = vpop.permute.xlu0 %5389  ;;  %v5296_v2 = vpop.permute.xlu1 %5295 }
 0xb01   :  { %5741 = vmatpush1.msra.mxu1 %v9505_v49  ;;  %v5406_v15 = vsel %vm390_vm2, %v5388_v43, %v9770_v52 }
 0xb02   :  { %5742 = vmatprep.subr.mxu1 %v5406_v15 }
 0xb03   :  { %5743 = vmatpush1.msra.mxu1 %v5405_v12  ;;  %v6235_v12 = vunpack.i.h.bf16 %v9312_v33 }
 0xb04   :  { %5744 = vmatprep.subr.mxu1 %v9513_v5  ;;  %v9777_v28 = vpop.permute.xlu0 %5297  ;;  %v5294_v17 = vpop.permute.xlu1 %5293  ;;  %v6234_v5 = vunpack.i.l.bf16 %v9312_v33  ;;  %v6240_v33 = vunpack.i.h.bf16 %v9310_v56 }
 0xb05   :  { %5745 = vmatpush1.msra.mxu1 %v9533_v54  ;;  %v5314_v32 = vsel %vm343_vm3, %v5296_v2, %v9777_v28  ;;  %v5313_v37 = vsel %vm343_vm3, %v5294_v17, %v5296_v2  ;;  %v6244_v2 = vunpack.i.l.bf16 %v9316_v4 }
 0xb06   :  { %5746 = vmatprep.subr.mxu1 %v5314_v32 }
 0xb07   :  { %5747 = vmatpush1.msra.mxu1 %v5313_v37  ;;  %v6249_v37 = vunpack.i.l.bf16 %v9314_v45 }
 0xb08   :  { %5748 = vmatprep.subr.mxu1 %v9547_v23  ;;  %v9784_v49 = vpop.permute.xlu0 %5181  ;;  %v5180_v36 = vpop.permute.xlu1 %5179 }
 0xb09   :  { %5749 = vmatpush1.msra.mxu1 %v9561_v0  ;;  %v5198_v23 = vsel %vm284_vm4, %v5180_v36, %v9784_v49  ;;  %v5197_v0 = vsel %vm284_vm4, %v6234_v5, %v5180_v36 }
 0xb0a   :  { %5750 = vmatprep.subr.mxu1 %v9457_v40  ;;  %v6239_v40 = vunpack.i.l.bf16 %v9310_v56  ;;  %v6245_v56 = vunpack.i.h.bf16 %v9316_v4  ;;  %v6250_v4 = vunpack.i.h.bf16 %v9314_v45  ;;  %v9837_v45 = vld [vmem:[%s9956_s14] sm:$0xff]  ;;  %s6362_s14 = smov [#allocation8]  }
 0xb0b   :  { %5751 = vmatpush1.msra.mxu1 %v9464_v13  ;;  %v5191_v13 = vsel %vm284_vm4, %v6235_v12, %v9570_v7  ;;  %v5099_v7 = vsel %vm237_vm5, %v6240_v33, %v9544_v51  ;;  %s6071_s20 = sshll.u32 %s6362_s14, 4  ;;  %s6072_s20 = int_to_ptr.vmem [resolvable:$true] %s6071_s20 }
 0xb0c   :  { %5752 = vmatprep.subr.mxu1 %v9344_v59  ;;  %v5088_v54 = vpop.permute.xlu0 %5087  ;;  %v9791_v43 = vpop.permute.xlu1 %5089  ;;  %v5007_v51 = vsel %vm190_vm6, %v6245_v56, %v9596_v39  ;;  %s6327_s21 = scalar_lea.vmem %s6072_s20, 768  ;;  %p6332_p6 = scmp.lt.s32.totalorder %s6072_s20, %s6072_s20 }
 0xb0d   :  { %5753 = vmatpush1.msra.mxu1 %v9354_v48  ;;  %v5106_v48 = vsel %vm237_vm5, %v5088_v54, %v9791_v43  ;;  %v5105_v19 = vsel %vm237_vm5, %v6239_v40, %v5088_v54  ;;  %p6328_p5 = scmp.ne.s32.totalorder %s6072_s20, %s6327_s21  ;;  %p6333_p7 = scmp.lt.s32.totalorder %s6327_s21, %s6327_s21 }
 0xb0e   :  { %5754 = vmatprep.subr.mxu1 %v5198_v23  ;;  %v4915_v23 = vsel %vm143_vm7, %v6250_v4, %v9572_v8 }
 0xb0f   :  { %5755 = vmatpush1.msra.mxu1 %v5197_v0  ;;  %p6334_p8 = por %p6333_p7, %p6332_p6 }
 0xb10   :  { %5756 = vmatprep.subr.mxu1 %v9577_v20  ;;  %v9802_v59 = vpop.permute.xlu0 %4997  ;;  %v4996_v41 = vpop.permute.xlu1 %4995 }
 0xb11   :  { %5757 = vmatpush1.msra.mxu1 %v5191_v13  ;;  %v5014_v17 = vsel %vm190_vm6, %v4996_v41, %v9802_v59  ;;  %v5013_v32 = vsel %vm190_vm6, %v6244_v2, %v4996_v41  ;;  %v6254_v41 = vunpack.i.l.bf16 %v9332_v26  ;;  %p6335_p9 = pnand %p6334_p8, %p6328_p5 }
 0xb12   :  { %5758 = vmatprep.subr.mxu1 %v5106_v48 }
 0xb13   :  { %5759 = vmatpush1.msra.mxu1 %v5105_v19  ;;  %v6259_v19 = vunpack.i.l.bf16 %v9330_v35 }
 0xb14   :  { %5760 = vmatprep.subr.mxu1 %v9590_v21  ;;  %v4904_v20 = vpop.permute.xlu0 %4903  ;;  %v9812_v15 = vpop.permute.xlu1 %4905 }
 0xb15   :  { %5761 = vmatpush1.msra.mxu1 %v5099_v7  ;;  %v4922_v5 = vsel %vm143_vm7, %v4904_v20, %v9812_v15  ;;  %v4921_v54 = vsel %vm143_vm7, %v6249_v37, %v4904_v20 }
 0xb16   :  { %5762 = vmatprep.subr.mxu1 %v5014_v17 }
 0xb17   :  { %5763 = vmatpush1.msra.mxu1 %v5013_v32  ;;  %v6264_v32 = vunpack.i.l.bf16 %v9336_v50 }
 0xb18   :  { %5764 = vmatprep.subr.mxu1 %v9601_v34  ;;  %v9822_v21 = vpop.permute.xlu0 %5573  ;;  %v5572_v36 = vpop.permute.xlu1 %5571 }
 0xb19   :  { %5765 = vmatpush1.msra.mxu1 %v5007_v51  ;;  %v5590_v12 = vsel %vm484_vm0, %v5572_v36, %v9822_v21 }
 0xb1a   :  { %5766 = vmatprep.subr.mxu1 %v4922_v5 }
 0xb1b   :  { %5767 = vmatpush1.msra.mxu1 %v4921_v54  ;;  %v10389_v54 = vld [vmem:[#allocation34_spill] sm:$0xff] }
 0xb1c   :  { %5768 = vmatprep.subr.mxu1 %v9617_v62  ;;  %v5486_v39 = vpop.permute.xlu0 %5485  ;;  %v5570_v34 = vpop.permute.xlu1 %5569 }
 0xb1d   :  { %5769 = vmatpush1.msra.mxu1 %v4915_v23  ;;  %v5589_v0 = vsel %vm484_vm0, %v5570_v34, %v5572_v36  ;;  %v10390_v23 = vld [vmem:[#allocation31_spill] sm:$0xff] }
 0xb1e   :  { %5798 = vmatprep.subr.mxu1 %v5590_v12 }
 0xb1f   :  { %5799 = vmatpush2.msra.mxu1 %v5589_v0 }
 0xb20   :  { %5800 = vmatprep.subr.mxu1 %v9625_v60  ;;  %v5392_v8 = vpop.permute.xlu0 %5391  ;;  %v5484_v40 = vpop.permute.xlu1 %5483 }
 0xb21   :  { %5801 = vmatpush2.msra.mxu1 %v9632_v29  ;;  %v5499_v62 = vsel %vm437_vm1, %v9764_v9, %v5484_v40  ;;  %v5500_v13 = vsel %vm437_vm1, %v5484_v40, %v5486_v39  ;;  %v6255_v29 = vunpack.i.h.bf16 %v9332_v26  ;;  %v5407_v17 = vsel %vm390_vm2, %v9770_v52, %v5392_v8  ;;  %v10392_v40 = vld [vmem:[#allocation36_spill] sm:$0xff] }
 0xb22   :  { %5803 = vmatmul.mubr.f32.vlgmr.msra.gmra.mxu1 %v9837_v45  ;;  %5809 = vmatprep.subr.mxu0 %v5500_v13 }
 0xb23   :  { %6106 = vmatprep.mubr.msk.f32.mxu1 %vm1894_vm9, %v9522_v42  ;;  %5810 = vmatpush1.msra.mxu0 %v5499_v62  ;;  %v5496_v2 = vsel %vm437_vm1, %v9612_v6, %v6255_v29 }
 0xb24   :  { %v5396_v48 = vpop.permute.xlu0 %5395  ;;  %v5488_v60 = vpop.permute.xlu1 %5487  ;;  %5811 = vmatprep.subr.mxu0 %v9648_v55  ;;  %v6260_v55 = vunpack.i.h.bf16 %v9330_v35 }
 0xb25   :  { %v5501_v33 = vsel %vm437_vm1, %v5486_v39, %v5488_v60  ;;  %5812 = vmatpush1.msra.mxu0 %v9604_v61  ;;  %v5502_v9 = vsel %vm437_vm1, %v5488_v60, %v6254_v41  ;;  %v5410_v20 = vsel %vm390_vm2, %v5396_v48, %v6259_v19  ;;  %v10394_v19 = vld [vmem:[#allocation73_spill] sm:$0xff] }
 0xb26   :  { %5880 = vmatprep.subr.mxu1 %v5502_v9  ;;  %v5404_v56 = vsel %vm390_vm2, %v9665_v53, %v6260_v55  ;;  %v10393_v9 = vld [vmem:[#allocation68_spill] sm:$0xff] }
 0xb27   :  { %5881 = vmatpush1.msra.mxu1 %v5501_v33 }
 0xb28   :  { %v5302_v42 = vpop.permute.xlu0 %5301  ;;  %v5394_v7 = vpop.permute.xlu1 %5393  ;;  %5882 = vmatprep.subr.mxu1 %v5496_v2 }
 0xb29   :  { %v5409_v26 = vsel %vm390_vm2, %v5394_v7, %v5396_v48  ;;  %5883 = vmatpush1.msra.mxu1 %v9645_v16  ;;  %v5408_v61 = vsel %vm390_vm2, %v5392_v8, %v5394_v7  ;;  %v10391_v8 = vld [vmem:[#allocation100_spill] sm:$0xff] }
 0xb2a   :  { %5813 = vmatprep.subr.mxu0 %v5408_v61  ;;  %5884 = vmatprep.subr.mxu1 %v5410_v20  ;;  %v10395_v61 = vld [vmem:[#allocation33_spill] sm:$0xff] }
 0xb2b   :  { %5814 = vmatpush1.msra.mxu0 %v5407_v17  ;;  %5885 = vmatpush1.msra.mxu1 %v5409_v26 }
 0xb2c   :  { %v5184_v6 = vpop.permute.xlu0 %5183  ;;  %v5300_v35 = vpop.permute.xlu1 %5299  ;;  %5815 = vmatprep.subr.mxu0 %v9659_v30  ;;  %5886 = vmatprep.subr.mxu1 %v5404_v56  ;;  %v6265_v30 = vunpack.i.h.bf16 %v9336_v50 }
 0xb2d   :  { %v5315_v16 = vsel %vm343_vm3, %v9777_v28, %v5300_v35  ;;  %5816 = vmatpush1.msra.mxu0 %v9656_v47  ;;  %5887 = vmatpush1.msra.mxu1 %v9669_v44  ;;  %v5316_v52 = vsel %vm343_vm3, %v5300_v35, %v5302_v42 }
 0xb2e   :  { %5817 = vmatprep.subr.mxu0 %v5316_v52  ;;  %v5312_v44 = vsel %vm343_vm3, %v9641_v38, %v6265_v30  ;;  %v10398_v52 = vld [vmem:[#allocation38_spill] sm:$0xff] }
 0xb2f   :  { %5818 = vmatpush1.msra.mxu0 %v5315_v16  ;;  %v10397_v16 = vld [vmem:[#allocation70_spill] sm:$0xff] }
 0xb30   :  { %v5188_v37 = vpop.permute.xlu0 %5187  ;;  %v5304_v51 = vpop.permute.xlu1 %5303  ;;  %5819 = vmatprep.subr.mxu0 %v9680_v22  ;;  %v10385_v22 = vld [vmem:[#allocation67_spill] sm:$0xff] }
 0xb31   :  { %v5317_v53 = vsel %vm343_vm3, %v5302_v42, %v5304_v51  ;;  %5820 = vmatpush1.msra.mxu0 %v9635_v25  ;;  %v5318_v28 = vsel %vm343_vm3, %v5304_v51, %v6264_v32 }
 0xb32   :  { %5821 = vmatprep.subr.mxu0 %v9556_v1  ;;  %5888 = vmatprep.subr.mxu1 %v5318_v28  ;;  %v5199_v1 = vsel %vm284_vm4, %v9784_v49, %v5184_v6 }
 0xb33   :  { %5822 = vmatpush1.msra.mxu0 %v9477_v18  ;;  %5889 = vmatpush1.msra.mxu1 %v5317_v53  ;;  %v10384_v18 = vld [vmem:[#allocation71_spill] sm:$0xff] }
 0xb34   :  { %v5092_v47 = vpop.permute.xlu0 %5091  ;;  %v5186_v36 = vpop.permute.xlu1 %5185  ;;  %5823 = vmatprep.subr.mxu0 %v9387_v11  ;;  %5890 = vmatprep.subr.mxu1 %v5312_v44  ;;  %v10386_v11 = vld [vmem:[#allocation99_spill] sm:$0xff] }
 0xb35   :  { %5824 = vmatpush1.msra.mxu0 %v9347_v10  ;;  %5891 = vmatpush1.msra.mxu1 %v9677_v27  ;;  %v5200_v50 = vsel %vm284_vm4, %v5184_v6, %v5186_v36  ;;  %v10387_v10 = vld [vmem:[#allocation66_spill] sm:$0xff]  ;;  %v10388_v27 = vld [vmem:[#allocation103_spill] sm:$0xff]  ;;  %v5201_v49 = vsel %vm284_vm4, %v5186_v36, %v5188_v37  ;;  %v5107_v34 = vsel %vm237_vm5, %v9791_v43, %v5092_v47  ;;  %v10396_v6 = vld [vmem:[#allocation32_spill] sm:$0xff] }
 0xb36   :  { %5825 = vmatprep.subr.mxu0 %v5200_v50  ;;  %5892 = vmatprep.subr.mxu1 %v9568_v58 }
 0xb37   :  { %5826 = vmatpush1.msra.mxu0 %v5199_v1  ;;  %5893 = vmatpush1.msra.mxu1 %v10384_v18 }
 0xb38   :  { %v5096_v25 = vpop.permute.xlu0 %5095  ;;  %v5190_v38 = vpop.permute.xlu1 %5189  ;;  %5827 = vmatprep.subr.mxu0 %v10385_v22  ;;  %5894 = vmatprep.subr.mxu1 %v10386_v11 }
 0xb39   :  { %5828 = vmatpush1.msra.mxu0 %v10387_v10  ;;  %5895 = vmatpush1.msra.mxu1 %v10388_v27  ;;  %v5202_v5 = vsel %vm284_vm4, %v5188_v37, %v5190_v38 }
 0xb3a   :  { %5896 = vmatprep.subr.mxu1 %v5202_v5 }
 0xb3b   :  { %5897 = vmatpush1.msra.mxu1 %v5201_v49 }
 0xb3c   :  { %v5000_v58 = vpop.permute.xlu0 %4999  ;;  %v5094_v4 = vpop.permute.xlu1 %5093  ;;  %5898 = vmatprep.subr.mxu1 %v10389_v54 }
 0xb3d   :  { %5899 = vmatpush1.msra.mxu1 %v10390_v23  ;;  %v5108_v39 = vsel %vm237_vm5, %v5092_v47, %v5094_v4  ;;  %v5109_v13 = vsel %vm237_vm5, %v5094_v4, %v5096_v25  ;;  %v5015_v60 = vsel %vm190_vm6, %v9802_v59, %v5000_v58 }
 0xb3e   :  { %5829 = vmatprep.subr.mxu0 %v5108_v39 }
 0xb3f   :  { %5830 = vmatpush1.msra.mxu0 %v5107_v34 }
 0xb40   :  { %v5004_v12 = vpop.permute.xlu0 %5003  ;;  %v5098_v0 = vpop.permute.xlu1 %5097  ;;  %5831 = vmatprep.subr.mxu0 %v10391_v8 }
 0xb41   :  { %5832 = vmatpush1.msra.mxu0 %v10392_v40  ;;  %v5110_v62 = vsel %vm237_vm5, %v5096_v25, %v5098_v0 }
 0xb42   :  { %5900 = vmatprep.subr.mxu1 %v5110_v62 }
 0xb43   :  { %5901 = vmatpush1.msra.mxu1 %v5109_v13 }
 0xb44   :  { %v4908_v41 = vpop.permute.xlu0 %4907  ;;  %v5002_v48 = vpop.permute.xlu1 %5001  ;;  %5902 = vmatprep.subr.mxu1 %v9725_v63 }
 0xb45   :  { %5903 = vmatpush1.msra.mxu1 %v9722_v31  ;;  %v5016_v43 = vsel %vm190_vm6, %v5000_v58, %v5002_v48  ;;  %v5017_v2 = vsel %vm190_vm6, %v5002_v48, %v5004_v12  ;;  %v4923_v7 = vsel %vm143_vm7, %v9812_v15, %v4908_v41 }
 0xb46   :  { %5833 = vmatprep.subr.mxu0 %v5016_v43 }
 0xb47   :  { %5834 = vmatpush1.msra.mxu0 %v5015_v60 }
 0xb48   :  { %v4912_v29 = vpop.permute.xlu0 %4911  ;;  %v5006_v33 = vpop.permute.xlu1 %5005  ;;  %5835 = vmatprep.subr.mxu0 %v10393_v9 }
 0xb49   :  { %5836 = vmatpush1.msra.mxu0 %v10394_v19  ;;  %v5018_v42 = vsel %vm190_vm6, %v5004_v12, %v5006_v33 }
 0xb4a   :  { %5904 = vmatprep.subr.mxu1 %v5018_v42 }
 0xb4b   :  { %5905 = vmatpush1.msra.mxu1 %v5017_v2 }
 0xb4c   :  { %v5576_v31 = vpop.permute.xlu0 %5575  ;;  %v4910_v63 = vpop.permute.xlu1 %4909  ;;  %5906 = vmatprep.subr.mxu1 %v9742_v3 }
 0xb4d   :  { %5907 = vmatpush1.msra.mxu1 %v9739_v24  ;;  %v4924_v59 = vsel %vm143_vm7, %v4908_v41, %v4910_v63  ;;  %v4925_v17 = vsel %vm143_vm7, %v4910_v63, %v4912_v29  ;;  %v5591_v56 = vsel %vm484_vm0, %v9822_v21, %v5576_v31 }
 0xb4e   :  { %5837 = vmatprep.subr.mxu0 %v4924_v59 }
 0xb4f   :  { %5838 = vmatpush1.msra.mxu0 %v4923_v7 }
 0xb50   :  { %v4914_v55 = vpop.permute.xlu1 %4913  ;;  %5839 = vmatprep.subr.mxu0 %v9749_v14  ;;  %v5580_v26 = vpop.permute.xlu0 %5579 }
 0xb51   :  { %5840 = vmatpush1.msra.mxu0 %v10395_v61  ;;  %v4926_v20 = vsel %vm143_vm7, %v4912_v29, %v4914_v55  ;;  %v5594_v14 = vsel %vm484_vm0, %v5580_v26, %v10396_v6 }
 0xb52   :  { %5908 = vmatprep.subr.mxu1 %v4926_v20 }
 0xb53   :  { %5909 = vmatpush1.msra.mxu1 %v4925_v17 }
 0xb54   :  { %v5578_v24 = vpop.permute.xlu1 %5577  ;;  %5910 = vmatprep.subr.mxu1 %v9755_v57  ;;  %v5566_v35 = vpop.permute.xlu0 %5565  ;;  %v5586_v57 = vsel %vm484_vm0, %v10398_v52, %v10397_v16 }
 0xb55   :  { %v5593_v3 = vsel %vm484_vm0, %v5578_v24, %v5580_v26  ;;  %5911 = vmatpush1.msra.mxu1 %v9752_v46  ;;  %v5592_v15 = vsel %vm484_vm0, %v5576_v31, %v5578_v24  ;;  %v10399_v46 = vld [vmem:[#allocation40_spill] sm:$0xff]  ;;  %v5587_v51 = vsel %vm484_vm0, %v10397_v16, %v5566_v35 }
 0xb56   :  { %5869 = vmatprep.subr.mxu0 %v5592_v15  ;;  %5940 = vmatprep.subr.mxu1 %v5594_v14 }
 0xb57   :  { %5870 = vmatpush2.msra.mxu0 %v5591_v56  ;;  %5941 = vmatpush2.msra.mxu1 %v5593_v3 }
 0xb58   :  { %v5568_v32 = vpop.permute.xlu1 %5567  ;;  %5871 = vmatprep.subr.mxu0 %v5586_v57 }
 0xb59   :  { %5872 = vmatpush2.msra.mxu0 %v10399_v46  ;;  %v5588_v37 = vsel %vm484_vm0, %v5566_v35, %v5568_v32 }
 0xb5a   :  { %5874 = vmatmul.mubr.f32.vlgmr.msra.gmra.mxu0 %v9837_v45  ;;  %5942 = vmatprep.subr.mxu1 %v5588_v37 }
 0xb5b   :  { %5943 = vmatpush2.msra.mxu1 %v5587_v51 }
 0xb5c   :  { %5945 = vmatmul.mubr.f32.vlgmr.msra.gmra.mxu1 %v9837_v45 }
 0xb61   :  { %v5733_v21 = vpop.permute.xlu0 %5732 }
 0xbe2   :  { %v5804_v30 = vpop.f32.mrf.mxu1 }
 0xbe3   :  { %v5805_v53 = vadd.f32 %v5804_v30, %v5733_v21 }
 0xbe4   :  { %v5806_v28 = vpop.f32.mrf.mxu1 }
 0xbe5   :  { %v5951_v47 = vrot.slane %v5805_v53, 4  ;;  %v5807_v44 = vadd.f32 %v5806_v28, %v5733_v21 }
 0xbe7   :  { %v5952_v36 = vmax.f32 %v5805_v53, %v5951_v47  ;;  %v5957_v50 = vrot.slane %v5807_v44, 4 }
 0xbe9   :  { %v5953_v1 = vrot.slane %v5952_v36, 2  ;;  %v5958_v18 = vmax.f32 %v5807_v44, %v5957_v50 }
 0xbeb   :  { %v5954_v25 = vmax.f32 %v5952_v36, %v5953_v1  ;;  %v5959_v38 = vrot.slane %v5958_v18, 2 }
 0xbed   :  { %v5955_v22 = vrot.slane %v5954_v25, 1  ;;  %v5960_v11 = vmax.f32 %v5958_v18, %v5959_v38 }
 0xbef   :  { %v5956_v10 = vmax.f32 %v5954_v25, %v5955_v22  ;;  %v5961_v27 = vrot.slane %v5960_v11, 1 }
 0xbf1   :  { %v5987_v5 = vsub.f32 %v5805_v53, %v5956_v10  ;;  %v5962_v49 = vmax.f32 %v5960_v11, %v5961_v27 }
 0xbf3   :  { %v5993_v58 = vmul.f32 1.442695, %v5987_v5  ;;  %v5988_v45 = vsub.f32 %v5807_v44, %v5962_v49 }
 0xbf5   :  { %6282 = vpow2.f32 %v5993_v58  ;;  %v5995_v4 = vmul.f32 1.442695, %v5988_v45 }
 0xbf7   :  { %6284 = vpow2.f32 %v5995_v4 }
 0xc02   :  { %v6283_v54 = vpop.eup %6282 }
 0xc03   :  { %v6005_v23 = vrot.slane %v6283_v54, 4 }
 0xc04   :  { %v6285_v39 = vpop.eup %6284 }
 0xc05   :  { %v6011_v34 = vrot.slane %v6285_v39, 4  ;;  %v6006_v12 = vadd.f32 %v6283_v54, %v6005_v23 }
 0xc07   :  { %v6007_v0 = vrot.slane %v6006_v12, 2  ;;  %v6012_v8 = vadd.f32 %v6285_v39, %v6011_v34 }
 0xc09   :  { %v6008_v40 = vadd.f32 %v6007_v0, %v6006_v12  ;;  %v6013_v62 = vrot.slane %v6012_v8, 2 }
 0xc0b   :  { %v6009_v13 = vrot.slane %v6008_v40, 1  ;;  %v6014_v41 = vadd.f32 %v6013_v62, %v6012_v8 }
 0xc0d   :  { %v6010_v48 = vadd.f32 %v6009_v13, %v6008_v40  ;;  %v6015_v43 = vrot.slane %v6014_v41, 1 }
 0xc0f   :  { %v6016_v60 = vadd.f32 %v6015_v43, %v6014_v41  ;;  %6286 = vrcp.f32 %v6010_v48 }
 0xc11   :  { %6288 = vrcp.f32 %v6016_v60 }
 0xc1a   :  { %v5875_v29 = vpop.f32.mrf.mxu0 }
 0xc1b   :  { %v5876_v9 = vadd.f32 %v5875_v29, %v5733_v21 }
 0xc1c   :  { %v6287_v33 = vpop.eup %6286  ;;  %v5877_v19 = vpop.f32.mrf.mxu0 }
 0xc1d   :  { %v5946_v42 = vpop.f32.mrf.mxu1  ;;  %v6053_v2 = vmul.f32 %v6287_v33, %v6283_v54  ;;  %v5963_v63 = vrot.slane %v5876_v9, 4  ;;  %v5878_v59 = vadd.f32 %v5877_v19, %v5733_v21 }
 0xc1e   :  { %v6289_v31 = vpop.eup %6288  ;;  %v5947_v7 = vadd.f32 %v5946_v42, %v5733_v21 }
 0xc1f   :  { %v5948_v55 = vpop.f32.mrf.mxu1  ;;  %v6054_v26 = vmul.f32 %v6289_v31, %v6285_v39  ;;  %6059 = vst [vmem:[#allocation8] sm:$0xff] %v6053_v2  ;;  %v5964_v61 = vmax.f32 %v5876_v9, %v5963_v63  ;;  %v5969_v20 = vrot.slane %v5878_v59, 4 }
 0xc20   :  { %v5975_v17 = vrot.slane %v5947_v7, 4  ;;  %v5949_v24 = vadd.f32 %v5948_v55, %v5733_v21 }
 0xc21   :  { %6060 = vst [vmem:[#allocation8 + $0x8] sm:$0xff] %v6054_v26  ;;  %v5965_v3 = vrot.slane %v5964_v61, 2  ;;  %v5970_v15 = vmax.f32 %v5878_v59, %v5969_v20 }
 0xc22   :  { %v5976_v6 = vmax.f32 %v5947_v7, %v5975_v17  ;;  %v5981_v14 = vrot.slane %v5949_v24, 4 }
 0xc23   :  { %v5966_v56 = vmax.f32 %v5964_v61, %v5965_v3  ;;  %v5971_v35 = vrot.slane %v5970_v15, 2 }
 0xc24   :  { %v5977_v16 = vrot.slane %v5976_v6, 2  ;;  %v5982_v52 = vmax.f32 %v5949_v24, %v5981_v14 }
 0xc25   :  { %v5967_v57 = vrot.slane %v5966_v56, 1  ;;  %v5972_v32 = vmax.f32 %v5970_v15, %v5971_v35 }
 0xc26   :  { %v5978_v46 = vmax.f32 %v5976_v6, %v5977_v16  ;;  %v5983_v37 = vrot.slane %v5982_v52, 2 }
 0xc27   :  { %v5968_v51 = vmax.f32 %v5966_v56, %v5967_v57  ;;  %v5973_v30 = vrot.slane %v5972_v32, 1 }
 0xc28   :  { %v5979_v53 = vrot.slane %v5978_v46, 1  ;;  %v5984_v28 = vmax.f32 %v5982_v52, %v5983_v37 }
 0xc29   :  { %v5989_v47 = vsub.f32 %v5876_v9, %v5968_v51  ;;  %v5974_v44 = vmax.f32 %v5972_v32, %v5973_v30 }
 0xc2a   :  { %v5980_v21 = vmax.f32 %v5978_v46, %v5979_v53  ;;  %v5985_v36 = vrot.slane %v5984_v28, 1 }
 0xc2b   :  { %v5997_v50 = vmul.f32 1.442695, %v5989_v47  ;;  %v5990_v1 = vsub.f32 %v5878_v59, %v5974_v44 }
 0xc2c   :  { %v5991_v18 = vsub.f32 %v5947_v7, %v5980_v21  ;;  %v5986_v25 = vmax.f32 %v5984_v28, %v5985_v36 }
 0xc2d   :  { %6290 = vpow2.f32 %v5997_v50  ;;  %v5999_v38 = vmul.f32 1.442695, %v5990_v1 }
 0xc2e   :  { %v6001_v22 = vmul.f32 1.442695, %v5991_v18  ;;  %v5992_v11 = vsub.f32 %v5949_v24, %v5986_v25 }
 0xc2f   :  { %6292 = vpow2.f32 %v5999_v38 }
 0xc30   :  { %v6003_v10 = vmul.f32 1.442695, %v5992_v11  ;;  %6294 = vpow2.f32 %v6001_v22 }
 0xc32   :  { %6296 = vpow2.f32 %v6003_v10 }
 0xc3a   :  { %v6291_v27 = vpop.eup %6290 }
 0xc3b   :  { %v6017_v5 = vrot.slane %v6291_v27, 4 }
 0xc3c   :  { %v6293_v49 = vpop.eup %6292 }
 0xc3d   :  { %v6295_v58 = vpop.eup %6294  ;;  %v6023_v45 = vrot.slane %v6293_v49, 4  ;;  %v6018_v4 = vadd.f32 %v6291_v27, %v6017_v5 }
 0xc3e   :  { %v6029_v23 = vrot.slane %v6295_v58, 4 }
 0xc3f   :  { %v6297_v54 = vpop.eup %6296  ;;  %v6019_v34 = vrot.slane %v6018_v4, 2  ;;  %v6024_v12 = vadd.f32 %v6293_v49, %v6023_v45 }
 0xc40   :  { %v6035_v39 = vrot.slane %v6297_v54, 4  ;;  %v6030_v0 = vadd.f32 %v6295_v58, %v6029_v23 }
 0xc41   :  { %v6020_v8 = vadd.f32 %v6019_v34, %v6018_v4  ;;  %v6025_v40 = vrot.slane %v6024_v12, 2 }
 0xc42   :  { %v6036_v62 = vadd.f32 %v6297_v54, %v6035_v39  ;;  %v6031_v13 = vrot.slane %v6030_v0, 2 }
 0xc43   :  { %v6021_v41 = vrot.slane %v6020_v8, 1  ;;  %v6026_v48 = vadd.f32 %v6025_v40, %v6024_v12 }
 0xc44   :  { %v6037_v43 = vrot.slane %v6036_v62, 2  ;;  %v6032_v60 = vadd.f32 %v6031_v13, %v6030_v0 }
 0xc45   :  { %v6022_v29 = vadd.f32 %v6021_v41, %v6020_v8  ;;  %v6027_v33 = vrot.slane %v6026_v48, 1 }
 0xc46   :  { %v6038_v9 = vadd.f32 %v6037_v43, %v6036_v62  ;;  %v6033_v19 = vrot.slane %v6032_v60, 1 }
 0xc47   :  { %v6028_v42 = vadd.f32 %v6027_v33, %v6026_v48  ;;  %6298 = vrcp.f32 %v6022_v29 }
 0xc48   :  { %v6039_v2 = vrot.slane %v6038_v9, 1  ;;  %v6034_v31 = vadd.f32 %v6033_v19, %v6032_v60 }
 0xc49   :  { %6300 = vrcp.f32 %v6028_v42 }
 0xc4a   :  { %v6040_v63 = vadd.f32 %v6039_v2, %v6038_v9  ;;  %6302 = vrcp.f32 %v6034_v31 }
 0xc4c   :  { %6304 = vrcp.f32 %v6040_v63 }
 0xc54   :  { %v6299_v59 = vpop.eup %6298 }
 0xc55   :  { %v6055_v7 = vmul.f32 %v6299_v59, %v6291_v27 }
 0xc56   :  { %v6301_v55 = vpop.eup %6300 }
 0xc57   :  { %v6303_v26 = vpop.eup %6302  ;;  %v6056_v61 = vmul.f32 %v6301_v55, %v6293_v49  ;;  %6061 = vst [vmem:[#allocation8 + $0x10] sm:$0xff] %v6055_v7 }
 0xc58   :  { %v6057_v17 = vmul.f32 %v6303_v26, %v6295_v58 }
 0xc59   :  { %v6305_v20 = vpop.eup %6304  ;;  %6062 = vst [vmem:[#allocation8 + $0x18] sm:$0xff] %v6056_v61 }
 0xc5a   :  { %v6058_v24 = vmul.f32 %v6305_v20, %v6297_v54  ;;  %6063 = vst [vmem:[#allocation8 + $0x20] sm:$0xff] %v6057_v17 }
 0xc5c   :  { %6064 = vst [vmem:[#allocation8 + $0x28] sm:$0xff] %v6058_v24 }
 0xc5d   :  { %6338 = shalt.err (!%p6335_p9)
}
 0xc5e   :  { %6074 = dma.vmem_to_hbm [thread:$0]  %s6072_s20, 768, %s9958_s16, [#allocation7]  }
 0xc5f   :  { %6349 = dma.done.wait [#allocation7], 768  }
 0xc60   :  { %6350 = vsyncadd [#allocation7], 4294966528 }
 0xc61   :  { %6078 = vsyncpa [#allocation6], 1 }
 0xc62   :  { %6079 = vsyncpa [#allocation7], 1 }

</bundles_post_ra>
